<compile_context>
chip_gen: v5e
topology: v5e:2x2
jax: 0.10.0
libtpu: 0.0.40
codegen_flags: <defaults>
</compile_context>

<pallas_src>
import math

import jax
import jax.numpy as jnp
from jax import lax
from jax.experimental import pallas as pl
from jax.experimental.pallas import tpu as pltpu

D_HIDDEN = 12
LANES = 128            # lane width of the flattened-batch layout
CHUNK_ROWS = 8         # (CHUNK_ROWS, LANES) f32 = exactly one vreg per activation
TILE_ROWS_MAX = 1024   # rows per grid step -> 1024*128*4 B = 512 KiB per block
_LOG_SQRT_2PI = 0.5 * math.log(2.0 * math.pi)

# v6e/v7x-only option: run the 12->12 hidden layers in bf16 (2x packed VALU
# throughput); final noise/log_pe math stays f32.  Keep False on v5e (no bf16
# VALU) or whenever strict ~2e-5 f32 accuracy is required.
USE_BF16_HIDDEN = False

# Offsets into the packed parameter vector (static Python ints).
_O_W1 = 0
_O_B1 = _O_W1 + D_HIDDEN
_O_W2 = _O_B1 + D_HIDDEN
_O_B2 = _O_W2 + D_HIDDEN * D_HIDDEN
_O_W3 = _O_B2 + D_HIDDEN
_O_B3 = _O_W3 + D_HIDDEN * D_HIDDEN
_O_W4 = _O_B3 + D_HIDDEN
_O_B4 = _O_W4 + D_HIDDEN
_O_INV_SCALE = _O_B4 + 1        # exp(-s)
_O_T_SCALED = _O_INV_SCALE + 1  # t * exp(-s)
_N_THETA = _O_T_SCALED + 1


def _tree_sum(terms):
    """Pairwise (tree) reduction -> shorter dep chain than a serial sum()."""
    while len(terms) > 1:
        nxt = [terms[i] + terms[i + 1] for i in range(0, len(terms) - 1, 2)]
        if len(terms) % 2:
            nxt.append(terms[-1])
        terms = nxt
    return terms[0]


def affine_flow_kernel(theta_ref, x_ref, y_ref, o_ref):
    """One (tile_rows, LANES) block; every element is an independent sample."""
    hdt = jnp.bfloat16 if USE_BF16_HIDDEN else jnp.float32
    n_chunks = x_ref.shape[0] // CHUNK_ROWS          # static at trace time

    inv_scale = theta_ref[_O_INV_SCALE]              # exp(-s), precomputed
    t_scaled = theta_ref[_O_T_SCALED]                # t * exp(-s), precomputed
    b4 = theta_ref[_O_B4]

    def chunk_body(c, carry):
        r = pl.multiple_of(c * CHUNK_ROWS, CHUNK_ROWS)
        x = x_ref[pl.ds(r, CHUNK_ROWS), :]

        # Layer 1 (1 -> 12): K=1, pure scalar-broadcast FMA + ReLU on the VPU.
        h = [jnp.maximum(x * theta_ref[_O_W1 + j] + theta_ref[_O_B1 + j],
                         0.0).astype(hdt)
             for j in range(D_HIDDEN)]

        # Layers 2 & 3 (12 -> 12): scalar-broadcast FMAs, tree-summed.  Each
        # activation is one vreg, so the whole hidden state stays register-
        # resident across the layer transition (no VMEM spill traffic).
        for o_w, o_b in ((_O_W2, _O_B2), (_O_W3, _O_B3)):
            h = [jnp.maximum(
                     _tree_sum([h[k] * theta_ref[o_w + k * D_HIDDEN + j].astype(hdt)
                                for k in range(D_HIDDEN)])
                     + theta_ref[o_b + j].astype(hdt),
                     0.0)
                 for j in range(D_HIDDEN)]

        # Layer 4 (12 -> 1): accumulate in f32.
        h_out = _tree_sum([h[k].astype(jnp.float32) * theta_ref[_O_W4 + k]
                           for k in range(D_HIDDEN)]) + b4

        y = y_ref[pl.ds(r, CHUNK_ROWS), :]
        # (y - t) / exp(s) == y*exp(-s) - t*exp(-s): no vector divide, no exp.
        noise = y * inv_scale - t_scaled - h_out
        o_ref[pl.ds(r, CHUNK_ROWS), :] = (-0.5 * (noise * noise)
                                          - jnp.float32(_LOG_SQRT_2PI))
        return carry

    lax.fori_loop(0, n_chunks, chunk_body, 0)


def init_params(key):
    """Deterministic synthetic parameters (shapes from AffineFlow.__init__)."""
    ks = jax.random.split(key, 10)
    return {
        "W1": jax.random.normal(ks[0], (1, D_HIDDEN), jnp.float32) * 0.5,
        "b1": jax.random.normal(ks[1], (D_HIDDEN,), jnp.float32) * 0.1,
        "W2": jax.random.normal(ks[2], (D_HIDDEN, D_HIDDEN), jnp.float32) * 0.3,
        "b2": jax.random.normal(ks[3], (D_HIDDEN,), jnp.float32) * 0.1,
        "W3": jax.random.normal(ks[4], (D_HIDDEN, D_HIDDEN), jnp.float32) * 0.3,
        "b3": jax.random.normal(ks[5], (D_HIDDEN,), jnp.float32) * 0.1,
        "W4": jax.random.normal(ks[6], (D_HIDDEN, 1), jnp.float32) * 0.3,
        "b4": jax.random.normal(ks[7], (1,), jnp.float32) * 0.1,
        "s": jax.random.normal(ks[8], (), jnp.float32),
        "t": jax.random.normal(ks[9], (), jnp.float32),
    }


def _round_up(v, m):
    return ((v + m - 1) // m) * m


def _pack_theta(params):
    """Pack all weights/biases + exp(-s), t*exp(-s) into one SMEM-bound vector."""
    inv_scale = jnp.exp(-params["s"])
    theta = jnp.concatenate([
        params["W1"].reshape(-1), params["b1"].reshape(-1),
        params["W2"].reshape(-1), params["b2"].reshape(-1),
        params["W3"].reshape(-1), params["b3"].reshape(-1),
        params["W4"].reshape(-1), params["b4"].reshape(-1),
        jnp.stack([inv_scale, params["t"] * inv_scale]),
    ]).astype(jnp.float32)
    assert theta.shape == (_N_THETA,)
    return theta


@jax.jit
def affine_flow_forward(X, Y, params):
    """X, Y: (N, 1) float32. Returns (log_pe (N, 1), log_det scalar)."""
    N = X.shape[0]

    # Static tiling math (trace time).
    rows_needed = _round_up(max(1, pl.cdiv(N, LANES)), CHUNK_ROWS)
    tile_rows = min(TILE_ROWS_MAX, rows_needed)
    # v7x has two TensorCores; make sure the "parallel" batch axis has at
    # least two (roughly balanced) grid steps whenever there is enough work.
    if rows_needed >= 2 * CHUNK_ROWS and rows_needed // tile_rows < 2:
        tile_rows = _round_up(pl.cdiv(rows_needed, 2), CHUNK_ROWS)
    n_blocks = pl.cdiv(rows_needed, tile_rows)
    rows_pad = n_blocks * tile_rows
    n_pad = rows_pad * LANES

    def to_lanes(v):
        flat = v.reshape(-1).astype(jnp.float32)
        return jnp.pad(flat, (0, n_pad - N)).reshape(rows_pad, LANES)

    x2 = to_lanes(X)
    y2 = to_lanes(Y)
    theta = _pack_theta(params)

    smem = pl.BlockSpec(memory_space=pltpu.MemorySpace.SMEM)
    tile = pl.BlockSpec((tile_rows, LANES), lambda i: (i, 0))

    log_pe2 = pl.pallas_call(
        affine_flow_kernel,
        out_shape=jax.ShapeDtypeStruct((rows_pad, LANES), jnp.float32),
        grid=(n_blocks,),
        in_specs=[smem, tile, tile],
        out_specs=tile,
        compiler_params=pltpu.CompilerParams(
            dimension_semantics=("parallel",)),
    )(theta, x2, y2)

    log_pe = log_pe2.reshape(n_pad)[:N].reshape(N, 1)
    log_det = -params["s"]      # trivially -s; no kernel writeback needed
    return log_pe, log_det


def reference_forward(X, Y, params):
    """Pure-JAX reference for correctness check (matches the PyTorch module)."""
    h = jnp.maximum(X @ params["W1"] + params["b1"], 0.0)
    h = jnp.maximum(h @ params["W2"] + params["b2"], 0.0)
    h = jnp.maximum(h @ params["W3"] + params["b3"], 0.0)
    h = h @ params["W4"] + params["b4"]
    noise = (Y - params["t"]) / jnp.exp(params["s"]) - h
    log_pe = -0.5 * noise * noise - _LOG_SQRT_2PI
    return log_pe, -params["s"]


if __name__ == "__main__":
    key = jax.random.PRNGKey(0)
    k_params, k_x, k_y = jax.random.split(key, 3)

    N = 16  # small batch of (n x 1) samples
    X = jax.random.normal(k_x, (N, 1), jnp.float32)
    Y = jax.random.normal(k_y, (N, 1), jnp.float32)
    params = init_params(k_params)

    log_pe, log_det = affine_flow_forward(X, Y, params)
    jax.block_until_ready((log_pe, log_det))

    ref_pe, ref_det = reference_forward(X, Y, params)
    assert log_pe.shape == (N, 1)
    assert jnp.allclose(log_pe, ref_pe, atol=2e-5, rtol=1e-5)
    assert jnp.allclose(log_det, ref_det, atol=1e-6)

    print("KERNEL_OK")
</pallas_src>

<mosaic_0001>
module attributes {stable_mosaic.version = 11 : i64} {
  func.func @affine_flow_kernel(%arg0: i32, %arg1: memref<351xf32, #tpu.memory_space<smem>>, %arg2: memref<8x128xf32, #tpu.memory_space<vmem>>, %arg3: memref<8x128xf32, #tpu.memory_space<vmem>>, %arg4: memref<8x128xf32, #tpu.memory_space<vmem>>) attributes {dimension_semantics = [#tpu.dimension_semantics<parallel>], iteration_bounds = array<i64: 1>, scalar_prefetch = 0 : i64, scratch_operands = 0 : i64, tpu.core_type = #tpu.core_type<tc>, window_params = [{transform_indices = @transform_0, window_bounds = array<i64: 351>}, {transform_indices = @transform_1, window_bounds = array<i64: 8, 128>}, {transform_indices = @transform_2, window_bounds = array<i64: 8, 128>}, {transform_indices = @transform_3, window_bounds = array<i64: 8, 128>}]} {
    %c349 = arith.constant 349 : index
    %0 = memref.load %arg1[%c349] : memref<351xf32, #tpu.memory_space<smem>>
    %c350 = arith.constant 350 : index
    %1 = memref.load %arg1[%c350] : memref<351xf32, #tpu.memory_space<smem>>
    %c348 = arith.constant 348 : index
    %2 = memref.load %arg1[%c348] : memref<351xf32, #tpu.memory_space<smem>>
    %c0_i32 = arith.constant 0 : i32
    %c8_i32 = arith.constant 8 : i32
    %3 = arith.muli %c0_i32, %c8_i32 : i32
    %4 = tpu.assume_multiple %3, 8 : i32
    %5 = arith.index_cast %4 : i32 to index
    %c0 = arith.constant 0 : index
    %6 = vector.load %arg2[%5, %c0] : memref<8x128xf32, #tpu.memory_space<vmem>>, vector<8x128xf32>
    %c0_0 = arith.constant 0 : index
    %7 = memref.load %arg1[%c0_0] : memref<351xf32, #tpu.memory_space<smem>>
    %8 = vector.broadcast %7 : f32 to vector<8x128xf32>
    %9 = arith.mulf %6, %8 : vector<8x128xf32>
    %c12 = arith.constant 12 : index
    %10 = memref.load %arg1[%c12] : memref<351xf32, #tpu.memory_space<smem>>
    %11 = vector.broadcast %10 : f32 to vector<8x128xf32>
    %12 = arith.addf %9, %11 : vector<8x128xf32>
    %cst = arith.constant 0.000000e+00 : f32
    %13 = vector.broadcast %cst : f32 to vector<8x128xf32>
    %14 = arith.maximumf %12, %13 : vector<8x128xf32>
    %c1 = arith.constant 1 : index
    %15 = memref.load %arg1[%c1] : memref<351xf32, #tpu.memory_space<smem>>
    %16 = vector.broadcast %15 : f32 to vector<8x128xf32>
    %17 = arith.mulf %6, %16 : vector<8x128xf32>
    %c13 = arith.constant 13 : index
    %18 = memref.load %arg1[%c13] : memref<351xf32, #tpu.memory_space<smem>>
    %19 = vector.broadcast %18 : f32 to vector<8x128xf32>
    %20 = arith.addf %17, %19 : vector<8x128xf32>
    %cst_1 = arith.constant 0.000000e+00 : f32
    %21 = vector.broadcast %cst_1 : f32 to vector<8x128xf32>
    %22 = arith.maximumf %20, %21 : vector<8x128xf32>
    %c2 = arith.constant 2 : index
    %23 = memref.load %arg1[%c2] : memref<351xf32, #tpu.memory_space<smem>>
    %24 = vector.broadcast %23 : f32 to vector<8x128xf32>
    %25 = arith.mulf %6, %24 : vector<8x128xf32>
    %c14 = arith.constant 14 : index
    %26 = memref.load %arg1[%c14] : memref<351xf32, #tpu.memory_space<smem>>
    %27 = vector.broadcast %26 : f32 to vector<8x128xf32>
    %28 = arith.addf %25, %27 : vector<8x128xf32>
    %cst_2 = arith.constant 0.000000e+00 : f32
    %29 = vector.broadcast %cst_2 : f32 to vector<8x128xf32>
    %30 = arith.maximumf %28, %29 : vector<8x128xf32>
    %c3 = arith.constant 3 : index
    %31 = memref.load %arg1[%c3] : memref<351xf32, #tpu.memory_space<smem>>
    %32 = vector.broadcast %31 : f32 to vector<8x128xf32>
    %33 = arith.mulf %6, %32 : vector<8x128xf32>
    %c15 = arith.constant 15 : index
    %34 = memref.load %arg1[%c15] : memref<351xf32, #tpu.memory_space<smem>>
    %35 = vector.broadcast %34 : f32 to vector<8x128xf32>
    %36 = arith.addf %33, %35 : vector<8x128xf32>
    %cst_3 = arith.constant 0.000000e+00 : f32
    %37 = vector.broadcast %cst_3 : f32 to vector<8x128xf32>
    %38 = arith.maximumf %36, %37 : vector<8x128xf32>
    %c4 = arith.constant 4 : index
    %39 = memref.load %arg1[%c4] : memref<351xf32, #tpu.memory_space<smem>>
    %40 = vector.broadcast %39 : f32 to vector<8x128xf32>
    %41 = arith.mulf %6, %40 : vector<8x128xf32>
    %c16 = arith.constant 16 : index
    %42 = memref.load %arg1[%c16] : memref<351xf32, #tpu.memory_space<smem>>
    %43 = vector.broadcast %42 : f32 to vector<8x128xf32>
    %44 = arith.addf %41, %43 : vector<8x128xf32>
    %cst_4 = arith.constant 0.000000e+00 : f32
    %45 = vector.broadcast %cst_4 : f32 to vector<8x128xf32>
    %46 = arith.maximumf %44, %45 : vector<8x128xf32>
    %c5 = arith.constant 5 : index
    %47 = memref.load %arg1[%c5] : memref<351xf32, #tpu.memory_space<smem>>
    %48 = vector.broadcast %47 : f32 to vector<8x128xf32>
    %49 = arith.mulf %6, %48 : vector<8x128xf32>
    %c17 = arith.constant 17 : index
    %50 = memref.load %arg1[%c17] : memref<351xf32, #tpu.memory_space<smem>>
    %51 = vector.broadcast %50 : f32 to vector<8x128xf32>
    %52 = arith.addf %49, %51 : vector<8x128xf32>
    %cst_5 = arith.constant 0.000000e+00 : f32
    %53 = vector.broadcast %cst_5 : f32 to vector<8x128xf32>
    %54 = arith.maximumf %52, %53 : vector<8x128xf32>
    %c6 = arith.constant 6 : index
    %55 = memref.load %arg1[%c6] : memref<351xf32, #tpu.memory_space<smem>>
    %56 = vector.broadcast %55 : f32 to vector<8x128xf32>
    %57 = arith.mulf %6, %56 : vector<8x128xf32>
    %c18 = arith.constant 18 : index
    %58 = memref.load %arg1[%c18] : memref<351xf32, #tpu.memory_space<smem>>
    %59 = vector.broadcast %58 : f32 to vector<8x128xf32>
    %60 = arith.addf %57, %59 : vector<8x128xf32>
    %cst_6 = arith.constant 0.000000e+00 : f32
    %61 = vector.broadcast %cst_6 : f32 to vector<8x128xf32>
    %62 = arith.maximumf %60, %61 : vector<8x128xf32>
    %c7 = arith.constant 7 : index
    %63 = memref.load %arg1[%c7] : memref<351xf32, #tpu.memory_space<smem>>
    %64 = vector.broadcast %63 : f32 to vector<8x128xf32>
    %65 = arith.mulf %6, %64 : vector<8x128xf32>
    %c19 = arith.constant 19 : index
    %66 = memref.load %arg1[%c19] : memref<351xf32, #tpu.memory_space<smem>>
    %67 = vector.broadcast %66 : f32 to vector<8x128xf32>
    %68 = arith.addf %65, %67 : vector<8x128xf32>
    %cst_7 = arith.constant 0.000000e+00 : f32
    %69 = vector.broadcast %cst_7 : f32 to vector<8x128xf32>
    %70 = arith.maximumf %68, %69 : vector<8x128xf32>
    %c8 = arith.constant 8 : index
    %71 = memref.load %arg1[%c8] : memref<351xf32, #tpu.memory_space<smem>>
    %72 = vector.broadcast %71 : f32 to vector<8x128xf32>
    %73 = arith.mulf %6, %72 : vector<8x128xf32>
    %c20 = arith.constant 20 : index
    %74 = memref.load %arg1[%c20] : memref<351xf32, #tpu.memory_space<smem>>
    %75 = vector.broadcast %74 : f32 to vector<8x128xf32>
    %76 = arith.addf %73, %75 : vector<8x128xf32>
    %cst_8 = arith.constant 0.000000e+00 : f32
    %77 = vector.broadcast %cst_8 : f32 to vector<8x128xf32>
    %78 = arith.maximumf %76, %77 : vector<8x128xf32>
    %c9 = arith.constant 9 : index
    %79 = memref.load %arg1[%c9] : memref<351xf32, #tpu.memory_space<smem>>
    %80 = vector.broadcast %79 : f32 to vector<8x128xf32>
    %81 = arith.mulf %6, %80 : vector<8x128xf32>
    %c21 = arith.constant 21 : index
    %82 = memref.load %arg1[%c21] : memref<351xf32, #tpu.memory_space<smem>>
    %83 = vector.broadcast %82 : f32 to vector<8x128xf32>
    %84 = arith.addf %81, %83 : vector<8x128xf32>
    %cst_9 = arith.constant 0.000000e+00 : f32
    %85 = vector.broadcast %cst_9 : f32 to vector<8x128xf32>
    %86 = arith.maximumf %84, %85 : vector<8x128xf32>
    %c10 = arith.constant 10 : index
    %87 = memref.load %arg1[%c10] : memref<351xf32, #tpu.memory_space<smem>>
    %88 = vector.broadcast %87 : f32 to vector<8x128xf32>
    %89 = arith.mulf %6, %88 : vector<8x128xf32>
    %c22 = arith.constant 22 : index
    %90 = memref.load %arg1[%c22] : memref<351xf32, #tpu.memory_space<smem>>
    %91 = vector.broadcast %90 : f32 to vector<8x128xf32>
    %92 = arith.addf %89, %91 : vector<8x128xf32>
    %cst_10 = arith.constant 0.000000e+00 : f32
    %93 = vector.broadcast %cst_10 : f32 to vector<8x128xf32>
    %94 = arith.maximumf %92, %93 : vector<8x128xf32>
    %c11 = arith.constant 11 : index
    %95 = memref.load %arg1[%c11] : memref<351xf32, #tpu.memory_space<smem>>
    %96 = vector.broadcast %95 : f32 to vector<8x128xf32>
    %97 = arith.mulf %6, %96 : vector<8x128xf32>
    %c23 = arith.constant 23 : index
    %98 = memref.load %arg1[%c23] : memref<351xf32, #tpu.memory_space<smem>>
    %99 = vector.broadcast %98 : f32 to vector<8x128xf32>
    %100 = arith.addf %97, %99 : vector<8x128xf32>
    %cst_11 = arith.constant 0.000000e+00 : f32
    %101 = vector.broadcast %cst_11 : f32 to vector<8x128xf32>
    %102 = arith.maximumf %100, %101 : vector<8x128xf32>
    %c24 = arith.constant 24 : index
    %103 = memref.load %arg1[%c24] : memref<351xf32, #tpu.memory_space<smem>>
    %104 = vector.broadcast %103 : f32 to vector<8x128xf32>
    %105 = arith.mulf %14, %104 : vector<8x128xf32>
    %c36 = arith.constant 36 : index
    %106 = memref.load %arg1[%c36] : memref<351xf32, #tpu.memory_space<smem>>
    %107 = vector.broadcast %106 : f32 to vector<8x128xf32>
    %108 = arith.mulf %22, %107 : vector<8x128xf32>
    %c48 = arith.constant 48 : index
    %109 = memref.load %arg1[%c48] : memref<351xf32, #tpu.memory_space<smem>>
    %110 = vector.broadcast %109 : f32 to vector<8x128xf32>
    %111 = arith.mulf %30, %110 : vector<8x128xf32>
    %c60 = arith.constant 60 : index
    %112 = memref.load %arg1[%c60] : memref<351xf32, #tpu.memory_space<smem>>
    %113 = vector.broadcast %112 : f32 to vector<8x128xf32>
    %114 = arith.mulf %38, %113 : vector<8x128xf32>
    %c72 = arith.constant 72 : index
    %115 = memref.load %arg1[%c72] : memref<351xf32, #tpu.memory_space<smem>>
    %116 = vector.broadcast %115 : f32 to vector<8x128xf32>
    %117 = arith.mulf %46, %116 : vector<8x128xf32>
    %c84 = arith.constant 84 : index
    %118 = memref.load %arg1[%c84] : memref<351xf32, #tpu.memory_space<smem>>
    %119 = vector.broadcast %118 : f32 to vector<8x128xf32>
    %120 = arith.mulf %54, %119 : vector<8x128xf32>
    %c96 = arith.constant 96 : index
    %121 = memref.load %arg1[%c96] : memref<351xf32, #tpu.memory_space<smem>>
    %122 = vector.broadcast %121 : f32 to vector<8x128xf32>
    %123 = arith.mulf %62, %122 : vector<8x128xf32>
    %c108 = arith.constant 108 : index
    %124 = memref.load %arg1[%c108] : memref<351xf32, #tpu.memory_space<smem>>
    %125 = vector.broadcast %124 : f32 to vector<8x128xf32>
    %126 = arith.mulf %70, %125 : vector<8x128xf32>
    %c120 = arith.constant 120 : index
    %127 = memref.load %arg1[%c120] : memref<351xf32, #tpu.memory_space<smem>>
    %128 = vector.broadcast %127 : f32 to vector<8x128xf32>
    %129 = arith.mulf %78, %128 : vector<8x128xf32>
    %c132 = arith.constant 132 : index
    %130 = memref.load %arg1[%c132] : memref<351xf32, #tpu.memory_space<smem>>
    %131 = vector.broadcast %130 : f32 to vector<8x128xf32>
    %132 = arith.mulf %86, %131 : vector<8x128xf32>
    %c144 = arith.constant 144 : index
    %133 = memref.load %arg1[%c144] : memref<351xf32, #tpu.memory_space<smem>>
    %134 = vector.broadcast %133 : f32 to vector<8x128xf32>
    %135 = arith.mulf %94, %134 : vector<8x128xf32>
    %c156 = arith.constant 156 : index
    %136 = memref.load %arg1[%c156] : memref<351xf32, #tpu.memory_space<smem>>
    %137 = vector.broadcast %136 : f32 to vector<8x128xf32>
    %138 = arith.mulf %102, %137 : vector<8x128xf32>
    %139 = arith.addf %105, %108 : vector<8x128xf32>
    %140 = arith.addf %111, %114 : vector<8x128xf32>
    %141 = arith.addf %117, %120 : vector<8x128xf32>
    %142 = arith.addf %123, %126 : vector<8x128xf32>
    %143 = arith.addf %129, %132 : vector<8x128xf32>
    %144 = arith.addf %135, %138 : vector<8x128xf32>
    %145 = arith.addf %139, %140 : vector<8x128xf32>
    %146 = arith.addf %141, %142 : vector<8x128xf32>
    %147 = arith.addf %143, %144 : vector<8x128xf32>
    %148 = arith.addf %145, %146 : vector<8x128xf32>
    %149 = arith.addf %148, %147 : vector<8x128xf32>
    %c168 = arith.constant 168 : index
    %150 = memref.load %arg1[%c168] : memref<351xf32, #tpu.memory_space<smem>>
    %151 = vector.broadcast %150 : f32 to vector<8x128xf32>
    %152 = arith.addf %149, %151 : vector<8x128xf32>
    %cst_12 = arith.constant 0.000000e+00 : f32
    %153 = vector.broadcast %cst_12 : f32 to vector<8x128xf32>
    %154 = arith.maximumf %152, %153 : vector<8x128xf32>
    %c25 = arith.constant 25 : index
    %155 = memref.load %arg1[%c25] : memref<351xf32, #tpu.memory_space<smem>>
    %156 = vector.broadcast %155 : f32 to vector<8x128xf32>
    %157 = arith.mulf %14, %156 : vector<8x128xf32>
    %c37 = arith.constant 37 : index
    %158 = memref.load %arg1[%c37] : memref<351xf32, #tpu.memory_space<smem>>
    %159 = vector.broadcast %158 : f32 to vector<8x128xf32>
    %160 = arith.mulf %22, %159 : vector<8x128xf32>
    %c49 = arith.constant 49 : index
    %161 = memref.load %arg1[%c49] : memref<351xf32, #tpu.memory_space<smem>>
    %162 = vector.broadcast %161 : f32 to vector<8x128xf32>
    %163 = arith.mulf %30, %162 : vector<8x128xf32>
    %c61 = arith.constant 61 : index
    %164 = memref.load %arg1[%c61] : memref<351xf32, #tpu.memory_space<smem>>
    %165 = vector.broadcast %164 : f32 to vector<8x128xf32>
    %166 = arith.mulf %38, %165 : vector<8x128xf32>
    %c73 = arith.constant 73 : index
    %167 = memref.load %arg1[%c73] : memref<351xf32, #tpu.memory_space<smem>>
    %168 = vector.broadcast %167 : f32 to vector<8x128xf32>
    %169 = arith.mulf %46, %168 : vector<8x128xf32>
    %c85 = arith.constant 85 : index
    %170 = memref.load %arg1[%c85] : memref<351xf32, #tpu.memory_space<smem>>
    %171 = vector.broadcast %170 : f32 to vector<8x128xf32>
    %172 = arith.mulf %54, %171 : vector<8x128xf32>
    %c97 = arith.constant 97 : index
    %173 = memref.load %arg1[%c97] : memref<351xf32, #tpu.memory_space<smem>>
    %174 = vector.broadcast %173 : f32 to vector<8x128xf32>
    %175 = arith.mulf %62, %174 : vector<8x128xf32>
    %c109 = arith.constant 109 : index
    %176 = memref.load %arg1[%c109] : memref<351xf32, #tpu.memory_space<smem>>
    %177 = vector.broadcast %176 : f32 to vector<8x128xf32>
    %178 = arith.mulf %70, %177 : vector<8x128xf32>
    %c121 = arith.constant 121 : index
    %179 = memref.load %arg1[%c121] : memref<351xf32, #tpu.memory_space<smem>>
    %180 = vector.broadcast %179 : f32 to vector<8x128xf32>
    %181 = arith.mulf %78, %180 : vector<8x128xf32>
    %c133 = arith.constant 133 : index
    %182 = memref.load %arg1[%c133] : memref<351xf32, #tpu.memory_space<smem>>
    %183 = vector.broadcast %182 : f32 to vector<8x128xf32>
    %184 = arith.mulf %86, %183 : vector<8x128xf32>
    %c145 = arith.constant 145 : index
    %185 = memref.load %arg1[%c145] : memref<351xf32, #tpu.memory_space<smem>>
    %186 = vector.broadcast %185 : f32 to vector<8x128xf32>
    %187 = arith.mulf %94, %186 : vector<8x128xf32>
    %c157 = arith.constant 157 : index
    %188 = memref.load %arg1[%c157] : memref<351xf32, #tpu.memory_space<smem>>
    %189 = vector.broadcast %188 : f32 to vector<8x128xf32>
    %190 = arith.mulf %102, %189 : vector<8x128xf32>
    %191 = arith.addf %157, %160 : vector<8x128xf32>
    %192 = arith.addf %163, %166 : vector<8x128xf32>
    %193 = arith.addf %169, %172 : vector<8x128xf32>
    %194 = arith.addf %175, %178 : vector<8x128xf32>
    %195 = arith.addf %181, %184 : vector<8x128xf32>
    %196 = arith.addf %187, %190 : vector<8x128xf32>
    %197 = arith.addf %191, %192 : vector<8x128xf32>
    %198 = arith.addf %193, %194 : vector<8x128xf32>
    %199 = arith.addf %195, %196 : vector<8x128xf32>
    %200 = arith.addf %197, %198 : vector<8x128xf32>
    %201 = arith.addf %200, %199 : vector<8x128xf32>
    %c169 = arith.constant 169 : index
    %202 = memref.load %arg1[%c169] : memref<351xf32, #tpu.memory_space<smem>>
    %203 = vector.broadcast %202 : f32 to vector<8x128xf32>
    %204 = arith.addf %201, %203 : vector<8x128xf32>
    %cst_13 = arith.constant 0.000000e+00 : f32
    %205 = vector.broadcast %cst_13 : f32 to vector<8x128xf32>
    %206 = arith.maximumf %204, %205 : vector<8x128xf32>
    %c26 = arith.constant 26 : index
    %207 = memref.load %arg1[%c26] : memref<351xf32, #tpu.memory_space<smem>>
    %208 = vector.broadcast %207 : f32 to vector<8x128xf32>
    %209 = arith.mulf %14, %208 : vector<8x128xf32>
    %c38 = arith.constant 38 : index
    %210 = memref.load %arg1[%c38] : memref<351xf32, #tpu.memory_space<smem>>
    %211 = vector.broadcast %210 : f32 to vector<8x128xf32>
    %212 = arith.mulf %22, %211 : vector<8x128xf32>
    %c50 = arith.constant 50 : index
    %213 = memref.load %arg1[%c50] : memref<351xf32, #tpu.memory_space<smem>>
    %214 = vector.broadcast %213 : f32 to vector<8x128xf32>
    %215 = arith.mulf %30, %214 : vector<8x128xf32>
    %c62 = arith.constant 62 : index
    %216 = memref.load %arg1[%c62] : memref<351xf32, #tpu.memory_space<smem>>
    %217 = vector.broadcast %216 : f32 to vector<8x128xf32>
    %218 = arith.mulf %38, %217 : vector<8x128xf32>
    %c74 = arith.constant 74 : index
    %219 = memref.load %arg1[%c74] : memref<351xf32, #tpu.memory_space<smem>>
    %220 = vector.broadcast %219 : f32 to vector<8x128xf32>
    %221 = arith.mulf %46, %220 : vector<8x128xf32>
    %c86 = arith.constant 86 : index
    %222 = memref.load %arg1[%c86] : memref<351xf32, #tpu.memory_space<smem>>
    %223 = vector.broadcast %222 : f32 to vector<8x128xf32>
    %224 = arith.mulf %54, %223 : vector<8x128xf32>
    %c98 = arith.constant 98 : index
    %225 = memref.load %arg1[%c98] : memref<351xf32, #tpu.memory_space<smem>>
    %226 = vector.broadcast %225 : f32 to vector<8x128xf32>
    %227 = arith.mulf %62, %226 : vector<8x128xf32>
    %c110 = arith.constant 110 : index
    %228 = memref.load %arg1[%c110] : memref<351xf32, #tpu.memory_space<smem>>
    %229 = vector.broadcast %228 : f32 to vector<8x128xf32>
    %230 = arith.mulf %70, %229 : vector<8x128xf32>
    %c122 = arith.constant 122 : index
    %231 = memref.load %arg1[%c122] : memref<351xf32, #tpu.memory_space<smem>>
    %232 = vector.broadcast %231 : f32 to vector<8x128xf32>
    %233 = arith.mulf %78, %232 : vector<8x128xf32>
    %c134 = arith.constant 134 : index
    %234 = memref.load %arg1[%c134] : memref<351xf32, #tpu.memory_space<smem>>
    %235 = vector.broadcast %234 : f32 to vector<8x128xf32>
    %236 = arith.mulf %86, %235 : vector<8x128xf32>
    %c146 = arith.constant 146 : index
    %237 = memref.load %arg1[%c146] : memref<351xf32, #tpu.memory_space<smem>>
    %238 = vector.broadcast %237 : f32 to vector<8x128xf32>
    %239 = arith.mulf %94, %238 : vector<8x128xf32>
    %c158 = arith.constant 158 : index
    %240 = memref.load %arg1[%c158] : memref<351xf32, #tpu.memory_space<smem>>
    %241 = vector.broadcast %240 : f32 to vector<8x128xf32>
    %242 = arith.mulf %102, %241 : vector<8x128xf32>
    %243 = arith.addf %209, %212 : vector<8x128xf32>
    %244 = arith.addf %215, %218 : vector<8x128xf32>
    %245 = arith.addf %221, %224 : vector<8x128xf32>
    %246 = arith.addf %227, %230 : vector<8x128xf32>
    %247 = arith.addf %233, %236 : vector<8x128xf32>
    %248 = arith.addf %239, %242 : vector<8x128xf32>
    %249 = arith.addf %243, %244 : vector<8x128xf32>
    %250 = arith.addf %245, %246 : vector<8x128xf32>
    %251 = arith.addf %247, %248 : vector<8x128xf32>
    %252 = arith.addf %249, %250 : vector<8x128xf32>
    %253 = arith.addf %252, %251 : vector<8x128xf32>
    %c170 = arith.constant 170 : index
    %254 = memref.load %arg1[%c170] : memref<351xf32, #tpu.memory_space<smem>>
    %255 = vector.broadcast %254 : f32 to vector<8x128xf32>
    %256 = arith.addf %253, %255 : vector<8x128xf32>
    %cst_14 = arith.constant 0.000000e+00 : f32
    %257 = vector.broadcast %cst_14 : f32 to vector<8x128xf32>
    %258 = arith.maximumf %256, %257 : vector<8x128xf32>
    %c27 = arith.constant 27 : index
    %259 = memref.load %arg1[%c27] : memref<351xf32, #tpu.memory_space<smem>>
    %260 = vector.broadcast %259 : f32 to vector<8x128xf32>
    %261 = arith.mulf %14, %260 : vector<8x128xf32>
    %c39 = arith.constant 39 : index
    %262 = memref.load %arg1[%c39] : memref<351xf32, #tpu.memory_space<smem>>
    %263 = vector.broadcast %262 : f32 to vector<8x128xf32>
    %264 = arith.mulf %22, %263 : vector<8x128xf32>
    %c51 = arith.constant 51 : index
    %265 = memref.load %arg1[%c51] : memref<351xf32, #tpu.memory_space<smem>>
    %266 = vector.broadcast %265 : f32 to vector<8x128xf32>
    %267 = arith.mulf %30, %266 : vector<8x128xf32>
    %c63 = arith.constant 63 : index
    %268 = memref.load %arg1[%c63] : memref<351xf32, #tpu.memory_space<smem>>
    %269 = vector.broadcast %268 : f32 to vector<8x128xf32>
    %270 = arith.mulf %38, %269 : vector<8x128xf32>
    %c75 = arith.constant 75 : index
    %271 = memref.load %arg1[%c75] : memref<351xf32, #tpu.memory_space<smem>>
    %272 = vector.broadcast %271 : f32 to vector<8x128xf32>
    %273 = arith.mulf %46, %272 : vector<8x128xf32>
    %c87 = arith.constant 87 : index
    %274 = memref.load %arg1[%c87] : memref<351xf32, #tpu.memory_space<smem>>
    %275 = vector.broadcast %274 : f32 to vector<8x128xf32>
    %276 = arith.mulf %54, %275 : vector<8x128xf32>
    %c99 = arith.constant 99 : index
    %277 = memref.load %arg1[%c99] : memref<351xf32, #tpu.memory_space<smem>>
    %278 = vector.broadcast %277 : f32 to vector<8x128xf32>
    %279 = arith.mulf %62, %278 : vector<8x128xf32>
    %c111 = arith.constant 111 : index
    %280 = memref.load %arg1[%c111] : memref<351xf32, #tpu.memory_space<smem>>
    %281 = vector.broadcast %280 : f32 to vector<8x128xf32>
    %282 = arith.mulf %70, %281 : vector<8x128xf32>
    %c123 = arith.constant 123 : index
    %283 = memref.load %arg1[%c123] : memref<351xf32, #tpu.memory_space<smem>>
    %284 = vector.broadcast %283 : f32 to vector<8x128xf32>
    %285 = arith.mulf %78, %284 : vector<8x128xf32>
    %c135 = arith.constant 135 : index
    %286 = memref.load %arg1[%c135] : memref<351xf32, #tpu.memory_space<smem>>
    %287 = vector.broadcast %286 : f32 to vector<8x128xf32>
    %288 = arith.mulf %86, %287 : vector<8x128xf32>
    %c147 = arith.constant 147 : index
    %289 = memref.load %arg1[%c147] : memref<351xf32, #tpu.memory_space<smem>>
    %290 = vector.broadcast %289 : f32 to vector<8x128xf32>
    %291 = arith.mulf %94, %290 : vector<8x128xf32>
    %c159 = arith.constant 159 : index
    %292 = memref.load %arg1[%c159] : memref<351xf32, #tpu.memory_space<smem>>
    %293 = vector.broadcast %292 : f32 to vector<8x128xf32>
    %294 = arith.mulf %102, %293 : vector<8x128xf32>
    %295 = arith.addf %261, %264 : vector<8x128xf32>
    %296 = arith.addf %267, %270 : vector<8x128xf32>
    %297 = arith.addf %273, %276 : vector<8x128xf32>
    %298 = arith.addf %279, %282 : vector<8x128xf32>
    %299 = arith.addf %285, %288 : vector<8x128xf32>
    %300 = arith.addf %291, %294 : vector<8x128xf32>
    %301 = arith.addf %295, %296 : vector<8x128xf32>
    %302 = arith.addf %297, %298 : vector<8x128xf32>
    %303 = arith.addf %299, %300 : vector<8x128xf32>
    %304 = arith.addf %301, %302 : vector<8x128xf32>
    %305 = arith.addf %304, %303 : vector<8x128xf32>
    %c171 = arith.constant 171 : index
    %306 = memref.load %arg1[%c171] : memref<351xf32, #tpu.memory_space<smem>>
    %307 = vector.broadcast %306 : f32 to vector<8x128xf32>
    %308 = arith.addf %305, %307 : vector<8x128xf32>
    %cst_15 = arith.constant 0.000000e+00 : f32
    %309 = vector.broadcast %cst_15 : f32 to vector<8x128xf32>
    %310 = arith.maximumf %308, %309 : vector<8x128xf32>
    %c28 = arith.constant 28 : index
    %311 = memref.load %arg1[%c28] : memref<351xf32, #tpu.memory_space<smem>>
    %312 = vector.broadcast %311 : f32 to vector<8x128xf32>
    %313 = arith.mulf %14, %312 : vector<8x128xf32>
    %c40 = arith.constant 40 : index
    %314 = memref.load %arg1[%c40] : memref<351xf32, #tpu.memory_space<smem>>
    %315 = vector.broadcast %314 : f32 to vector<8x128xf32>
    %316 = arith.mulf %22, %315 : vector<8x128xf32>
    %c52 = arith.constant 52 : index
    %317 = memref.load %arg1[%c52] : memref<351xf32, #tpu.memory_space<smem>>
    %318 = vector.broadcast %317 : f32 to vector<8x128xf32>
    %319 = arith.mulf %30, %318 : vector<8x128xf32>
    %c64 = arith.constant 64 : index
    %320 = memref.load %arg1[%c64] : memref<351xf32, #tpu.memory_space<smem>>
    %321 = vector.broadcast %320 : f32 to vector<8x128xf32>
    %322 = arith.mulf %38, %321 : vector<8x128xf32>
    %c76 = arith.constant 76 : index
    %323 = memref.load %arg1[%c76] : memref<351xf32, #tpu.memory_space<smem>>
    %324 = vector.broadcast %323 : f32 to vector<8x128xf32>
    %325 = arith.mulf %46, %324 : vector<8x128xf32>
    %c88 = arith.constant 88 : index
    %326 = memref.load %arg1[%c88] : memref<351xf32, #tpu.memory_space<smem>>
    %327 = vector.broadcast %326 : f32 to vector<8x128xf32>
    %328 = arith.mulf %54, %327 : vector<8x128xf32>
    %c100 = arith.constant 100 : index
    %329 = memref.load %arg1[%c100] : memref<351xf32, #tpu.memory_space<smem>>
    %330 = vector.broadcast %329 : f32 to vector<8x128xf32>
    %331 = arith.mulf %62, %330 : vector<8x128xf32>
    %c112 = arith.constant 112 : index
    %332 = memref.load %arg1[%c112] : memref<351xf32, #tpu.memory_space<smem>>
    %333 = vector.broadcast %332 : f32 to vector<8x128xf32>
    %334 = arith.mulf %70, %333 : vector<8x128xf32>
    %c124 = arith.constant 124 : index
    %335 = memref.load %arg1[%c124] : memref<351xf32, #tpu.memory_space<smem>>
    %336 = vector.broadcast %335 : f32 to vector<8x128xf32>
    %337 = arith.mulf %78, %336 : vector<8x128xf32>
    %c136 = arith.constant 136 : index
    %338 = memref.load %arg1[%c136] : memref<351xf32, #tpu.memory_space<smem>>
    %339 = vector.broadcast %338 : f32 to vector<8x128xf32>
    %340 = arith.mulf %86, %339 : vector<8x128xf32>
    %c148 = arith.constant 148 : index
    %341 = memref.load %arg1[%c148] : memref<351xf32, #tpu.memory_space<smem>>
    %342 = vector.broadcast %341 : f32 to vector<8x128xf32>
    %343 = arith.mulf %94, %342 : vector<8x128xf32>
    %c160 = arith.constant 160 : index
    %344 = memref.load %arg1[%c160] : memref<351xf32, #tpu.memory_space<smem>>
    %345 = vector.broadcast %344 : f32 to vector<8x128xf32>
    %346 = arith.mulf %102, %345 : vector<8x128xf32>
    %347 = arith.addf %313, %316 : vector<8x128xf32>
    %348 = arith.addf %319, %322 : vector<8x128xf32>
    %349 = arith.addf %325, %328 : vector<8x128xf32>
    %350 = arith.addf %331, %334 : vector<8x128xf32>
    %351 = arith.addf %337, %340 : vector<8x128xf32>
    %352 = arith.addf %343, %346 : vector<8x128xf32>
    %353 = arith.addf %347, %348 : vector<8x128xf32>
    %354 = arith.addf %349, %350 : vector<8x128xf32>
    %355 = arith.addf %351, %352 : vector<8x128xf32>
    %356 = arith.addf %353, %354 : vector<8x128xf32>
    %357 = arith.addf %356, %355 : vector<8x128xf32>
    %c172 = arith.constant 172 : index
    %358 = memref.load %arg1[%c172] : memref<351xf32, #tpu.memory_space<smem>>
    %359 = vector.broadcast %358 : f32 to vector<8x128xf32>
    %360 = arith.addf %357, %359 : vector<8x128xf32>
    %cst_16 = arith.constant 0.000000e+00 : f32
    %361 = vector.broadcast %cst_16 : f32 to vector<8x128xf32>
    %362 = arith.maximumf %360, %361 : vector<8x128xf32>
    %c29 = arith.constant 29 : index
    %363 = memref.load %arg1[%c29] : memref<351xf32, #tpu.memory_space<smem>>
    %364 = vector.broadcast %363 : f32 to vector<8x128xf32>
    %365 = arith.mulf %14, %364 : vector<8x128xf32>
    %c41 = arith.constant 41 : index
    %366 = memref.load %arg1[%c41] : memref<351xf32, #tpu.memory_space<smem>>
    %367 = vector.broadcast %366 : f32 to vector<8x128xf32>
    %368 = arith.mulf %22, %367 : vector<8x128xf32>
    %c53 = arith.constant 53 : index
    %369 = memref.load %arg1[%c53] : memref<351xf32, #tpu.memory_space<smem>>
    %370 = vector.broadcast %369 : f32 to vector<8x128xf32>
    %371 = arith.mulf %30, %370 : vector<8x128xf32>
    %c65 = arith.constant 65 : index
    %372 = memref.load %arg1[%c65] : memref<351xf32, #tpu.memory_space<smem>>
    %373 = vector.broadcast %372 : f32 to vector<8x128xf32>
    %374 = arith.mulf %38, %373 : vector<8x128xf32>
    %c77 = arith.constant 77 : index
    %375 = memref.load %arg1[%c77] : memref<351xf32, #tpu.memory_space<smem>>
    %376 = vector.broadcast %375 : f32 to vector<8x128xf32>
    %377 = arith.mulf %46, %376 : vector<8x128xf32>
    %c89 = arith.constant 89 : index
    %378 = memref.load %arg1[%c89] : memref<351xf32, #tpu.memory_space<smem>>
    %379 = vector.broadcast %378 : f32 to vector<8x128xf32>
    %380 = arith.mulf %54, %379 : vector<8x128xf32>
    %c101 = arith.constant 101 : index
    %381 = memref.load %arg1[%c101] : memref<351xf32, #tpu.memory_space<smem>>
    %382 = vector.broadcast %381 : f32 to vector<8x128xf32>
    %383 = arith.mulf %62, %382 : vector<8x128xf32>
    %c113 = arith.constant 113 : index
    %384 = memref.load %arg1[%c113] : memref<351xf32, #tpu.memory_space<smem>>
    %385 = vector.broadcast %384 : f32 to vector<8x128xf32>
    %386 = arith.mulf %70, %385 : vector<8x128xf32>
    %c125 = arith.constant 125 : index
    %387 = memref.load %arg1[%c125] : memref<351xf32, #tpu.memory_space<smem>>
    %388 = vector.broadcast %387 : f32 to vector<8x128xf32>
    %389 = arith.mulf %78, %388 : vector<8x128xf32>
    %c137 = arith.constant 137 : index
    %390 = memref.load %arg1[%c137] : memref<351xf32, #tpu.memory_space<smem>>
    %391 = vector.broadcast %390 : f32 to vector<8x128xf32>
    %392 = arith.mulf %86, %391 : vector<8x128xf32>
    %c149 = arith.constant 149 : index
    %393 = memref.load %arg1[%c149] : memref<351xf32, #tpu.memory_space<smem>>
    %394 = vector.broadcast %393 : f32 to vector<8x128xf32>
    %395 = arith.mulf %94, %394 : vector<8x128xf32>
    %c161 = arith.constant 161 : index
    %396 = memref.load %arg1[%c161] : memref<351xf32, #tpu.memory_space<smem>>
    %397 = vector.broadcast %396 : f32 to vector<8x128xf32>
    %398 = arith.mulf %102, %397 : vector<8x128xf32>
    %399 = arith.addf %365, %368 : vector<8x128xf32>
    %400 = arith.addf %371, %374 : vector<8x128xf32>
    %401 = arith.addf %377, %380 : vector<8x128xf32>
    %402 = arith.addf %383, %386 : vector<8x128xf32>
    %403 = arith.addf %389, %392 : vector<8x128xf32>
    %404 = arith.addf %395, %398 : vector<8x128xf32>
    %405 = arith.addf %399, %400 : vector<8x128xf32>
    %406 = arith.addf %401, %402 : vector<8x128xf32>
    %407 = arith.addf %403, %404 : vector<8x128xf32>
    %408 = arith.addf %405, %406 : vector<8x128xf32>
    %409 = arith.addf %408, %407 : vector<8x128xf32>
    %c173 = arith.constant 173 : index
    %410 = memref.load %arg1[%c173] : memref<351xf32, #tpu.memory_space<smem>>
    %411 = vector.broadcast %410 : f32 to vector<8x128xf32>
    %412 = arith.addf %409, %411 : vector<8x128xf32>
    %cst_17 = arith.constant 0.000000e+00 : f32
    %413 = vector.broadcast %cst_17 : f32 to vector<8x128xf32>
    %414 = arith.maximumf %412, %413 : vector<8x128xf32>
    %c30 = arith.constant 30 : index
    %415 = memref.load %arg1[%c30] : memref<351xf32, #tpu.memory_space<smem>>
    %416 = vector.broadcast %415 : f32 to vector<8x128xf32>
    %417 = arith.mulf %14, %416 : vector<8x128xf32>
    %c42 = arith.constant 42 : index
    %418 = memref.load %arg1[%c42] : memref<351xf32, #tpu.memory_space<smem>>
    %419 = vector.broadcast %418 : f32 to vector<8x128xf32>
    %420 = arith.mulf %22, %419 : vector<8x128xf32>
    %c54 = arith.constant 54 : index
    %421 = memref.load %arg1[%c54] : memref<351xf32, #tpu.memory_space<smem>>
    %422 = vector.broadcast %421 : f32 to vector<8x128xf32>
    %423 = arith.mulf %30, %422 : vector<8x128xf32>
    %c66 = arith.constant 66 : index
    %424 = memref.load %arg1[%c66] : memref<351xf32, #tpu.memory_space<smem>>
    %425 = vector.broadcast %424 : f32 to vector<8x128xf32>
    %426 = arith.mulf %38, %425 : vector<8x128xf32>
    %c78 = arith.constant 78 : index
    %427 = memref.load %arg1[%c78] : memref<351xf32, #tpu.memory_space<smem>>
    %428 = vector.broadcast %427 : f32 to vector<8x128xf32>
    %429 = arith.mulf %46, %428 : vector<8x128xf32>
    %c90 = arith.constant 90 : index
    %430 = memref.load %arg1[%c90] : memref<351xf32, #tpu.memory_space<smem>>
    %431 = vector.broadcast %430 : f32 to vector<8x128xf32>
    %432 = arith.mulf %54, %431 : vector<8x128xf32>
    %c102 = arith.constant 102 : index
    %433 = memref.load %arg1[%c102] : memref<351xf32, #tpu.memory_space<smem>>
    %434 = vector.broadcast %433 : f32 to vector<8x128xf32>
    %435 = arith.mulf %62, %434 : vector<8x128xf32>
    %c114 = arith.constant 114 : index
    %436 = memref.load %arg1[%c114] : memref<351xf32, #tpu.memory_space<smem>>
    %437 = vector.broadcast %436 : f32 to vector<8x128xf32>
    %438 = arith.mulf %70, %437 : vector<8x128xf32>
    %c126 = arith.constant 126 : index
    %439 = memref.load %arg1[%c126] : memref<351xf32, #tpu.memory_space<smem>>
    %440 = vector.broadcast %439 : f32 to vector<8x128xf32>
    %441 = arith.mulf %78, %440 : vector<8x128xf32>
    %c138 = arith.constant 138 : index
    %442 = memref.load %arg1[%c138] : memref<351xf32, #tpu.memory_space<smem>>
    %443 = vector.broadcast %442 : f32 to vector<8x128xf32>
    %444 = arith.mulf %86, %443 : vector<8x128xf32>
    %c150 = arith.constant 150 : index
    %445 = memref.load %arg1[%c150] : memref<351xf32, #tpu.memory_space<smem>>
    %446 = vector.broadcast %445 : f32 to vector<8x128xf32>
    %447 = arith.mulf %94, %446 : vector<8x128xf32>
    %c162 = arith.constant 162 : index
    %448 = memref.load %arg1[%c162] : memref<351xf32, #tpu.memory_space<smem>>
    %449 = vector.broadcast %448 : f32 to vector<8x128xf32>
    %450 = arith.mulf %102, %449 : vector<8x128xf32>
    %451 = arith.addf %417, %420 : vector<8x128xf32>
    %452 = arith.addf %423, %426 : vector<8x128xf32>
    %453 = arith.addf %429, %432 : vector<8x128xf32>
    %454 = arith.addf %435, %438 : vector<8x128xf32>
    %455 = arith.addf %441, %444 : vector<8x128xf32>
    %456 = arith.addf %447, %450 : vector<8x128xf32>
    %457 = arith.addf %451, %452 : vector<8x128xf32>
    %458 = arith.addf %453, %454 : vector<8x128xf32>
    %459 = arith.addf %455, %456 : vector<8x128xf32>
    %460 = arith.addf %457, %458 : vector<8x128xf32>
    %461 = arith.addf %460, %459 : vector<8x128xf32>
    %c174 = arith.constant 174 : index
    %462 = memref.load %arg1[%c174] : memref<351xf32, #tpu.memory_space<smem>>
    %463 = vector.broadcast %462 : f32 to vector<8x128xf32>
    %464 = arith.addf %461, %463 : vector<8x128xf32>
    %cst_18 = arith.constant 0.000000e+00 : f32
    %465 = vector.broadcast %cst_18 : f32 to vector<8x128xf32>
    %466 = arith.maximumf %464, %465 : vector<8x128xf32>
    %c31 = arith.constant 31 : index
    %467 = memref.load %arg1[%c31] : memref<351xf32, #tpu.memory_space<smem>>
    %468 = vector.broadcast %467 : f32 to vector<8x128xf32>
    %469 = arith.mulf %14, %468 : vector<8x128xf32>
    %c43 = arith.constant 43 : index
    %470 = memref.load %arg1[%c43] : memref<351xf32, #tpu.memory_space<smem>>
    %471 = vector.broadcast %470 : f32 to vector<8x128xf32>
    %472 = arith.mulf %22, %471 : vector<8x128xf32>
    %c55 = arith.constant 55 : index
    %473 = memref.load %arg1[%c55] : memref<351xf32, #tpu.memory_space<smem>>
    %474 = vector.broadcast %473 : f32 to vector<8x128xf32>
    %475 = arith.mulf %30, %474 : vector<8x128xf32>
    %c67 = arith.constant 67 : index
    %476 = memref.load %arg1[%c67] : memref<351xf32, #tpu.memory_space<smem>>
    %477 = vector.broadcast %476 : f32 to vector<8x128xf32>
    %478 = arith.mulf %38, %477 : vector<8x128xf32>
    %c79 = arith.constant 79 : index
    %479 = memref.load %arg1[%c79] : memref<351xf32, #tpu.memory_space<smem>>
    %480 = vector.broadcast %479 : f32 to vector<8x128xf32>
    %481 = arith.mulf %46, %480 : vector<8x128xf32>
    %c91 = arith.constant 91 : index
    %482 = memref.load %arg1[%c91] : memref<351xf32, #tpu.memory_space<smem>>
    %483 = vector.broadcast %482 : f32 to vector<8x128xf32>
    %484 = arith.mulf %54, %483 : vector<8x128xf32>
    %c103 = arith.constant 103 : index
    %485 = memref.load %arg1[%c103] : memref<351xf32, #tpu.memory_space<smem>>
    %486 = vector.broadcast %485 : f32 to vector<8x128xf32>
    %487 = arith.mulf %62, %486 : vector<8x128xf32>
    %c115 = arith.constant 115 : index
    %488 = memref.load %arg1[%c115] : memref<351xf32, #tpu.memory_space<smem>>
    %489 = vector.broadcast %488 : f32 to vector<8x128xf32>
    %490 = arith.mulf %70, %489 : vector<8x128xf32>
    %c127 = arith.constant 127 : index
    %491 = memref.load %arg1[%c127] : memref<351xf32, #tpu.memory_space<smem>>
    %492 = vector.broadcast %491 : f32 to vector<8x128xf32>
    %493 = arith.mulf %78, %492 : vector<8x128xf32>
    %c139 = arith.constant 139 : index
    %494 = memref.load %arg1[%c139] : memref<351xf32, #tpu.memory_space<smem>>
    %495 = vector.broadcast %494 : f32 to vector<8x128xf32>
    %496 = arith.mulf %86, %495 : vector<8x128xf32>
    %c151 = arith.constant 151 : index
    %497 = memref.load %arg1[%c151] : memref<351xf32, #tpu.memory_space<smem>>
    %498 = vector.broadcast %497 : f32 to vector<8x128xf32>
    %499 = arith.mulf %94, %498 : vector<8x128xf32>
    %c163 = arith.constant 163 : index
    %500 = memref.load %arg1[%c163] : memref<351xf32, #tpu.memory_space<smem>>
    %501 = vector.broadcast %500 : f32 to vector<8x128xf32>
    %502 = arith.mulf %102, %501 : vector<8x128xf32>
    %503 = arith.addf %469, %472 : vector<8x128xf32>
    %504 = arith.addf %475, %478 : vector<8x128xf32>
    %505 = arith.addf %481, %484 : vector<8x128xf32>
    %506 = arith.addf %487, %490 : vector<8x128xf32>
    %507 = arith.addf %493, %496 : vector<8x128xf32>
    %508 = arith.addf %499, %502 : vector<8x128xf32>
    %509 = arith.addf %503, %504 : vector<8x128xf32>
    %510 = arith.addf %505, %506 : vector<8x128xf32>
    %511 = arith.addf %507, %508 : vector<8x128xf32>
    %512 = arith.addf %509, %510 : vector<8x128xf32>
    %513 = arith.addf %512, %511 : vector<8x128xf32>
    %c175 = arith.constant 175 : index
    %514 = memref.load %arg1[%c175] : memref<351xf32, #tpu.memory_space<smem>>
    %515 = vector.broadcast %514 : f32 to vector<8x128xf32>
    %516 = arith.addf %513, %515 : vector<8x128xf32>
    %cst_19 = arith.constant 0.000000e+00 : f32
    %517 = vector.broadcast %cst_19 : f32 to vector<8x128xf32>
    %518 = arith.maximumf %516, %517 : vector<8x128xf32>
    %c32 = arith.constant 32 : index
    %519 = memref.load %arg1[%c32] : memref<351xf32, #tpu.memory_space<smem>>
    %520 = vector.broadcast %519 : f32 to vector<8x128xf32>
    %521 = arith.mulf %14, %520 : vector<8x128xf32>
    %c44 = arith.constant 44 : index
    %522 = memref.load %arg1[%c44] : memref<351xf32, #tpu.memory_space<smem>>
    %523 = vector.broadcast %522 : f32 to vector<8x128xf32>
    %524 = arith.mulf %22, %523 : vector<8x128xf32>
    %c56 = arith.constant 56 : index
    %525 = memref.load %arg1[%c56] : memref<351xf32, #tpu.memory_space<smem>>
    %526 = vector.broadcast %525 : f32 to vector<8x128xf32>
    %527 = arith.mulf %30, %526 : vector<8x128xf32>
    %c68 = arith.constant 68 : index
    %528 = memref.load %arg1[%c68] : memref<351xf32, #tpu.memory_space<smem>>
    %529 = vector.broadcast %528 : f32 to vector<8x128xf32>
    %530 = arith.mulf %38, %529 : vector<8x128xf32>
    %c80 = arith.constant 80 : index
    %531 = memref.load %arg1[%c80] : memref<351xf32, #tpu.memory_space<smem>>
    %532 = vector.broadcast %531 : f32 to vector<8x128xf32>
    %533 = arith.mulf %46, %532 : vector<8x128xf32>
    %c92 = arith.constant 92 : index
    %534 = memref.load %arg1[%c92] : memref<351xf32, #tpu.memory_space<smem>>
    %535 = vector.broadcast %534 : f32 to vector<8x128xf32>
    %536 = arith.mulf %54, %535 : vector<8x128xf32>
    %c104 = arith.constant 104 : index
    %537 = memref.load %arg1[%c104] : memref<351xf32, #tpu.memory_space<smem>>
    %538 = vector.broadcast %537 : f32 to vector<8x128xf32>
    %539 = arith.mulf %62, %538 : vector<8x128xf32>
    %c116 = arith.constant 116 : index
    %540 = memref.load %arg1[%c116] : memref<351xf32, #tpu.memory_space<smem>>
    %541 = vector.broadcast %540 : f32 to vector<8x128xf32>
    %542 = arith.mulf %70, %541 : vector<8x128xf32>
    %c128 = arith.constant 128 : index
    %543 = memref.load %arg1[%c128] : memref<351xf32, #tpu.memory_space<smem>>
    %544 = vector.broadcast %543 : f32 to vector<8x128xf32>
    %545 = arith.mulf %78, %544 : vector<8x128xf32>
    %c140 = arith.constant 140 : index
    %546 = memref.load %arg1[%c140] : memref<351xf32, #tpu.memory_space<smem>>
    %547 = vector.broadcast %546 : f32 to vector<8x128xf32>
    %548 = arith.mulf %86, %547 : vector<8x128xf32>
    %c152 = arith.constant 152 : index
    %549 = memref.load %arg1[%c152] : memref<351xf32, #tpu.memory_space<smem>>
    %550 = vector.broadcast %549 : f32 to vector<8x128xf32>
    %551 = arith.mulf %94, %550 : vector<8x128xf32>
    %c164 = arith.constant 164 : index
    %552 = memref.load %arg1[%c164] : memref<351xf32, #tpu.memory_space<smem>>
    %553 = vector.broadcast %552 : f32 to vector<8x128xf32>
    %554 = arith.mulf %102, %553 : vector<8x128xf32>
    %555 = arith.addf %521, %524 : vector<8x128xf32>
    %556 = arith.addf %527, %530 : vector<8x128xf32>
    %557 = arith.addf %533, %536 : vector<8x128xf32>
    %558 = arith.addf %539, %542 : vector<8x128xf32>
    %559 = arith.addf %545, %548 : vector<8x128xf32>
    %560 = arith.addf %551, %554 : vector<8x128xf32>
    %561 = arith.addf %555, %556 : vector<8x128xf32>
    %562 = arith.addf %557, %558 : vector<8x128xf32>
    %563 = arith.addf %559, %560 : vector<8x128xf32>
    %564 = arith.addf %561, %562 : vector<8x128xf32>
    %565 = arith.addf %564, %563 : vector<8x128xf32>
    %c176 = arith.constant 176 : index
    %566 = memref.load %arg1[%c176] : memref<351xf32, #tpu.memory_space<smem>>
    %567 = vector.broadcast %566 : f32 to vector<8x128xf32>
    %568 = arith.addf %565, %567 : vector<8x128xf32>
    %cst_20 = arith.constant 0.000000e+00 : f32
    %569 = vector.broadcast %cst_20 : f32 to vector<8x128xf32>
    %570 = arith.maximumf %568, %569 : vector<8x128xf32>
    %c33 = arith.constant 33 : index
    %571 = memref.load %arg1[%c33] : memref<351xf32, #tpu.memory_space<smem>>
    %572 = vector.broadcast %571 : f32 to vector<8x128xf32>
    %573 = arith.mulf %14, %572 : vector<8x128xf32>
    %c45 = arith.constant 45 : index
    %574 = memref.load %arg1[%c45] : memref<351xf32, #tpu.memory_space<smem>>
    %575 = vector.broadcast %574 : f32 to vector<8x128xf32>
    %576 = arith.mulf %22, %575 : vector<8x128xf32>
    %c57 = arith.constant 57 : index
    %577 = memref.load %arg1[%c57] : memref<351xf32, #tpu.memory_space<smem>>
    %578 = vector.broadcast %577 : f32 to vector<8x128xf32>
    %579 = arith.mulf %30, %578 : vector<8x128xf32>
    %c69 = arith.constant 69 : index
    %580 = memref.load %arg1[%c69] : memref<351xf32, #tpu.memory_space<smem>>
    %581 = vector.broadcast %580 : f32 to vector<8x128xf32>
    %582 = arith.mulf %38, %581 : vector<8x128xf32>
    %c81 = arith.constant 81 : index
    %583 = memref.load %arg1[%c81] : memref<351xf32, #tpu.memory_space<smem>>
    %584 = vector.broadcast %583 : f32 to vector<8x128xf32>
    %585 = arith.mulf %46, %584 : vector<8x128xf32>
    %c93 = arith.constant 93 : index
    %586 = memref.load %arg1[%c93] : memref<351xf32, #tpu.memory_space<smem>>
    %587 = vector.broadcast %586 : f32 to vector<8x128xf32>
    %588 = arith.mulf %54, %587 : vector<8x128xf32>
    %c105 = arith.constant 105 : index
    %589 = memref.load %arg1[%c105] : memref<351xf32, #tpu.memory_space<smem>>
    %590 = vector.broadcast %589 : f32 to vector<8x128xf32>
    %591 = arith.mulf %62, %590 : vector<8x128xf32>
    %c117 = arith.constant 117 : index
    %592 = memref.load %arg1[%c117] : memref<351xf32, #tpu.memory_space<smem>>
    %593 = vector.broadcast %592 : f32 to vector<8x128xf32>
    %594 = arith.mulf %70, %593 : vector<8x128xf32>
    %c129 = arith.constant 129 : index
    %595 = memref.load %arg1[%c129] : memref<351xf32, #tpu.memory_space<smem>>
    %596 = vector.broadcast %595 : f32 to vector<8x128xf32>
    %597 = arith.mulf %78, %596 : vector<8x128xf32>
    %c141 = arith.constant 141 : index
    %598 = memref.load %arg1[%c141] : memref<351xf32, #tpu.memory_space<smem>>
    %599 = vector.broadcast %598 : f32 to vector<8x128xf32>
    %600 = arith.mulf %86, %599 : vector<8x128xf32>
    %c153 = arith.constant 153 : index
    %601 = memref.load %arg1[%c153] : memref<351xf32, #tpu.memory_space<smem>>
    %602 = vector.broadcast %601 : f32 to vector<8x128xf32>
    %603 = arith.mulf %94, %602 : vector<8x128xf32>
    %c165 = arith.constant 165 : index
    %604 = memref.load %arg1[%c165] : memref<351xf32, #tpu.memory_space<smem>>
    %605 = vector.broadcast %604 : f32 to vector<8x128xf32>
    %606 = arith.mulf %102, %605 : vector<8x128xf32>
    %607 = arith.addf %573, %576 : vector<8x128xf32>
    %608 = arith.addf %579, %582 : vector<8x128xf32>
    %609 = arith.addf %585, %588 : vector<8x128xf32>
    %610 = arith.addf %591, %594 : vector<8x128xf32>
    %611 = arith.addf %597, %600 : vector<8x128xf32>
    %612 = arith.addf %603, %606 : vector<8x128xf32>
    %613 = arith.addf %607, %608 : vector<8x128xf32>
    %614 = arith.addf %609, %610 : vector<8x128xf32>
    %615 = arith.addf %611, %612 : vector<8x128xf32>
    %616 = arith.addf %613, %614 : vector<8x128xf32>
    %617 = arith.addf %616, %615 : vector<8x128xf32>
    %c177 = arith.constant 177 : index
    %618 = memref.load %arg1[%c177] : memref<351xf32, #tpu.memory_space<smem>>
    %619 = vector.broadcast %618 : f32 to vector<8x128xf32>
    %620 = arith.addf %617, %619 : vector<8x128xf32>
    %cst_21 = arith.constant 0.000000e+00 : f32
    %621 = vector.broadcast %cst_21 : f32 to vector<8x128xf32>
    %622 = arith.maximumf %620, %621 : vector<8x128xf32>
    %c34 = arith.constant 34 : index
    %623 = memref.load %arg1[%c34] : memref<351xf32, #tpu.memory_space<smem>>
    %624 = vector.broadcast %623 : f32 to vector<8x128xf32>
    %625 = arith.mulf %14, %624 : vector<8x128xf32>
    %c46 = arith.constant 46 : index
    %626 = memref.load %arg1[%c46] : memref<351xf32, #tpu.memory_space<smem>>
    %627 = vector.broadcast %626 : f32 to vector<8x128xf32>
    %628 = arith.mulf %22, %627 : vector<8x128xf32>
    %c58 = arith.constant 58 : index
    %629 = memref.load %arg1[%c58] : memref<351xf32, #tpu.memory_space<smem>>
    %630 = vector.broadcast %629 : f32 to vector<8x128xf32>
    %631 = arith.mulf %30, %630 : vector<8x128xf32>
    %c70 = arith.constant 70 : index
    %632 = memref.load %arg1[%c70] : memref<351xf32, #tpu.memory_space<smem>>
    %633 = vector.broadcast %632 : f32 to vector<8x128xf32>
    %634 = arith.mulf %38, %633 : vector<8x128xf32>
    %c82 = arith.constant 82 : index
    %635 = memref.load %arg1[%c82] : memref<351xf32, #tpu.memory_space<smem>>
    %636 = vector.broadcast %635 : f32 to vector<8x128xf32>
    %637 = arith.mulf %46, %636 : vector<8x128xf32>
    %c94 = arith.constant 94 : index
    %638 = memref.load %arg1[%c94] : memref<351xf32, #tpu.memory_space<smem>>
    %639 = vector.broadcast %638 : f32 to vector<8x128xf32>
    %640 = arith.mulf %54, %639 : vector<8x128xf32>
    %c106 = arith.constant 106 : index
    %641 = memref.load %arg1[%c106] : memref<351xf32, #tpu.memory_space<smem>>
    %642 = vector.broadcast %641 : f32 to vector<8x128xf32>
    %643 = arith.mulf %62, %642 : vector<8x128xf32>
    %c118 = arith.constant 118 : index
    %644 = memref.load %arg1[%c118] : memref<351xf32, #tpu.memory_space<smem>>
    %645 = vector.broadcast %644 : f32 to vector<8x128xf32>
    %646 = arith.mulf %70, %645 : vector<8x128xf32>
    %c130 = arith.constant 130 : index
    %647 = memref.load %arg1[%c130] : memref<351xf32, #tpu.memory_space<smem>>
    %648 = vector.broadcast %647 : f32 to vector<8x128xf32>
    %649 = arith.mulf %78, %648 : vector<8x128xf32>
    %c142 = arith.constant 142 : index
    %650 = memref.load %arg1[%c142] : memref<351xf32, #tpu.memory_space<smem>>
    %651 = vector.broadcast %650 : f32 to vector<8x128xf32>
    %652 = arith.mulf %86, %651 : vector<8x128xf32>
    %c154 = arith.constant 154 : index
    %653 = memref.load %arg1[%c154] : memref<351xf32, #tpu.memory_space<smem>>
    %654 = vector.broadcast %653 : f32 to vector<8x128xf32>
    %655 = arith.mulf %94, %654 : vector<8x128xf32>
    %c166 = arith.constant 166 : index
    %656 = memref.load %arg1[%c166] : memref<351xf32, #tpu.memory_space<smem>>
    %657 = vector.broadcast %656 : f32 to vector<8x128xf32>
    %658 = arith.mulf %102, %657 : vector<8x128xf32>
    %659 = arith.addf %625, %628 : vector<8x128xf32>
    %660 = arith.addf %631, %634 : vector<8x128xf32>
    %661 = arith.addf %637, %640 : vector<8x128xf32>
    %662 = arith.addf %643, %646 : vector<8x128xf32>
    %663 = arith.addf %649, %652 : vector<8x128xf32>
    %664 = arith.addf %655, %658 : vector<8x128xf32>
    %665 = arith.addf %659, %660 : vector<8x128xf32>
    %666 = arith.addf %661, %662 : vector<8x128xf32>
    %667 = arith.addf %663, %664 : vector<8x128xf32>
    %668 = arith.addf %665, %666 : vector<8x128xf32>
    %669 = arith.addf %668, %667 : vector<8x128xf32>
    %c178 = arith.constant 178 : index
    %670 = memref.load %arg1[%c178] : memref<351xf32, #tpu.memory_space<smem>>
    %671 = vector.broadcast %670 : f32 to vector<8x128xf32>
    %672 = arith.addf %669, %671 : vector<8x128xf32>
    %cst_22 = arith.constant 0.000000e+00 : f32
    %673 = vector.broadcast %cst_22 : f32 to vector<8x128xf32>
    %674 = arith.maximumf %672, %673 : vector<8x128xf32>
    %c35 = arith.constant 35 : index
    %675 = memref.load %arg1[%c35] : memref<351xf32, #tpu.memory_space<smem>>
    %676 = vector.broadcast %675 : f32 to vector<8x128xf32>
    %677 = arith.mulf %14, %676 : vector<8x128xf32>
    %c47 = arith.constant 47 : index
    %678 = memref.load %arg1[%c47] : memref<351xf32, #tpu.memory_space<smem>>
    %679 = vector.broadcast %678 : f32 to vector<8x128xf32>
    %680 = arith.mulf %22, %679 : vector<8x128xf32>
    %c59 = arith.constant 59 : index
    %681 = memref.load %arg1[%c59] : memref<351xf32, #tpu.memory_space<smem>>
    %682 = vector.broadcast %681 : f32 to vector<8x128xf32>
    %683 = arith.mulf %30, %682 : vector<8x128xf32>
    %c71 = arith.constant 71 : index
    %684 = memref.load %arg1[%c71] : memref<351xf32, #tpu.memory_space<smem>>
    %685 = vector.broadcast %684 : f32 to vector<8x128xf32>
    %686 = arith.mulf %38, %685 : vector<8x128xf32>
    %c83 = arith.constant 83 : index
    %687 = memref.load %arg1[%c83] : memref<351xf32, #tpu.memory_space<smem>>
    %688 = vector.broadcast %687 : f32 to vector<8x128xf32>
    %689 = arith.mulf %46, %688 : vector<8x128xf32>
    %c95 = arith.constant 95 : index
    %690 = memref.load %arg1[%c95] : memref<351xf32, #tpu.memory_space<smem>>
    %691 = vector.broadcast %690 : f32 to vector<8x128xf32>
    %692 = arith.mulf %54, %691 : vector<8x128xf32>
    %c107 = arith.constant 107 : index
    %693 = memref.load %arg1[%c107] : memref<351xf32, #tpu.memory_space<smem>>
    %694 = vector.broadcast %693 : f32 to vector<8x128xf32>
    %695 = arith.mulf %62, %694 : vector<8x128xf32>
    %c119 = arith.constant 119 : index
    %696 = memref.load %arg1[%c119] : memref<351xf32, #tpu.memory_space<smem>>
    %697 = vector.broadcast %696 : f32 to vector<8x128xf32>
    %698 = arith.mulf %70, %697 : vector<8x128xf32>
    %c131 = arith.constant 131 : index
    %699 = memref.load %arg1[%c131] : memref<351xf32, #tpu.memory_space<smem>>
    %700 = vector.broadcast %699 : f32 to vector<8x128xf32>
    %701 = arith.mulf %78, %700 : vector<8x128xf32>
    %c143 = arith.constant 143 : index
    %702 = memref.load %arg1[%c143] : memref<351xf32, #tpu.memory_space<smem>>
    %703 = vector.broadcast %702 : f32 to vector<8x128xf32>
    %704 = arith.mulf %86, %703 : vector<8x128xf32>
    %c155 = arith.constant 155 : index
    %705 = memref.load %arg1[%c155] : memref<351xf32, #tpu.memory_space<smem>>
    %706 = vector.broadcast %705 : f32 to vector<8x128xf32>
    %707 = arith.mulf %94, %706 : vector<8x128xf32>
    %c167 = arith.constant 167 : index
    %708 = memref.load %arg1[%c167] : memref<351xf32, #tpu.memory_space<smem>>
    %709 = vector.broadcast %708 : f32 to vector<8x128xf32>
    %710 = arith.mulf %102, %709 : vector<8x128xf32>
    %711 = arith.addf %677, %680 : vector<8x128xf32>
    %712 = arith.addf %683, %686 : vector<8x128xf32>
    %713 = arith.addf %689, %692 : vector<8x128xf32>
    %714 = arith.addf %695, %698 : vector<8x128xf32>
    %715 = arith.addf %701, %704 : vector<8x128xf32>
    %716 = arith.addf %707, %710 : vector<8x128xf32>
    %717 = arith.addf %711, %712 : vector<8x128xf32>
    %718 = arith.addf %713, %714 : vector<8x128xf32>
    %719 = arith.addf %715, %716 : vector<8x128xf32>
    %720 = arith.addf %717, %718 : vector<8x128xf32>
    %721 = arith.addf %720, %719 : vector<8x128xf32>
    %c179 = arith.constant 179 : index
    %722 = memref.load %arg1[%c179] : memref<351xf32, #tpu.memory_space<smem>>
    %723 = vector.broadcast %722 : f32 to vector<8x128xf32>
    %724 = arith.addf %721, %723 : vector<8x128xf32>
    %cst_23 = arith.constant 0.000000e+00 : f32
    %725 = vector.broadcast %cst_23 : f32 to vector<8x128xf32>
    %726 = arith.maximumf %724, %725 : vector<8x128xf32>
    %c180 = arith.constant 180 : index
    %727 = memref.load %arg1[%c180] : memref<351xf32, #tpu.memory_space<smem>>
    %728 = vector.broadcast %727 : f32 to vector<8x128xf32>
    %729 = arith.mulf %154, %728 : vector<8x128xf32>
    %c192 = arith.constant 192 : index
    %730 = memref.load %arg1[%c192] : memref<351xf32, #tpu.memory_space<smem>>
    %731 = vector.broadcast %730 : f32 to vector<8x128xf32>
    %732 = arith.mulf %206, %731 : vector<8x128xf32>
    %c204 = arith.constant 204 : index
    %733 = memref.load %arg1[%c204] : memref<351xf32, #tpu.memory_space<smem>>
    %734 = vector.broadcast %733 : f32 to vector<8x128xf32>
    %735 = arith.mulf %258, %734 : vector<8x128xf32>
    %c216 = arith.constant 216 : index
    %736 = memref.load %arg1[%c216] : memref<351xf32, #tpu.memory_space<smem>>
    %737 = vector.broadcast %736 : f32 to vector<8x128xf32>
    %738 = arith.mulf %310, %737 : vector<8x128xf32>
    %c228 = arith.constant 228 : index
    %739 = memref.load %arg1[%c228] : memref<351xf32, #tpu.memory_space<smem>>
    %740 = vector.broadcast %739 : f32 to vector<8x128xf32>
    %741 = arith.mulf %362, %740 : vector<8x128xf32>
    %c240 = arith.constant 240 : index
    %742 = memref.load %arg1[%c240] : memref<351xf32, #tpu.memory_space<smem>>
    %743 = vector.broadcast %742 : f32 to vector<8x128xf32>
    %744 = arith.mulf %414, %743 : vector<8x128xf32>
    %c252 = arith.constant 252 : index
    %745 = memref.load %arg1[%c252] : memref<351xf32, #tpu.memory_space<smem>>
    %746 = vector.broadcast %745 : f32 to vector<8x128xf32>
    %747 = arith.mulf %466, %746 : vector<8x128xf32>
    %c264 = arith.constant 264 : index
    %748 = memref.load %arg1[%c264] : memref<351xf32, #tpu.memory_space<smem>>
    %749 = vector.broadcast %748 : f32 to vector<8x128xf32>
    %750 = arith.mulf %518, %749 : vector<8x128xf32>
    %c276 = arith.constant 276 : index
    %751 = memref.load %arg1[%c276] : memref<351xf32, #tpu.memory_space<smem>>
    %752 = vector.broadcast %751 : f32 to vector<8x128xf32>
    %753 = arith.mulf %570, %752 : vector<8x128xf32>
    %c288 = arith.constant 288 : index
    %754 = memref.load %arg1[%c288] : memref<351xf32, #tpu.memory_space<smem>>
    %755 = vector.broadcast %754 : f32 to vector<8x128xf32>
    %756 = arith.mulf %622, %755 : vector<8x128xf32>
    %c300 = arith.constant 300 : index
    %757 = memref.load %arg1[%c300] : memref<351xf32, #tpu.memory_space<smem>>
    %758 = vector.broadcast %757 : f32 to vector<8x128xf32>
    %759 = arith.mulf %674, %758 : vector<8x128xf32>
    %c312 = arith.constant 312 : index
    %760 = memref.load %arg1[%c312] : memref<351xf32, #tpu.memory_space<smem>>
    %761 = vector.broadcast %760 : f32 to vector<8x128xf32>
    %762 = arith.mulf %726, %761 : vector<8x128xf32>
    %763 = arith.addf %729, %732 : vector<8x128xf32>
    %764 = arith.addf %735, %738 : vector<8x128xf32>
    %765 = arith.addf %741, %744 : vector<8x128xf32>
    %766 = arith.addf %747, %750 : vector<8x128xf32>
    %767 = arith.addf %753, %756 : vector<8x128xf32>
    %768 = arith.addf %759, %762 : vector<8x128xf32>
    %769 = arith.addf %763, %764 : vector<8x128xf32>
    %770 = arith.addf %765, %766 : vector<8x128xf32>
    %771 = arith.addf %767, %768 : vector<8x128xf32>
    %772 = arith.addf %769, %770 : vector<8x128xf32>
    %773 = arith.addf %772, %771 : vector<8x128xf32>
    %c324 = arith.constant 324 : index
    %774 = memref.load %arg1[%c324] : memref<351xf32, #tpu.memory_space<smem>>
    %775 = vector.broadcast %774 : f32 to vector<8x128xf32>
    %776 = arith.addf %773, %775 : vector<8x128xf32>
    %cst_24 = arith.constant 0.000000e+00 : f32
    %777 = vector.broadcast %cst_24 : f32 to vector<8x128xf32>
    %778 = arith.maximumf %776, %777 : vector<8x128xf32>
    %c181 = arith.constant 181 : index
    %779 = memref.load %arg1[%c181] : memref<351xf32, #tpu.memory_space<smem>>
    %780 = vector.broadcast %779 : f32 to vector<8x128xf32>
    %781 = arith.mulf %154, %780 : vector<8x128xf32>
    %c193 = arith.constant 193 : index
    %782 = memref.load %arg1[%c193] : memref<351xf32, #tpu.memory_space<smem>>
    %783 = vector.broadcast %782 : f32 to vector<8x128xf32>
    %784 = arith.mulf %206, %783 : vector<8x128xf32>
    %c205 = arith.constant 205 : index
    %785 = memref.load %arg1[%c205] : memref<351xf32, #tpu.memory_space<smem>>
    %786 = vector.broadcast %785 : f32 to vector<8x128xf32>
    %787 = arith.mulf %258, %786 : vector<8x128xf32>
    %c217 = arith.constant 217 : index
    %788 = memref.load %arg1[%c217] : memref<351xf32, #tpu.memory_space<smem>>
    %789 = vector.broadcast %788 : f32 to vector<8x128xf32>
    %790 = arith.mulf %310, %789 : vector<8x128xf32>
    %c229 = arith.constant 229 : index
    %791 = memref.load %arg1[%c229] : memref<351xf32, #tpu.memory_space<smem>>
    %792 = vector.broadcast %791 : f32 to vector<8x128xf32>
    %793 = arith.mulf %362, %792 : vector<8x128xf32>
    %c241 = arith.constant 241 : index
    %794 = memref.load %arg1[%c241] : memref<351xf32, #tpu.memory_space<smem>>
    %795 = vector.broadcast %794 : f32 to vector<8x128xf32>
    %796 = arith.mulf %414, %795 : vector<8x128xf32>
    %c253 = arith.constant 253 : index
    %797 = memref.load %arg1[%c253] : memref<351xf32, #tpu.memory_space<smem>>
    %798 = vector.broadcast %797 : f32 to vector<8x128xf32>
    %799 = arith.mulf %466, %798 : vector<8x128xf32>
    %c265 = arith.constant 265 : index
    %800 = memref.load %arg1[%c265] : memref<351xf32, #tpu.memory_space<smem>>
    %801 = vector.broadcast %800 : f32 to vector<8x128xf32>
    %802 = arith.mulf %518, %801 : vector<8x128xf32>
    %c277 = arith.constant 277 : index
    %803 = memref.load %arg1[%c277] : memref<351xf32, #tpu.memory_space<smem>>
    %804 = vector.broadcast %803 : f32 to vector<8x128xf32>
    %805 = arith.mulf %570, %804 : vector<8x128xf32>
    %c289 = arith.constant 289 : index
    %806 = memref.load %arg1[%c289] : memref<351xf32, #tpu.memory_space<smem>>
    %807 = vector.broadcast %806 : f32 to vector<8x128xf32>
    %808 = arith.mulf %622, %807 : vector<8x128xf32>
    %c301 = arith.constant 301 : index
    %809 = memref.load %arg1[%c301] : memref<351xf32, #tpu.memory_space<smem>>
    %810 = vector.broadcast %809 : f32 to vector<8x128xf32>
    %811 = arith.mulf %674, %810 : vector<8x128xf32>
    %c313 = arith.constant 313 : index
    %812 = memref.load %arg1[%c313] : memref<351xf32, #tpu.memory_space<smem>>
    %813 = vector.broadcast %812 : f32 to vector<8x128xf32>
    %814 = arith.mulf %726, %813 : vector<8x128xf32>
    %815 = arith.addf %781, %784 : vector<8x128xf32>
    %816 = arith.addf %787, %790 : vector<8x128xf32>
    %817 = arith.addf %793, %796 : vector<8x128xf32>
    %818 = arith.addf %799, %802 : vector<8x128xf32>
    %819 = arith.addf %805, %808 : vector<8x128xf32>
    %820 = arith.addf %811, %814 : vector<8x128xf32>
    %821 = arith.addf %815, %816 : vector<8x128xf32>
    %822 = arith.addf %817, %818 : vector<8x128xf32>
    %823 = arith.addf %819, %820 : vector<8x128xf32>
    %824 = arith.addf %821, %822 : vector<8x128xf32>
    %825 = arith.addf %824, %823 : vector<8x128xf32>
    %c325 = arith.constant 325 : index
    %826 = memref.load %arg1[%c325] : memref<351xf32, #tpu.memory_space<smem>>
    %827 = vector.broadcast %826 : f32 to vector<8x128xf32>
    %828 = arith.addf %825, %827 : vector<8x128xf32>
    %cst_25 = arith.constant 0.000000e+00 : f32
    %829 = vector.broadcast %cst_25 : f32 to vector<8x128xf32>
    %830 = arith.maximumf %828, %829 : vector<8x128xf32>
    %c182 = arith.constant 182 : index
    %831 = memref.load %arg1[%c182] : memref<351xf32, #tpu.memory_space<smem>>
    %832 = vector.broadcast %831 : f32 to vector<8x128xf32>
    %833 = arith.mulf %154, %832 : vector<8x128xf32>
    %c194 = arith.constant 194 : index
    %834 = memref.load %arg1[%c194] : memref<351xf32, #tpu.memory_space<smem>>
    %835 = vector.broadcast %834 : f32 to vector<8x128xf32>
    %836 = arith.mulf %206, %835 : vector<8x128xf32>
    %c206 = arith.constant 206 : index
    %837 = memref.load %arg1[%c206] : memref<351xf32, #tpu.memory_space<smem>>
    %838 = vector.broadcast %837 : f32 to vector<8x128xf32>
    %839 = arith.mulf %258, %838 : vector<8x128xf32>
    %c218 = arith.constant 218 : index
    %840 = memref.load %arg1[%c218] : memref<351xf32, #tpu.memory_space<smem>>
    %841 = vector.broadcast %840 : f32 to vector<8x128xf32>
    %842 = arith.mulf %310, %841 : vector<8x128xf32>
    %c230 = arith.constant 230 : index
    %843 = memref.load %arg1[%c230] : memref<351xf32, #tpu.memory_space<smem>>
    %844 = vector.broadcast %843 : f32 to vector<8x128xf32>
    %845 = arith.mulf %362, %844 : vector<8x128xf32>
    %c242 = arith.constant 242 : index
    %846 = memref.load %arg1[%c242] : memref<351xf32, #tpu.memory_space<smem>>
    %847 = vector.broadcast %846 : f32 to vector<8x128xf32>
    %848 = arith.mulf %414, %847 : vector<8x128xf32>
    %c254 = arith.constant 254 : index
    %849 = memref.load %arg1[%c254] : memref<351xf32, #tpu.memory_space<smem>>
    %850 = vector.broadcast %849 : f32 to vector<8x128xf32>
    %851 = arith.mulf %466, %850 : vector<8x128xf32>
    %c266 = arith.constant 266 : index
    %852 = memref.load %arg1[%c266] : memref<351xf32, #tpu.memory_space<smem>>
    %853 = vector.broadcast %852 : f32 to vector<8x128xf32>
    %854 = arith.mulf %518, %853 : vector<8x128xf32>
    %c278 = arith.constant 278 : index
    %855 = memref.load %arg1[%c278] : memref<351xf32, #tpu.memory_space<smem>>
    %856 = vector.broadcast %855 : f32 to vector<8x128xf32>
    %857 = arith.mulf %570, %856 : vector<8x128xf32>
    %c290 = arith.constant 290 : index
    %858 = memref.load %arg1[%c290] : memref<351xf32, #tpu.memory_space<smem>>
    %859 = vector.broadcast %858 : f32 to vector<8x128xf32>
    %860 = arith.mulf %622, %859 : vector<8x128xf32>
    %c302 = arith.constant 302 : index
    %861 = memref.load %arg1[%c302] : memref<351xf32, #tpu.memory_space<smem>>
    %862 = vector.broadcast %861 : f32 to vector<8x128xf32>
    %863 = arith.mulf %674, %862 : vector<8x128xf32>
    %c314 = arith.constant 314 : index
    %864 = memref.load %arg1[%c314] : memref<351xf32, #tpu.memory_space<smem>>
    %865 = vector.broadcast %864 : f32 to vector<8x128xf32>
    %866 = arith.mulf %726, %865 : vector<8x128xf32>
    %867 = arith.addf %833, %836 : vector<8x128xf32>
    %868 = arith.addf %839, %842 : vector<8x128xf32>
    %869 = arith.addf %845, %848 : vector<8x128xf32>
    %870 = arith.addf %851, %854 : vector<8x128xf32>
    %871 = arith.addf %857, %860 : vector<8x128xf32>
    %872 = arith.addf %863, %866 : vector<8x128xf32>
    %873 = arith.addf %867, %868 : vector<8x128xf32>
    %874 = arith.addf %869, %870 : vector<8x128xf32>
    %875 = arith.addf %871, %872 : vector<8x128xf32>
    %876 = arith.addf %873, %874 : vector<8x128xf32>
    %877 = arith.addf %876, %875 : vector<8x128xf32>
    %c326 = arith.constant 326 : index
    %878 = memref.load %arg1[%c326] : memref<351xf32, #tpu.memory_space<smem>>
    %879 = vector.broadcast %878 : f32 to vector<8x128xf32>
    %880 = arith.addf %877, %879 : vector<8x128xf32>
    %cst_26 = arith.constant 0.000000e+00 : f32
    %881 = vector.broadcast %cst_26 : f32 to vector<8x128xf32>
    %882 = arith.maximumf %880, %881 : vector<8x128xf32>
    %c183 = arith.constant 183 : index
    %883 = memref.load %arg1[%c183] : memref<351xf32, #tpu.memory_space<smem>>
    %884 = vector.broadcast %883 : f32 to vector<8x128xf32>
    %885 = arith.mulf %154, %884 : vector<8x128xf32>
    %c195 = arith.constant 195 : index
    %886 = memref.load %arg1[%c195] : memref<351xf32, #tpu.memory_space<smem>>
    %887 = vector.broadcast %886 : f32 to vector<8x128xf32>
    %888 = arith.mulf %206, %887 : vector<8x128xf32>
    %c207 = arith.constant 207 : index
    %889 = memref.load %arg1[%c207] : memref<351xf32, #tpu.memory_space<smem>>
    %890 = vector.broadcast %889 : f32 to vector<8x128xf32>
    %891 = arith.mulf %258, %890 : vector<8x128xf32>
    %c219 = arith.constant 219 : index
    %892 = memref.load %arg1[%c219] : memref<351xf32, #tpu.memory_space<smem>>
    %893 = vector.broadcast %892 : f32 to vector<8x128xf32>
    %894 = arith.mulf %310, %893 : vector<8x128xf32>
    %c231 = arith.constant 231 : index
    %895 = memref.load %arg1[%c231] : memref<351xf32, #tpu.memory_space<smem>>
    %896 = vector.broadcast %895 : f32 to vector<8x128xf32>
    %897 = arith.mulf %362, %896 : vector<8x128xf32>
    %c243 = arith.constant 243 : index
    %898 = memref.load %arg1[%c243] : memref<351xf32, #tpu.memory_space<smem>>
    %899 = vector.broadcast %898 : f32 to vector<8x128xf32>
    %900 = arith.mulf %414, %899 : vector<8x128xf32>
    %c255 = arith.constant 255 : index
    %901 = memref.load %arg1[%c255] : memref<351xf32, #tpu.memory_space<smem>>
    %902 = vector.broadcast %901 : f32 to vector<8x128xf32>
    %903 = arith.mulf %466, %902 : vector<8x128xf32>
    %c267 = arith.constant 267 : index
    %904 = memref.load %arg1[%c267] : memref<351xf32, #tpu.memory_space<smem>>
    %905 = vector.broadcast %904 : f32 to vector<8x128xf32>
    %906 = arith.mulf %518, %905 : vector<8x128xf32>
    %c279 = arith.constant 279 : index
    %907 = memref.load %arg1[%c279] : memref<351xf32, #tpu.memory_space<smem>>
    %908 = vector.broadcast %907 : f32 to vector<8x128xf32>
    %909 = arith.mulf %570, %908 : vector<8x128xf32>
    %c291 = arith.constant 291 : index
    %910 = memref.load %arg1[%c291] : memref<351xf32, #tpu.memory_space<smem>>
    %911 = vector.broadcast %910 : f32 to vector<8x128xf32>
    %912 = arith.mulf %622, %911 : vector<8x128xf32>
    %c303 = arith.constant 303 : index
    %913 = memref.load %arg1[%c303] : memref<351xf32, #tpu.memory_space<smem>>
    %914 = vector.broadcast %913 : f32 to vector<8x128xf32>
    %915 = arith.mulf %674, %914 : vector<8x128xf32>
    %c315 = arith.constant 315 : index
    %916 = memref.load %arg1[%c315] : memref<351xf32, #tpu.memory_space<smem>>
    %917 = vector.broadcast %916 : f32 to vector<8x128xf32>
    %918 = arith.mulf %726, %917 : vector<8x128xf32>
    %919 = arith.addf %885, %888 : vector<8x128xf32>
    %920 = arith.addf %891, %894 : vector<8x128xf32>
    %921 = arith.addf %897, %900 : vector<8x128xf32>
    %922 = arith.addf %903, %906 : vector<8x128xf32>
    %923 = arith.addf %909, %912 : vector<8x128xf32>
    %924 = arith.addf %915, %918 : vector<8x128xf32>
    %925 = arith.addf %919, %920 : vector<8x128xf32>
    %926 = arith.addf %921, %922 : vector<8x128xf32>
    %927 = arith.addf %923, %924 : vector<8x128xf32>
    %928 = arith.addf %925, %926 : vector<8x128xf32>
    %929 = arith.addf %928, %927 : vector<8x128xf32>
    %c327 = arith.constant 327 : index
    %930 = memref.load %arg1[%c327] : memref<351xf32, #tpu.memory_space<smem>>
    %931 = vector.broadcast %930 : f32 to vector<8x128xf32>
    %932 = arith.addf %929, %931 : vector<8x128xf32>
    %cst_27 = arith.constant 0.000000e+00 : f32
    %933 = vector.broadcast %cst_27 : f32 to vector<8x128xf32>
    %934 = arith.maximumf %932, %933 : vector<8x128xf32>
    %c184 = arith.constant 184 : index
    %935 = memref.load %arg1[%c184] : memref<351xf32, #tpu.memory_space<smem>>
    %936 = vector.broadcast %935 : f32 to vector<8x128xf32>
    %937 = arith.mulf %154, %936 : vector<8x128xf32>
    %c196 = arith.constant 196 : index
    %938 = memref.load %arg1[%c196] : memref<351xf32, #tpu.memory_space<smem>>
    %939 = vector.broadcast %938 : f32 to vector<8x128xf32>
    %940 = arith.mulf %206, %939 : vector<8x128xf32>
    %c208 = arith.constant 208 : index
    %941 = memref.load %arg1[%c208] : memref<351xf32, #tpu.memory_space<smem>>
    %942 = vector.broadcast %941 : f32 to vector<8x128xf32>
    %943 = arith.mulf %258, %942 : vector<8x128xf32>
    %c220 = arith.constant 220 : index
    %944 = memref.load %arg1[%c220] : memref<351xf32, #tpu.memory_space<smem>>
    %945 = vector.broadcast %944 : f32 to vector<8x128xf32>
    %946 = arith.mulf %310, %945 : vector<8x128xf32>
    %c232 = arith.constant 232 : index
    %947 = memref.load %arg1[%c232] : memref<351xf32, #tpu.memory_space<smem>>
    %948 = vector.broadcast %947 : f32 to vector<8x128xf32>
    %949 = arith.mulf %362, %948 : vector<8x128xf32>
    %c244 = arith.constant 244 : index
    %950 = memref.load %arg1[%c244] : memref<351xf32, #tpu.memory_space<smem>>
    %951 = vector.broadcast %950 : f32 to vector<8x128xf32>
    %952 = arith.mulf %414, %951 : vector<8x128xf32>
    %c256 = arith.constant 256 : index
    %953 = memref.load %arg1[%c256] : memref<351xf32, #tpu.memory_space<smem>>
    %954 = vector.broadcast %953 : f32 to vector<8x128xf32>
    %955 = arith.mulf %466, %954 : vector<8x128xf32>
    %c268 = arith.constant 268 : index
    %956 = memref.load %arg1[%c268] : memref<351xf32, #tpu.memory_space<smem>>
    %957 = vector.broadcast %956 : f32 to vector<8x128xf32>
    %958 = arith.mulf %518, %957 : vector<8x128xf32>
    %c280 = arith.constant 280 : index
    %959 = memref.load %arg1[%c280] : memref<351xf32, #tpu.memory_space<smem>>
    %960 = vector.broadcast %959 : f32 to vector<8x128xf32>
    %961 = arith.mulf %570, %960 : vector<8x128xf32>
    %c292 = arith.constant 292 : index
    %962 = memref.load %arg1[%c292] : memref<351xf32, #tpu.memory_space<smem>>
    %963 = vector.broadcast %962 : f32 to vector<8x128xf32>
    %964 = arith.mulf %622, %963 : vector<8x128xf32>
    %c304 = arith.constant 304 : index
    %965 = memref.load %arg1[%c304] : memref<351xf32, #tpu.memory_space<smem>>
    %966 = vector.broadcast %965 : f32 to vector<8x128xf32>
    %967 = arith.mulf %674, %966 : vector<8x128xf32>
    %c316 = arith.constant 316 : index
    %968 = memref.load %arg1[%c316] : memref<351xf32, #tpu.memory_space<smem>>
    %969 = vector.broadcast %968 : f32 to vector<8x128xf32>
    %970 = arith.mulf %726, %969 : vector<8x128xf32>
    %971 = arith.addf %937, %940 : vector<8x128xf32>
    %972 = arith.addf %943, %946 : vector<8x128xf32>
    %973 = arith.addf %949, %952 : vector<8x128xf32>
    %974 = arith.addf %955, %958 : vector<8x128xf32>
    %975 = arith.addf %961, %964 : vector<8x128xf32>
    %976 = arith.addf %967, %970 : vector<8x128xf32>
    %977 = arith.addf %971, %972 : vector<8x128xf32>
    %978 = arith.addf %973, %974 : vector<8x128xf32>
    %979 = arith.addf %975, %976 : vector<8x128xf32>
    %980 = arith.addf %977, %978 : vector<8x128xf32>
    %981 = arith.addf %980, %979 : vector<8x128xf32>
    %c328 = arith.constant 328 : index
    %982 = memref.load %arg1[%c328] : memref<351xf32, #tpu.memory_space<smem>>
    %983 = vector.broadcast %982 : f32 to vector<8x128xf32>
    %984 = arith.addf %981, %983 : vector<8x128xf32>
    %cst_28 = arith.constant 0.000000e+00 : f32
    %985 = vector.broadcast %cst_28 : f32 to vector<8x128xf32>
    %986 = arith.maximumf %984, %985 : vector<8x128xf32>
    %c185 = arith.constant 185 : index
    %987 = memref.load %arg1[%c185] : memref<351xf32, #tpu.memory_space<smem>>
    %988 = vector.broadcast %987 : f32 to vector<8x128xf32>
    %989 = arith.mulf %154, %988 : vector<8x128xf32>
    %c197 = arith.constant 197 : index
    %990 = memref.load %arg1[%c197] : memref<351xf32, #tpu.memory_space<smem>>
    %991 = vector.broadcast %990 : f32 to vector<8x128xf32>
    %992 = arith.mulf %206, %991 : vector<8x128xf32>
    %c209 = arith.constant 209 : index
    %993 = memref.load %arg1[%c209] : memref<351xf32, #tpu.memory_space<smem>>
    %994 = vector.broadcast %993 : f32 to vector<8x128xf32>
    %995 = arith.mulf %258, %994 : vector<8x128xf32>
    %c221 = arith.constant 221 : index
    %996 = memref.load %arg1[%c221] : memref<351xf32, #tpu.memory_space<smem>>
    %997 = vector.broadcast %996 : f32 to vector<8x128xf32>
    %998 = arith.mulf %310, %997 : vector<8x128xf32>
    %c233 = arith.constant 233 : index
    %999 = memref.load %arg1[%c233] : memref<351xf32, #tpu.memory_space<smem>>
    %1000 = vector.broadcast %999 : f32 to vector<8x128xf32>
    %1001 = arith.mulf %362, %1000 : vector<8x128xf32>
    %c245 = arith.constant 245 : index
    %1002 = memref.load %arg1[%c245] : memref<351xf32, #tpu.memory_space<smem>>
    %1003 = vector.broadcast %1002 : f32 to vector<8x128xf32>
    %1004 = arith.mulf %414, %1003 : vector<8x128xf32>
    %c257 = arith.constant 257 : index
    %1005 = memref.load %arg1[%c257] : memref<351xf32, #tpu.memory_space<smem>>
    %1006 = vector.broadcast %1005 : f32 to vector<8x128xf32>
    %1007 = arith.mulf %466, %1006 : vector<8x128xf32>
    %c269 = arith.constant 269 : index
    %1008 = memref.load %arg1[%c269] : memref<351xf32, #tpu.memory_space<smem>>
    %1009 = vector.broadcast %1008 : f32 to vector<8x128xf32>
    %1010 = arith.mulf %518, %1009 : vector<8x128xf32>
    %c281 = arith.constant 281 : index
    %1011 = memref.load %arg1[%c281] : memref<351xf32, #tpu.memory_space<smem>>
    %1012 = vector.broadcast %1011 : f32 to vector<8x128xf32>
    %1013 = arith.mulf %570, %1012 : vector<8x128xf32>
    %c293 = arith.constant 293 : index
    %1014 = memref.load %arg1[%c293] : memref<351xf32, #tpu.memory_space<smem>>
    %1015 = vector.broadcast %1014 : f32 to vector<8x128xf32>
    %1016 = arith.mulf %622, %1015 : vector<8x128xf32>
    %c305 = arith.constant 305 : index
    %1017 = memref.load %arg1[%c305] : memref<351xf32, #tpu.memory_space<smem>>
    %1018 = vector.broadcast %1017 : f32 to vector<8x128xf32>
    %1019 = arith.mulf %674, %1018 : vector<8x128xf32>
    %c317 = arith.constant 317 : index
    %1020 = memref.load %arg1[%c317] : memref<351xf32, #tpu.memory_space<smem>>
    %1021 = vector.broadcast %1020 : f32 to vector<8x128xf32>
    %1022 = arith.mulf %726, %1021 : vector<8x128xf32>
    %1023 = arith.addf %989, %992 : vector<8x128xf32>
    %1024 = arith.addf %995, %998 : vector<8x128xf32>
    %1025 = arith.addf %1001, %1004 : vector<8x128xf32>
    %1026 = arith.addf %1007, %1010 : vector<8x128xf32>
    %1027 = arith.addf %1013, %1016 : vector<8x128xf32>
    %1028 = arith.addf %1019, %1022 : vector<8x128xf32>
    %1029 = arith.addf %1023, %1024 : vector<8x128xf32>
    %1030 = arith.addf %1025, %1026 : vector<8x128xf32>
    %1031 = arith.addf %1027, %1028 : vector<8x128xf32>
    %1032 = arith.addf %1029, %1030 : vector<8x128xf32>
    %1033 = arith.addf %1032, %1031 : vector<8x128xf32>
    %c329 = arith.constant 329 : index
    %1034 = memref.load %arg1[%c329] : memref<351xf32, #tpu.memory_space<smem>>
    %1035 = vector.broadcast %1034 : f32 to vector<8x128xf32>
    %1036 = arith.addf %1033, %1035 : vector<8x128xf32>
    %cst_29 = arith.constant 0.000000e+00 : f32
    %1037 = vector.broadcast %cst_29 : f32 to vector<8x128xf32>
    %1038 = arith.maximumf %1036, %1037 : vector<8x128xf32>
    %c186 = arith.constant 186 : index
    %1039 = memref.load %arg1[%c186] : memref<351xf32, #tpu.memory_space<smem>>
    %1040 = vector.broadcast %1039 : f32 to vector<8x128xf32>
    %1041 = arith.mulf %154, %1040 : vector<8x128xf32>
    %c198 = arith.constant 198 : index
    %1042 = memref.load %arg1[%c198] : memref<351xf32, #tpu.memory_space<smem>>
    %1043 = vector.broadcast %1042 : f32 to vector<8x128xf32>
    %1044 = arith.mulf %206, %1043 : vector<8x128xf32>
    %c210 = arith.constant 210 : index
    %1045 = memref.load %arg1[%c210] : memref<351xf32, #tpu.memory_space<smem>>
    %1046 = vector.broadcast %1045 : f32 to vector<8x128xf32>
    %1047 = arith.mulf %258, %1046 : vector<8x128xf32>
    %c222 = arith.constant 222 : index
    %1048 = memref.load %arg1[%c222] : memref<351xf32, #tpu.memory_space<smem>>
    %1049 = vector.broadcast %1048 : f32 to vector<8x128xf32>
    %1050 = arith.mulf %310, %1049 : vector<8x128xf32>
    %c234 = arith.constant 234 : index
    %1051 = memref.load %arg1[%c234] : memref<351xf32, #tpu.memory_space<smem>>
    %1052 = vector.broadcast %1051 : f32 to vector<8x128xf32>
    %1053 = arith.mulf %362, %1052 : vector<8x128xf32>
    %c246 = arith.constant 246 : index
    %1054 = memref.load %arg1[%c246] : memref<351xf32, #tpu.memory_space<smem>>
    %1055 = vector.broadcast %1054 : f32 to vector<8x128xf32>
    %1056 = arith.mulf %414, %1055 : vector<8x128xf32>
    %c258 = arith.constant 258 : index
    %1057 = memref.load %arg1[%c258] : memref<351xf32, #tpu.memory_space<smem>>
    %1058 = vector.broadcast %1057 : f32 to vector<8x128xf32>
    %1059 = arith.mulf %466, %1058 : vector<8x128xf32>
    %c270 = arith.constant 270 : index
    %1060 = memref.load %arg1[%c270] : memref<351xf32, #tpu.memory_space<smem>>
    %1061 = vector.broadcast %1060 : f32 to vector<8x128xf32>
    %1062 = arith.mulf %518, %1061 : vector<8x128xf32>
    %c282 = arith.constant 282 : index
    %1063 = memref.load %arg1[%c282] : memref<351xf32, #tpu.memory_space<smem>>
    %1064 = vector.broadcast %1063 : f32 to vector<8x128xf32>
    %1065 = arith.mulf %570, %1064 : vector<8x128xf32>
    %c294 = arith.constant 294 : index
    %1066 = memref.load %arg1[%c294] : memref<351xf32, #tpu.memory_space<smem>>
    %1067 = vector.broadcast %1066 : f32 to vector<8x128xf32>
    %1068 = arith.mulf %622, %1067 : vector<8x128xf32>
    %c306 = arith.constant 306 : index
    %1069 = memref.load %arg1[%c306] : memref<351xf32, #tpu.memory_space<smem>>
    %1070 = vector.broadcast %1069 : f32 to vector<8x128xf32>
    %1071 = arith.mulf %674, %1070 : vector<8x128xf32>
    %c318 = arith.constant 318 : index
    %1072 = memref.load %arg1[%c318] : memref<351xf32, #tpu.memory_space<smem>>
    %1073 = vector.broadcast %1072 : f32 to vector<8x128xf32>
    %1074 = arith.mulf %726, %1073 : vector<8x128xf32>
    %1075 = arith.addf %1041, %1044 : vector<8x128xf32>
    %1076 = arith.addf %1047, %1050 : vector<8x128xf32>
    %1077 = arith.addf %1053, %1056 : vector<8x128xf32>
    %1078 = arith.addf %1059, %1062 : vector<8x128xf32>
    %1079 = arith.addf %1065, %1068 : vector<8x128xf32>
    %1080 = arith.addf %1071, %1074 : vector<8x128xf32>
    %1081 = arith.addf %1075, %1076 : vector<8x128xf32>
    %1082 = arith.addf %1077, %1078 : vector<8x128xf32>
    %1083 = arith.addf %1079, %1080 : vector<8x128xf32>
    %1084 = arith.addf %1081, %1082 : vector<8x128xf32>
    %1085 = arith.addf %1084, %1083 : vector<8x128xf32>
    %c330 = arith.constant 330 : index
    %1086 = memref.load %arg1[%c330] : memref<351xf32, #tpu.memory_space<smem>>
    %1087 = vector.broadcast %1086 : f32 to vector<8x128xf32>
    %1088 = arith.addf %1085, %1087 : vector<8x128xf32>
    %cst_30 = arith.constant 0.000000e+00 : f32
    %1089 = vector.broadcast %cst_30 : f32 to vector<8x128xf32>
    %1090 = arith.maximumf %1088, %1089 : vector<8x128xf32>
    %c187 = arith.constant 187 : index
    %1091 = memref.load %arg1[%c187] : memref<351xf32, #tpu.memory_space<smem>>
    %1092 = vector.broadcast %1091 : f32 to vector<8x128xf32>
    %1093 = arith.mulf %154, %1092 : vector<8x128xf32>
    %c199 = arith.constant 199 : index
    %1094 = memref.load %arg1[%c199] : memref<351xf32, #tpu.memory_space<smem>>
    %1095 = vector.broadcast %1094 : f32 to vector<8x128xf32>
    %1096 = arith.mulf %206, %1095 : vector<8x128xf32>
    %c211 = arith.constant 211 : index
    %1097 = memref.load %arg1[%c211] : memref<351xf32, #tpu.memory_space<smem>>
    %1098 = vector.broadcast %1097 : f32 to vector<8x128xf32>
    %1099 = arith.mulf %258, %1098 : vector<8x128xf32>
    %c223 = arith.constant 223 : index
    %1100 = memref.load %arg1[%c223] : memref<351xf32, #tpu.memory_space<smem>>
    %1101 = vector.broadcast %1100 : f32 to vector<8x128xf32>
    %1102 = arith.mulf %310, %1101 : vector<8x128xf32>
    %c235 = arith.constant 235 : index
    %1103 = memref.load %arg1[%c235] : memref<351xf32, #tpu.memory_space<smem>>
    %1104 = vector.broadcast %1103 : f32 to vector<8x128xf32>
    %1105 = arith.mulf %362, %1104 : vector<8x128xf32>
    %c247 = arith.constant 247 : index
    %1106 = memref.load %arg1[%c247] : memref<351xf32, #tpu.memory_space<smem>>
    %1107 = vector.broadcast %1106 : f32 to vector<8x128xf32>
    %1108 = arith.mulf %414, %1107 : vector<8x128xf32>
    %c259 = arith.constant 259 : index
    %1109 = memref.load %arg1[%c259] : memref<351xf32, #tpu.memory_space<smem>>
    %1110 = vector.broadcast %1109 : f32 to vector<8x128xf32>
    %1111 = arith.mulf %466, %1110 : vector<8x128xf32>
    %c271 = arith.constant 271 : index
    %1112 = memref.load %arg1[%c271] : memref<351xf32, #tpu.memory_space<smem>>
    %1113 = vector.broadcast %1112 : f32 to vector<8x128xf32>
    %1114 = arith.mulf %518, %1113 : vector<8x128xf32>
    %c283 = arith.constant 283 : index
    %1115 = memref.load %arg1[%c283] : memref<351xf32, #tpu.memory_space<smem>>
    %1116 = vector.broadcast %1115 : f32 to vector<8x128xf32>
    %1117 = arith.mulf %570, %1116 : vector<8x128xf32>
    %c295 = arith.constant 295 : index
    %1118 = memref.load %arg1[%c295] : memref<351xf32, #tpu.memory_space<smem>>
    %1119 = vector.broadcast %1118 : f32 to vector<8x128xf32>
    %1120 = arith.mulf %622, %1119 : vector<8x128xf32>
    %c307 = arith.constant 307 : index
    %1121 = memref.load %arg1[%c307] : memref<351xf32, #tpu.memory_space<smem>>
    %1122 = vector.broadcast %1121 : f32 to vector<8x128xf32>
    %1123 = arith.mulf %674, %1122 : vector<8x128xf32>
    %c319 = arith.constant 319 : index
    %1124 = memref.load %arg1[%c319] : memref<351xf32, #tpu.memory_space<smem>>
    %1125 = vector.broadcast %1124 : f32 to vector<8x128xf32>
    %1126 = arith.mulf %726, %1125 : vector<8x128xf32>
    %1127 = arith.addf %1093, %1096 : vector<8x128xf32>
    %1128 = arith.addf %1099, %1102 : vector<8x128xf32>
    %1129 = arith.addf %1105, %1108 : vector<8x128xf32>
    %1130 = arith.addf %1111, %1114 : vector<8x128xf32>
    %1131 = arith.addf %1117, %1120 : vector<8x128xf32>
    %1132 = arith.addf %1123, %1126 : vector<8x128xf32>
    %1133 = arith.addf %1127, %1128 : vector<8x128xf32>
    %1134 = arith.addf %1129, %1130 : vector<8x128xf32>
    %1135 = arith.addf %1131, %1132 : vector<8x128xf32>
    %1136 = arith.addf %1133, %1134 : vector<8x128xf32>
    %1137 = arith.addf %1136, %1135 : vector<8x128xf32>
    %c331 = arith.constant 331 : index
    %1138 = memref.load %arg1[%c331] : memref<351xf32, #tpu.memory_space<smem>>
    %1139 = vector.broadcast %1138 : f32 to vector<8x128xf32>
    %1140 = arith.addf %1137, %1139 : vector<8x128xf32>
    %cst_31 = arith.constant 0.000000e+00 : f32
    %1141 = vector.broadcast %cst_31 : f32 to vector<8x128xf32>
    %1142 = arith.maximumf %1140, %1141 : vector<8x128xf32>
    %c188 = arith.constant 188 : index
    %1143 = memref.load %arg1[%c188] : memref<351xf32, #tpu.memory_space<smem>>
    %1144 = vector.broadcast %1143 : f32 to vector<8x128xf32>
    %1145 = arith.mulf %154, %1144 : vector<8x128xf32>
    %c200 = arith.constant 200 : index
    %1146 = memref.load %arg1[%c200] : memref<351xf32, #tpu.memory_space<smem>>
    %1147 = vector.broadcast %1146 : f32 to vector<8x128xf32>
    %1148 = arith.mulf %206, %1147 : vector<8x128xf32>
    %c212 = arith.constant 212 : index
    %1149 = memref.load %arg1[%c212] : memref<351xf32, #tpu.memory_space<smem>>
    %1150 = vector.broadcast %1149 : f32 to vector<8x128xf32>
    %1151 = arith.mulf %258, %1150 : vector<8x128xf32>
    %c224 = arith.constant 224 : index
    %1152 = memref.load %arg1[%c224] : memref<351xf32, #tpu.memory_space<smem>>
    %1153 = vector.broadcast %1152 : f32 to vector<8x128xf32>
    %1154 = arith.mulf %310, %1153 : vector<8x128xf32>
    %c236 = arith.constant 236 : index
    %1155 = memref.load %arg1[%c236] : memref<351xf32, #tpu.memory_space<smem>>
    %1156 = vector.broadcast %1155 : f32 to vector<8x128xf32>
    %1157 = arith.mulf %362, %1156 : vector<8x128xf32>
    %c248 = arith.constant 248 : index
    %1158 = memref.load %arg1[%c248] : memref<351xf32, #tpu.memory_space<smem>>
    %1159 = vector.broadcast %1158 : f32 to vector<8x128xf32>
    %1160 = arith.mulf %414, %1159 : vector<8x128xf32>
    %c260 = arith.constant 260 : index
    %1161 = memref.load %arg1[%c260] : memref<351xf32, #tpu.memory_space<smem>>
    %1162 = vector.broadcast %1161 : f32 to vector<8x128xf32>
    %1163 = arith.mulf %466, %1162 : vector<8x128xf32>
    %c272 = arith.constant 272 : index
    %1164 = memref.load %arg1[%c272] : memref<351xf32, #tpu.memory_space<smem>>
    %1165 = vector.broadcast %1164 : f32 to vector<8x128xf32>
    %1166 = arith.mulf %518, %1165 : vector<8x128xf32>
    %c284 = arith.constant 284 : index
    %1167 = memref.load %arg1[%c284] : memref<351xf32, #tpu.memory_space<smem>>
    %1168 = vector.broadcast %1167 : f32 to vector<8x128xf32>
    %1169 = arith.mulf %570, %1168 : vector<8x128xf32>
    %c296 = arith.constant 296 : index
    %1170 = memref.load %arg1[%c296] : memref<351xf32, #tpu.memory_space<smem>>
    %1171 = vector.broadcast %1170 : f32 to vector<8x128xf32>
    %1172 = arith.mulf %622, %1171 : vector<8x128xf32>
    %c308 = arith.constant 308 : index
    %1173 = memref.load %arg1[%c308] : memref<351xf32, #tpu.memory_space<smem>>
    %1174 = vector.broadcast %1173 : f32 to vector<8x128xf32>
    %1175 = arith.mulf %674, %1174 : vector<8x128xf32>
    %c320 = arith.constant 320 : index
    %1176 = memref.load %arg1[%c320] : memref<351xf32, #tpu.memory_space<smem>>
    %1177 = vector.broadcast %1176 : f32 to vector<8x128xf32>
    %1178 = arith.mulf %726, %1177 : vector<8x128xf32>
    %1179 = arith.addf %1145, %1148 : vector<8x128xf32>
    %1180 = arith.addf %1151, %1154 : vector<8x128xf32>
    %1181 = arith.addf %1157, %1160 : vector<8x128xf32>
    %1182 = arith.addf %1163, %1166 : vector<8x128xf32>
    %1183 = arith.addf %1169, %1172 : vector<8x128xf32>
    %1184 = arith.addf %1175, %1178 : vector<8x128xf32>
    %1185 = arith.addf %1179, %1180 : vector<8x128xf32>
    %1186 = arith.addf %1181, %1182 : vector<8x128xf32>
    %1187 = arith.addf %1183, %1184 : vector<8x128xf32>
    %1188 = arith.addf %1185, %1186 : vector<8x128xf32>
    %1189 = arith.addf %1188, %1187 : vector<8x128xf32>
    %c332 = arith.constant 332 : index
    %1190 = memref.load %arg1[%c332] : memref<351xf32, #tpu.memory_space<smem>>
    %1191 = vector.broadcast %1190 : f32 to vector<8x128xf32>
    %1192 = arith.addf %1189, %1191 : vector<8x128xf32>
    %cst_32 = arith.constant 0.000000e+00 : f32
    %1193 = vector.broadcast %cst_32 : f32 to vector<8x128xf32>
    %1194 = arith.maximumf %1192, %1193 : vector<8x128xf32>
    %c189 = arith.constant 189 : index
    %1195 = memref.load %arg1[%c189] : memref<351xf32, #tpu.memory_space<smem>>
    %1196 = vector.broadcast %1195 : f32 to vector<8x128xf32>
    %1197 = arith.mulf %154, %1196 : vector<8x128xf32>
    %c201 = arith.constant 201 : index
    %1198 = memref.load %arg1[%c201] : memref<351xf32, #tpu.memory_space<smem>>
    %1199 = vector.broadcast %1198 : f32 to vector<8x128xf32>
    %1200 = arith.mulf %206, %1199 : vector<8x128xf32>
    %c213 = arith.constant 213 : index
    %1201 = memref.load %arg1[%c213] : memref<351xf32, #tpu.memory_space<smem>>
    %1202 = vector.broadcast %1201 : f32 to vector<8x128xf32>
    %1203 = arith.mulf %258, %1202 : vector<8x128xf32>
    %c225 = arith.constant 225 : index
    %1204 = memref.load %arg1[%c225] : memref<351xf32, #tpu.memory_space<smem>>
    %1205 = vector.broadcast %1204 : f32 to vector<8x128xf32>
    %1206 = arith.mulf %310, %1205 : vector<8x128xf32>
    %c237 = arith.constant 237 : index
    %1207 = memref.load %arg1[%c237] : memref<351xf32, #tpu.memory_space<smem>>
    %1208 = vector.broadcast %1207 : f32 to vector<8x128xf32>
    %1209 = arith.mulf %362, %1208 : vector<8x128xf32>
    %c249 = arith.constant 249 : index
    %1210 = memref.load %arg1[%c249] : memref<351xf32, #tpu.memory_space<smem>>
    %1211 = vector.broadcast %1210 : f32 to vector<8x128xf32>
    %1212 = arith.mulf %414, %1211 : vector<8x128xf32>
    %c261 = arith.constant 261 : index
    %1213 = memref.load %arg1[%c261] : memref<351xf32, #tpu.memory_space<smem>>
    %1214 = vector.broadcast %1213 : f32 to vector<8x128xf32>
    %1215 = arith.mulf %466, %1214 : vector<8x128xf32>
    %c273 = arith.constant 273 : index
    %1216 = memref.load %arg1[%c273] : memref<351xf32, #tpu.memory_space<smem>>
    %1217 = vector.broadcast %1216 : f32 to vector<8x128xf32>
    %1218 = arith.mulf %518, %1217 : vector<8x128xf32>
    %c285 = arith.constant 285 : index
    %1219 = memref.load %arg1[%c285] : memref<351xf32, #tpu.memory_space<smem>>
    %1220 = vector.broadcast %1219 : f32 to vector<8x128xf32>
    %1221 = arith.mulf %570, %1220 : vector<8x128xf32>
    %c297 = arith.constant 297 : index
    %1222 = memref.load %arg1[%c297] : memref<351xf32, #tpu.memory_space<smem>>
    %1223 = vector.broadcast %1222 : f32 to vector<8x128xf32>
    %1224 = arith.mulf %622, %1223 : vector<8x128xf32>
    %c309 = arith.constant 309 : index
    %1225 = memref.load %arg1[%c309] : memref<351xf32, #tpu.memory_space<smem>>
    %1226 = vector.broadcast %1225 : f32 to vector<8x128xf32>
    %1227 = arith.mulf %674, %1226 : vector<8x128xf32>
    %c321 = arith.constant 321 : index
    %1228 = memref.load %arg1[%c321] : memref<351xf32, #tpu.memory_space<smem>>
    %1229 = vector.broadcast %1228 : f32 to vector<8x128xf32>
    %1230 = arith.mulf %726, %1229 : vector<8x128xf32>
    %1231 = arith.addf %1197, %1200 : vector<8x128xf32>
    %1232 = arith.addf %1203, %1206 : vector<8x128xf32>
    %1233 = arith.addf %1209, %1212 : vector<8x128xf32>
    %1234 = arith.addf %1215, %1218 : vector<8x128xf32>
    %1235 = arith.addf %1221, %1224 : vector<8x128xf32>
    %1236 = arith.addf %1227, %1230 : vector<8x128xf32>
    %1237 = arith.addf %1231, %1232 : vector<8x128xf32>
    %1238 = arith.addf %1233, %1234 : vector<8x128xf32>
    %1239 = arith.addf %1235, %1236 : vector<8x128xf32>
    %1240 = arith.addf %1237, %1238 : vector<8x128xf32>
    %1241 = arith.addf %1240, %1239 : vector<8x128xf32>
    %c333 = arith.constant 333 : index
    %1242 = memref.load %arg1[%c333] : memref<351xf32, #tpu.memory_space<smem>>
    %1243 = vector.broadcast %1242 : f32 to vector<8x128xf32>
    %1244 = arith.addf %1241, %1243 : vector<8x128xf32>
    %cst_33 = arith.constant 0.000000e+00 : f32
    %1245 = vector.broadcast %cst_33 : f32 to vector<8x128xf32>
    %1246 = arith.maximumf %1244, %1245 : vector<8x128xf32>
    %c190 = arith.constant 190 : index
    %1247 = memref.load %arg1[%c190] : memref<351xf32, #tpu.memory_space<smem>>
    %1248 = vector.broadcast %1247 : f32 to vector<8x128xf32>
    %1249 = arith.mulf %154, %1248 : vector<8x128xf32>
    %c202 = arith.constant 202 : index
    %1250 = memref.load %arg1[%c202] : memref<351xf32, #tpu.memory_space<smem>>
    %1251 = vector.broadcast %1250 : f32 to vector<8x128xf32>
    %1252 = arith.mulf %206, %1251 : vector<8x128xf32>
    %c214 = arith.constant 214 : index
    %1253 = memref.load %arg1[%c214] : memref<351xf32, #tpu.memory_space<smem>>
    %1254 = vector.broadcast %1253 : f32 to vector<8x128xf32>
    %1255 = arith.mulf %258, %1254 : vector<8x128xf32>
    %c226 = arith.constant 226 : index
    %1256 = memref.load %arg1[%c226] : memref<351xf32, #tpu.memory_space<smem>>
    %1257 = vector.broadcast %1256 : f32 to vector<8x128xf32>
    %1258 = arith.mulf %310, %1257 : vector<8x128xf32>
    %c238 = arith.constant 238 : index
    %1259 = memref.load %arg1[%c238] : memref<351xf32, #tpu.memory_space<smem>>
    %1260 = vector.broadcast %1259 : f32 to vector<8x128xf32>
    %1261 = arith.mulf %362, %1260 : vector<8x128xf32>
    %c250 = arith.constant 250 : index
    %1262 = memref.load %arg1[%c250] : memref<351xf32, #tpu.memory_space<smem>>
    %1263 = vector.broadcast %1262 : f32 to vector<8x128xf32>
    %1264 = arith.mulf %414, %1263 : vector<8x128xf32>
    %c262 = arith.constant 262 : index
    %1265 = memref.load %arg1[%c262] : memref<351xf32, #tpu.memory_space<smem>>
    %1266 = vector.broadcast %1265 : f32 to vector<8x128xf32>
    %1267 = arith.mulf %466, %1266 : vector<8x128xf32>
    %c274 = arith.constant 274 : index
    %1268 = memref.load %arg1[%c274] : memref<351xf32, #tpu.memory_space<smem>>
    %1269 = vector.broadcast %1268 : f32 to vector<8x128xf32>
    %1270 = arith.mulf %518, %1269 : vector<8x128xf32>
    %c286 = arith.constant 286 : index
    %1271 = memref.load %arg1[%c286] : memref<351xf32, #tpu.memory_space<smem>>
    %1272 = vector.broadcast %1271 : f32 to vector<8x128xf32>
    %1273 = arith.mulf %570, %1272 : vector<8x128xf32>
    %c298 = arith.constant 298 : index
    %1274 = memref.load %arg1[%c298] : memref<351xf32, #tpu.memory_space<smem>>
    %1275 = vector.broadcast %1274 : f32 to vector<8x128xf32>
    %1276 = arith.mulf %622, %1275 : vector<8x128xf32>
    %c310 = arith.constant 310 : index
    %1277 = memref.load %arg1[%c310] : memref<351xf32, #tpu.memory_space<smem>>
    %1278 = vector.broadcast %1277 : f32 to vector<8x128xf32>
    %1279 = arith.mulf %674, %1278 : vector<8x128xf32>
    %c322 = arith.constant 322 : index
    %1280 = memref.load %arg1[%c322] : memref<351xf32, #tpu.memory_space<smem>>
    %1281 = vector.broadcast %1280 : f32 to vector<8x128xf32>
    %1282 = arith.mulf %726, %1281 : vector<8x128xf32>
    %1283 = arith.addf %1249, %1252 : vector<8x128xf32>
    %1284 = arith.addf %1255, %1258 : vector<8x128xf32>
    %1285 = arith.addf %1261, %1264 : vector<8x128xf32>
    %1286 = arith.addf %1267, %1270 : vector<8x128xf32>
    %1287 = arith.addf %1273, %1276 : vector<8x128xf32>
    %1288 = arith.addf %1279, %1282 : vector<8x128xf32>
    %1289 = arith.addf %1283, %1284 : vector<8x128xf32>
    %1290 = arith.addf %1285, %1286 : vector<8x128xf32>
    %1291 = arith.addf %1287, %1288 : vector<8x128xf32>
    %1292 = arith.addf %1289, %1290 : vector<8x128xf32>
    %1293 = arith.addf %1292, %1291 : vector<8x128xf32>
    %c334 = arith.constant 334 : index
    %1294 = memref.load %arg1[%c334] : memref<351xf32, #tpu.memory_space<smem>>
    %1295 = vector.broadcast %1294 : f32 to vector<8x128xf32>
    %1296 = arith.addf %1293, %1295 : vector<8x128xf32>
    %cst_34 = arith.constant 0.000000e+00 : f32
    %1297 = vector.broadcast %cst_34 : f32 to vector<8x128xf32>
    %1298 = arith.maximumf %1296, %1297 : vector<8x128xf32>
    %c191 = arith.constant 191 : index
    %1299 = memref.load %arg1[%c191] : memref<351xf32, #tpu.memory_space<smem>>
    %1300 = vector.broadcast %1299 : f32 to vector<8x128xf32>
    %1301 = arith.mulf %154, %1300 : vector<8x128xf32>
    %c203 = arith.constant 203 : index
    %1302 = memref.load %arg1[%c203] : memref<351xf32, #tpu.memory_space<smem>>
    %1303 = vector.broadcast %1302 : f32 to vector<8x128xf32>
    %1304 = arith.mulf %206, %1303 : vector<8x128xf32>
    %c215 = arith.constant 215 : index
    %1305 = memref.load %arg1[%c215] : memref<351xf32, #tpu.memory_space<smem>>
    %1306 = vector.broadcast %1305 : f32 to vector<8x128xf32>
    %1307 = arith.mulf %258, %1306 : vector<8x128xf32>
    %c227 = arith.constant 227 : index
    %1308 = memref.load %arg1[%c227] : memref<351xf32, #tpu.memory_space<smem>>
    %1309 = vector.broadcast %1308 : f32 to vector<8x128xf32>
    %1310 = arith.mulf %310, %1309 : vector<8x128xf32>
    %c239 = arith.constant 239 : index
    %1311 = memref.load %arg1[%c239] : memref<351xf32, #tpu.memory_space<smem>>
    %1312 = vector.broadcast %1311 : f32 to vector<8x128xf32>
    %1313 = arith.mulf %362, %1312 : vector<8x128xf32>
    %c251 = arith.constant 251 : index
    %1314 = memref.load %arg1[%c251] : memref<351xf32, #tpu.memory_space<smem>>
    %1315 = vector.broadcast %1314 : f32 to vector<8x128xf32>
    %1316 = arith.mulf %414, %1315 : vector<8x128xf32>
    %c263 = arith.constant 263 : index
    %1317 = memref.load %arg1[%c263] : memref<351xf32, #tpu.memory_space<smem>>
    %1318 = vector.broadcast %1317 : f32 to vector<8x128xf32>
    %1319 = arith.mulf %466, %1318 : vector<8x128xf32>
    %c275 = arith.constant 275 : index
    %1320 = memref.load %arg1[%c275] : memref<351xf32, #tpu.memory_space<smem>>
    %1321 = vector.broadcast %1320 : f32 to vector<8x128xf32>
    %1322 = arith.mulf %518, %1321 : vector<8x128xf32>
    %c287 = arith.constant 287 : index
    %1323 = memref.load %arg1[%c287] : memref<351xf32, #tpu.memory_space<smem>>
    %1324 = vector.broadcast %1323 : f32 to vector<8x128xf32>
    %1325 = arith.mulf %570, %1324 : vector<8x128xf32>
    %c299 = arith.constant 299 : index
    %1326 = memref.load %arg1[%c299] : memref<351xf32, #tpu.memory_space<smem>>
    %1327 = vector.broadcast %1326 : f32 to vector<8x128xf32>
    %1328 = arith.mulf %622, %1327 : vector<8x128xf32>
    %c311 = arith.constant 311 : index
    %1329 = memref.load %arg1[%c311] : memref<351xf32, #tpu.memory_space<smem>>
    %1330 = vector.broadcast %1329 : f32 to vector<8x128xf32>
    %1331 = arith.mulf %674, %1330 : vector<8x128xf32>
    %c323 = arith.constant 323 : index
    %1332 = memref.load %arg1[%c323] : memref<351xf32, #tpu.memory_space<smem>>
    %1333 = vector.broadcast %1332 : f32 to vector<8x128xf32>
    %1334 = arith.mulf %726, %1333 : vector<8x128xf32>
    %1335 = arith.addf %1301, %1304 : vector<8x128xf32>
    %1336 = arith.addf %1307, %1310 : vector<8x128xf32>
    %1337 = arith.addf %1313, %1316 : vector<8x128xf32>
    %1338 = arith.addf %1319, %1322 : vector<8x128xf32>
    %1339 = arith.addf %1325, %1328 : vector<8x128xf32>
    %1340 = arith.addf %1331, %1334 : vector<8x128xf32>
    %1341 = arith.addf %1335, %1336 : vector<8x128xf32>
    %1342 = arith.addf %1337, %1338 : vector<8x128xf32>
    %1343 = arith.addf %1339, %1340 : vector<8x128xf32>
    %1344 = arith.addf %1341, %1342 : vector<8x128xf32>
    %1345 = arith.addf %1344, %1343 : vector<8x128xf32>
    %c335 = arith.constant 335 : index
    %1346 = memref.load %arg1[%c335] : memref<351xf32, #tpu.memory_space<smem>>
    %1347 = vector.broadcast %1346 : f32 to vector<8x128xf32>
    %1348 = arith.addf %1345, %1347 : vector<8x128xf32>
    %cst_35 = arith.constant 0.000000e+00 : f32
    %1349 = vector.broadcast %cst_35 : f32 to vector<8x128xf32>
    %1350 = arith.maximumf %1348, %1349 : vector<8x128xf32>
    %c336 = arith.constant 336 : index
    %1351 = memref.load %arg1[%c336] : memref<351xf32, #tpu.memory_space<smem>>
    %1352 = vector.broadcast %1351 : f32 to vector<8x128xf32>
    %1353 = arith.mulf %778, %1352 : vector<8x128xf32>
    %c337 = arith.constant 337 : index
    %1354 = memref.load %arg1[%c337] : memref<351xf32, #tpu.memory_space<smem>>
    %1355 = vector.broadcast %1354 : f32 to vector<8x128xf32>
    %1356 = arith.mulf %830, %1355 : vector<8x128xf32>
    %c338 = arith.constant 338 : index
    %1357 = memref.load %arg1[%c338] : memref<351xf32, #tpu.memory_space<smem>>
    %1358 = vector.broadcast %1357 : f32 to vector<8x128xf32>
    %1359 = arith.mulf %882, %1358 : vector<8x128xf32>
    %c339 = arith.constant 339 : index
    %1360 = memref.load %arg1[%c339] : memref<351xf32, #tpu.memory_space<smem>>
    %1361 = vector.broadcast %1360 : f32 to vector<8x128xf32>
    %1362 = arith.mulf %934, %1361 : vector<8x128xf32>
    %c340 = arith.constant 340 : index
    %1363 = memref.load %arg1[%c340] : memref<351xf32, #tpu.memory_space<smem>>
    %1364 = vector.broadcast %1363 : f32 to vector<8x128xf32>
    %1365 = arith.mulf %986, %1364 : vector<8x128xf32>
    %c341 = arith.constant 341 : index
    %1366 = memref.load %arg1[%c341] : memref<351xf32, #tpu.memory_space<smem>>
    %1367 = vector.broadcast %1366 : f32 to vector<8x128xf32>
    %1368 = arith.mulf %1038, %1367 : vector<8x128xf32>
    %c342 = arith.constant 342 : index
    %1369 = memref.load %arg1[%c342] : memref<351xf32, #tpu.memory_space<smem>>
    %1370 = vector.broadcast %1369 : f32 to vector<8x128xf32>
    %1371 = arith.mulf %1090, %1370 : vector<8x128xf32>
    %c343 = arith.constant 343 : index
    %1372 = memref.load %arg1[%c343] : memref<351xf32, #tpu.memory_space<smem>>
    %1373 = vector.broadcast %1372 : f32 to vector<8x128xf32>
    %1374 = arith.mulf %1142, %1373 : vector<8x128xf32>
    %c344 = arith.constant 344 : index
    %1375 = memref.load %arg1[%c344] : memref<351xf32, #tpu.memory_space<smem>>
    %1376 = vector.broadcast %1375 : f32 to vector<8x128xf32>
    %1377 = arith.mulf %1194, %1376 : vector<8x128xf32>
    %c345 = arith.constant 345 : index
    %1378 = memref.load %arg1[%c345] : memref<351xf32, #tpu.memory_space<smem>>
    %1379 = vector.broadcast %1378 : f32 to vector<8x128xf32>
    %1380 = arith.mulf %1246, %1379 : vector<8x128xf32>
    %c346 = arith.constant 346 : index
    %1381 = memref.load %arg1[%c346] : memref<351xf32, #tpu.memory_space<smem>>
    %1382 = vector.broadcast %1381 : f32 to vector<8x128xf32>
    %1383 = arith.mulf %1298, %1382 : vector<8x128xf32>
    %c347 = arith.constant 347 : index
    %1384 = memref.load %arg1[%c347] : memref<351xf32, #tpu.memory_space<smem>>
    %1385 = vector.broadcast %1384 : f32 to vector<8x128xf32>
    %1386 = arith.mulf %1350, %1385 : vector<8x128xf32>
    %1387 = arith.addf %1353, %1356 : vector<8x128xf32>
    %1388 = arith.addf %1359, %1362 : vector<8x128xf32>
    %1389 = arith.addf %1365, %1368 : vector<8x128xf32>
    %1390 = arith.addf %1371, %1374 : vector<8x128xf32>
    %1391 = arith.addf %1377, %1380 : vector<8x128xf32>
    %1392 = arith.addf %1383, %1386 : vector<8x128xf32>
    %1393 = arith.addf %1387, %1388 : vector<8x128xf32>
    %1394 = arith.addf %1389, %1390 : vector<8x128xf32>
    %1395 = arith.addf %1391, %1392 : vector<8x128xf32>
    %1396 = arith.addf %1393, %1394 : vector<8x128xf32>
    %1397 = arith.addf %1396, %1395 : vector<8x128xf32>
    %1398 = vector.broadcast %2 : f32 to vector<8x128xf32>
    %1399 = arith.addf %1397, %1398 : vector<8x128xf32>
    %1400 = arith.index_cast %4 : i32 to index
    %c0_36 = arith.constant 0 : index
    %1401 = vector.load %arg3[%1400, %c0_36] : memref<8x128xf32, #tpu.memory_space<vmem>>, vector<8x128xf32>
    %1402 = vector.broadcast %0 : f32 to vector<8x128xf32>
    %1403 = arith.mulf %1401, %1402 : vector<8x128xf32>
    %1404 = vector.broadcast %1 : f32 to vector<8x128xf32>
    %1405 = arith.subf %1403, %1404 : vector<8x128xf32>
    %1406 = arith.subf %1405, %1399 : vector<8x128xf32>
    %1407 = arith.mulf %1406, %1406 : vector<8x128xf32>
    %cst_37 = arith.constant -5.000000e-01 : f32
    %1408 = vector.broadcast %cst_37 : f32 to vector<8x128xf32>
    %1409 = arith.mulf %1408, %1407 : vector<8x128xf32>
    %cst_38 = arith.constant 0.918938517 : f32
    %1410 = vector.broadcast %cst_38 : f32 to vector<8x128xf32>
    %1411 = arith.subf %1409, %1410 : vector<8x128xf32>
    %1412 = arith.index_cast %4 : i32 to index
    %c0_39 = arith.constant 0 : index
    %1413 = vector.load %arg4[%1412, %c0_39] : memref<8x128xf32, #tpu.memory_space<vmem>>, vector<8x128xf32>
    tpu.vector_store %arg4[%1412, %c0_39], %1411 {strides = array<i32>} : memref<8x128xf32, #tpu.memory_space<vmem>>, vector<8x128xf32>,
    %c1_i32 = arith.constant 1 : i32
    return
  }
  func.func @transform_0(%arg0: i32) -> i32 {
    %c0_i32 = arith.constant 0 : i32
    %c0_i32_0 = arith.constant 0 : i32
    return %c0_i32 : i32
  }
  func.func @transform_1(%arg0: i32) -> (i32, i32) {
    %c0_i32 = arith.constant 0 : i32
    %c0_i32_0 = arith.constant 0 : i32
    return %arg0, %c0_i32 : i32, i32
  }
  func.func @transform_2(%arg0: i32) -> (i32, i32) {
    %c0_i32 = arith.constant 0 : i32
    %c0_i32_0 = arith.constant 0 : i32
    return %arg0, %c0_i32 : i32, i32
  }
  func.func @transform_3(%arg0: i32) -> (i32, i32) {
    %c0_i32 = arith.constant 0 : i32
    %c0_i32_0 = arith.constant 0 : i32
    return %arg0, %c0_i32 : i32, i32
  }
}

</mosaic_0001>

<bundles_post_ra>
// kernel: affine_flow_forward.1
= control target key start
LH: loop header
LB: loop body
LE: loop exit
PB: predicated region body
PF: predicated region fallthrough
CT: control target
= control target key end

     0   :  { %s3320_s0 = inlined_call_operand.vmem [shape: f32[351], index: 0, kind: input, shape index: {}]   ;;  %s3321_s1 = inlined_call_operand.vmem [shape: f32[8,128], index: 1, kind: input, shape index: {}]   ;;  %s3322_s2 = inlined_call_operand.vmem [shape: f32[8,128], index: 2, kind: input, shape index: {}]   ;;  %s3323_s3 = inlined_call_operand.vmem [shape: f32[8,128], index: 3, kind: output, shape index: {}]  }
   0x1   :  { %3329 = sst [smem:[#allocation77_spill]] %s3322_s2 }
   0x2   :  { %3330 = sst [smem:[#allocation78_spill]] %s3323_s3 }
   0x3   :  { %8 = vsyncpa [#allocation3], 0  ;;  %s14_s14 = sshll.u32 %s3320_s0, 4  ;;  %s1769_s15 = smov [#allocation2]   ;;  %s15_s14 = int_to_ptr.vmem [resolvable:$true] %s14_s14 }
   0x4   :  { %17 = dma.vmem_to_smem %s15_s14, 48, %s1769_s15, [#allocation3]  }
   0x5   :  { %1767 = dma.done.wait [#allocation3], 48  }
   0x6   :  { %1768 = vsyncadd [#allocation3], 4294967248 }
   0x7   :  { %26 = sfence }
   0x8   :  { %s1793_s16 = sld [smem:[#allocation2 + $0x15d]]  ;;  %v30_v0 = vld [vmem:[%s3321_s1] sm:$0xff] }
   0x9   :  { %s1795_s17 = sld [smem:[#allocation2]] }
   0xa   :  { %s1797_s18 = sld [smem:[#allocation2 + $0xc]] }
   0xb   :  { %s1799_s19 = sld [smem:[#allocation2 + $0x1]] }
   0xc   :  { %s1801_s20 = sld [smem:[#allocation2 + $0xd]] }
   0xd   :  { %s1803_s21 = sld [smem:[#allocation2 + $0x2]] }
   0xe   :  { %3331 = sst [smem:[#allocation5_spill]] %s1793_s16 }
   0xf   :  { %s1805_s22 = sld [smem:[#allocation2 + $0xe]]  ;;  %v32_v1 = vstv %s1795_s17 }
  0x10   :  { %s1807_s0 = sld [smem:[#allocation2 + $0x3]]  ;;  %v33_v5 = vmul.f32 %v32_v1, %v30_v0  ;;  %v35_v7 = vstv %s1797_s18 }
  0x11   :  { %s1809_s23 = sld [smem:[#allocation2 + $0xf]]  ;;  %v39_v2 = vstv %s1799_s19 }
  0x12   :  { %s1811_s24 = sld [smem:[#allocation2 + $0x4]]  ;;  %v40_v6 = vmul.f32 %v39_v2, %v30_v0  ;;  %v42_v8 = vstv %s1801_s20  ;;  %v36_v17 = vadd.f32 %v35_v7, %v33_v5 }
  0x13   :  { %s1813_s25 = sld [smem:[#allocation2 + $0x10]]  ;;  %v46_v3 = vstv %s1803_s21 }
  0x14   :  { %s1815_s26 = sld [smem:[#allocation2 + $0x5]]  ;;  %v47_v9 = vmul.f32 %v46_v3, %v30_v0  ;;  %v43_v18 = vadd.f32 %v42_v8, %v40_v6  ;;  %v2028_v32 = vmax.f32 %v36_v17, 0.0 }
  0x15   :  { %s1817_s27 = sld [smem:[#allocation2 + $0x11]]  ;;  %v49_v11 = vstv %s1805_s22 }
  0x16   :  { %s1819_s28 = sld [smem:[#allocation2 + $0x6]]  ;;  %v53_v4 = vstv %s1807_s0  ;;  %v50_v20 = vadd.f32 %v49_v11, %v47_v9  ;;  %v2035_v36 = vmax.f32 %v43_v18, 0.0 }
  0x17   :  { %s1821_s29 = sld [smem:[#allocation2 + $0x12]]  ;;  %v54_v10 = vmul.f32 %v53_v4, %v30_v0  ;;  %v56_v12 = vstv %s1809_s23 }
  0x18   :  { %s1823_s30 = sld [smem:[#allocation2 + $0x7]]  ;;  %v60_v13 = vstv %s1811_s24  ;;  %v2037_v37 = vmax.f32 %v50_v20, 0.0 }
  0x19   :  { %s1825_s4 = sld [smem:[#allocation2 + $0x13]]  ;;  %v57_v21 = vadd.f32 %v56_v12, %v54_v10  ;;  %v61_v22 = vmul.f32 %v60_v13, %v30_v0  ;;  %v63_v24 = vstv %s1813_s25 }
  0x1a   :  { %s1827_s5 = sld [smem:[#allocation2 + $0x8]]  ;;  %v67_v14 = vstv %s1815_s26 }
  0x1b   :  { %s1829_s6 = sld [smem:[#allocation2 + $0x14]]  ;;  %v68_v23 = vmul.f32 %v67_v14, %v30_v0  ;;  %v70_v25 = vstv %s1817_s27  ;;  %v64_v38 = vadd.f32 %v63_v24, %v61_v22  ;;  %v2041_v40 = vmax.f32 %v57_v21, 0.0 }
  0x1c   :  { %s1831_s7 = sld [smem:[#allocation2 + $0x9]]  ;;  %v74_v15 = vstv %s1819_s28 }
  0x1d   :  { %s1833_s8 = sld [smem:[#allocation2 + $0x15]]  ;;  %v75_v26 = vmul.f32 %v74_v15, %v30_v0  ;;  %v77_v28 = vstv %s1821_s29  ;;  %v71_v39 = vadd.f32 %v70_v25, %v68_v23  ;;  %v2054_v52 = vmax.f32 %v64_v38, 0.0 }
  0x1e   :  { %s1835_s9 = sld [smem:[#allocation2 + $0xa]]  ;;  %v81_v16 = vstv %s1823_s30 }
  0x1f   :  { %s1837_s10 = sld [smem:[#allocation2 + $0x16]]  ;;  %v82_v27 = vmul.f32 %v81_v16, %v30_v0  ;;  %v84_v29 = vstv %s1825_s4  ;;  %v78_v41 = vadd.f32 %v77_v28, %v75_v26  ;;  %v2056_v53 = vmax.f32 %v71_v39, 0.0 }
  0x20   :  { %s1839_s11 = sld [smem:[#allocation2 + $0xb]]  ;;  %v88_v19 = vstv %s1827_s5 }
  0x21   :  { %s1841_s12 = sld [smem:[#allocation2 + $0x17]]  ;;  %v89_v30 = vmul.f32 %v88_v19, %v30_v0  ;;  %v91_v33 = vstv %s1829_s6  ;;  %v85_v42 = vadd.f32 %v84_v29, %v82_v27  ;;  %v2062_v56 = vmax.f32 %v78_v41, 0.0 }
  0x22   :  { %s1843_s13 = sld [smem:[#allocation2 + $0x18]]  ;;  %v95_v31 = vstv %s1831_s7 }
  0x23   :  { %3332 = sst [smem:[#allocation6_spill]] %s1833_s8  ;;  %v96_v43 = vmul.f32 %v95_v31, %v30_v0  ;;  %v92_v44 = vadd.f32 %v91_v33, %v89_v30 }
  0x24   :  { %3333 = sst [smem:[#allocation7_spill]] %s1835_s9 }
  0x25   :  { %3334 = sst [smem:[#allocation8_spill]] %s1837_s10  ;;  %v2074_v1 = vmax.f32 %v92_v44, 0.0 }
  0x26   :  { %3335 = sst [smem:[#allocation9_spill]] %s1839_s11 }
  0x27   :  { %3336 = sst [smem:[#allocation10_spill]] %s1841_s12 }
  0x28   :  { %3337 = sst [smem:[#allocation11_spill]] %s1843_s13 }
  0x29   :  { %s1845_s14 = sld [smem:[#allocation2 + $0x24]] }
  0x2a   :  { %s1847_s15 = sld [smem:[#allocation2 + $0x30]] }
  0x2b   :  { %s1849_s3 = sld [smem:[#allocation2 + $0x3c]] }
  0x2c   :  { %s1851_s2 = sld [smem:[#allocation2 + $0x48]] }
  0x2d   :  { %s1853_s16 = sld [smem:[#allocation2 + $0x54]] }
  0x2e   :  { %s1855_s8 = sld [smem:[#allocation2 + $0x60]] }
  0x2f   :  { %3338 = sst [smem:[#allocation12_spill]] %s1845_s14 }
  0x30   :  { %3339 = sst [smem:[#allocation13_spill]] %s1847_s15 }
  0x31   :  { %3340 = sst [smem:[#allocation14_spill]] %s1849_s3 }
  0x32   :  { %3341 = sst [smem:[#allocation15_spill]] %s1851_s2 }
  0x33   :  { %3342 = sst [smem:[#allocation16_spill]] %s1853_s16 }
  0x34   :  { %3343 = sst [smem:[#allocation17_spill]] %s1855_s8 }
  0x35   :  { %s1857_s9 = sld [smem:[#allocation2 + $0x6c]] }
  0x36   :  { %s1859_s10 = sld [smem:[#allocation2 + $0x78]] }
  0x37   :  { %s1861_s11 = sld [smem:[#allocation2 + $0x84]] }
  0x38   :  { %s1863_s12 = sld [smem:[#allocation2 + $0x90]] }
  0x39   :  { %s1865_s13 = sld [smem:[#allocation2 + $0x9c]] }
  0x3a   :  { %s1867_s14 = sld [smem:[#allocation2 + $0xa8]] }
  0x3b   :  { %3344 = sst [smem:[#allocation18_spill]] %s1857_s9 }
  0x3c   :  { %3345 = sst [smem:[#allocation19_spill]] %s1859_s10 }
  0x3d   :  { %3346 = sst [smem:[#allocation20_spill]] %s1861_s11 }
  0x3e   :  { %3347 = sst [smem:[#allocation21_spill]] %s1863_s12 }
  0x3f   :  { %3348 = sst [smem:[#allocation22_spill]] %s1865_s13 }
  0x40   :  { %3349 = sst [smem:[#allocation23_spill]] %s1867_s14 }
  0x41   :  { %s1869_s15 = sld [smem:[#allocation2 + $0x19]] }
  0x42   :  { %s1871_s3 = sld [smem:[#allocation2 + $0x25]] }
  0x43   :  { %s1873_s2 = sld [smem:[#allocation2 + $0x31]] }
  0x44   :  { %s1875_s16 = sld [smem:[#allocation2 + $0x3d]] }
  0x45   :  { %s1877_s8 = sld [smem:[#allocation2 + $0x49]] }
  0x46   :  { %s1879_s9 = sld [smem:[#allocation2 + $0x55]] }
  0x47   :  { %3350 = sst [smem:[#allocation24_spill]] %s1869_s15 }
  0x48   :  { %3351 = sst [smem:[#allocation25_spill]] %s1871_s3 }
  0x49   :  { %3352 = sst [smem:[#allocation26_spill]] %s1873_s2 }
  0x4a   :  { %3353 = sst [smem:[#allocation27_spill]] %s1875_s16 }
  0x4b   :  { %3354 = sst [smem:[#allocation28_spill]] %s1877_s8 }
  0x4c   :  { %3355 = sst [smem:[#allocation29_spill]] %s1879_s9 }
  0x4d   :  { %s1881_s10 = sld [smem:[#allocation2 + $0x61]] }
  0x4e   :  { %s1883_s11 = sld [smem:[#allocation2 + $0x6d]] }
  0x4f   :  { %s1885_s12 = sld [smem:[#allocation2 + $0x79]] }
  0x50   :  { %s1887_s13 = sld [smem:[#allocation2 + $0x85]] }
  0x51   :  { %s1889_s14 = sld [smem:[#allocation2 + $0x91]] }
  0x52   :  { %s1891_s15 = sld [smem:[#allocation2 + $0x9d]] }
  0x53   :  { %3356 = sst [smem:[#allocation30_spill]] %s1881_s10 }
  0x54   :  { %3357 = sst [smem:[#allocation31_spill]] %s1883_s11 }
  0x55   :  { %3358 = sst [smem:[#allocation32_spill]] %s1885_s12 }
  0x56   :  { %3359 = sst [smem:[#allocation33_spill]] %s1887_s13 }
  0x57   :  { %3360 = sst [smem:[#allocation34_spill]] %s1889_s14 }
  0x58   :  { %3361 = sst [smem:[#allocation35_spill]] %s1891_s15 }
  0x59   :  { %s1893_s3 = sld [smem:[#allocation2 + $0xa9]] }
  0x5a   :  { %s1895_s2 = sld [smem:[#allocation2 + $0x1a]] }
  0x5b   :  { %s1897_s16 = sld [smem:[#allocation2 + $0x26]] }
  0x5c   :  { %s1899_s8 = sld [smem:[#allocation2 + $0x32]] }
  0x5d   :  { %s1901_s9 = sld [smem:[#allocation2 + $0x3e]] }
  0x5e   :  { %s1903_s10 = sld [smem:[#allocation2 + $0x4a]] }
  0x5f   :  { %3362 = sst [smem:[#allocation36_spill]] %s1893_s3 }
  0x60   :  { %3363 = sst [smem:[#allocation37_spill]] %s1895_s2 }
  0x61   :  { %3364 = sst [smem:[#allocation38_spill]] %s1897_s16 }
  0x62   :  { %3365 = sst [smem:[#allocation39_spill]] %s1899_s8 }
  0x63   :  { %3366 = sst [smem:[#allocation40_spill]] %s1901_s9 }
  0x64   :  { %3367 = sst [smem:[#allocation41_spill]] %s1903_s10 }
  0x65   :  { %s1905_s11 = sld [smem:[#allocation2 + $0x56]] }
  0x66   :  { %s1907_s12 = sld [smem:[#allocation2 + $0x62]] }
  0x67   :  { %s1909_s13 = sld [smem:[#allocation2 + $0x6e]] }
  0x68   :  { %s1911_s14 = sld [smem:[#allocation2 + $0x7a]] }
  0x69   :  { %s1913_s15 = sld [smem:[#allocation2 + $0x86]] }
  0x6a   :  { %s1915_s3 = sld [smem:[#allocation2 + $0x92]] }
  0x6b   :  { %3368 = sst [smem:[#allocation42_spill]] %s1905_s11 }
  0x6c   :  { %3369 = sst [smem:[#allocation43_spill]] %s1907_s12 }
  0x6d   :  { %3370 = sst [smem:[#allocation44_spill]] %s1909_s13 }
  0x6e   :  { %3371 = sst [smem:[#allocation45_spill]] %s1911_s14 }
  0x6f   :  { %3372 = sst [smem:[#allocation46_spill]] %s1913_s15 }
  0x70   :  { %3373 = sst [smem:[#allocation47_spill]] %s1915_s3 }
  0x71   :  { %s1917_s2 = sld [smem:[#allocation2 + $0x9e]] }
  0x72   :  { %s1919_s16 = sld [smem:[#allocation2 + $0xaa]] }
  0x73   :  { %s1921_s8 = sld [smem:[#allocation2 + $0x1b]] }
  0x74   :  { %s1923_s9 = sld [smem:[#allocation2 + $0x27]] }
  0x75   :  { %s1925_s10 = sld [smem:[#allocation2 + $0x33]] }
  0x76   :  { %s1927_s11 = sld [smem:[#allocation2 + $0x3f]] }
  0x77   :  { %3374 = sst [smem:[#allocation48_spill]] %s1917_s2 }
  0x78   :  { %3375 = sst [smem:[#allocation49_spill]] %s1919_s16 }
  0x79   :  { %3376 = sst [smem:[#allocation50_spill]] %s1921_s8 }
  0x7a   :  { %3377 = sst [smem:[#allocation51_spill]] %s1923_s9 }
  0x7b   :  { %3378 = sst [smem:[#allocation52_spill]] %s1925_s10 }
  0x7c   :  { %3379 = sst [smem:[#allocation53_spill]] %s1927_s11 }
  0x7d   :  { %s1929_s12 = sld [smem:[#allocation2 + $0x4b]] }
  0x7e   :  { %s1931_s13 = sld [smem:[#allocation2 + $0x57]] }
  0x7f   :  { %s1933_s14 = sld [smem:[#allocation2 + $0x63]] }
  0x80   :  { %s1935_s15 = sld [smem:[#allocation2 + $0x6f]] }
  0x81   :  { %s1937_s3 = sld [smem:[#allocation2 + $0x7b]] }
  0x82   :  { %s1939_s2 = sld [smem:[#allocation2 + $0x87]] }
  0x83   :  { %3380 = sst [smem:[#allocation54_spill]] %s1929_s12 }
  0x84   :  { %3381 = sst [smem:[#allocation55_spill]] %s1931_s13 }
  0x85   :  { %3382 = sst [smem:[#allocation56_spill]] %s1933_s14 }
  0x86   :  { %s1941_s16 = sld [smem:[#allocation2 + $0x93]] }
  0x87   :  { %3383 = sst [smem:[#allocation57_spill]] %s1937_s3 }
  0x88   :  { %3384 = sst [smem:[#allocation58_spill]] %s1939_s2 }
  0x89   :  { %s1943_s8 = sld [smem:[#allocation2 + $0x9f]] }
  0x8a   :  { %s1945_s9 = sld [smem:[#allocation2 + $0xab]] }
  0x8b   :  { %s1947_s10 = sld [smem:[#allocation2 + $0x1c]] }
  0x8c   :  { %3385 = sst [smem:[#allocation59_spill]] %s1941_s16 }
  0x8d   :  { %s1949_s11 = sld [smem:[#allocation2 + $0x28]] }
  0x8e   :  { %s1951_s12 = sld [smem:[#allocation2 + $0x34]] }
  0x8f   :  { %3386 = sst [smem:[#allocation60_spill]] %s1943_s8 }
  0x90   :  { %3387 = sst [smem:[#allocation61_spill]] %s1945_s9 }
  0x91   :  { %3388 = sst [smem:[#allocation62_spill]] %s1947_s10 }
  0x92   :  { %s1953_s13 = sld [smem:[#allocation2 + $0x40]] }
  0x93   :  { %3389 = sst [smem:[#allocation63_spill]] %s1949_s11 }
  0x94   :  { %3390 = sst [smem:[#allocation64_spill]] %s1951_s12 }
  0x95   :  { %s1955_s14 = sld [smem:[#allocation2 + $0x4c]] }
  0x96   :  { %s1957_s3 = sld [smem:[#allocation2 + $0x58]] }
  0x97   :  { %s1959_s2 = sld [smem:[#allocation2 + $0x64]] }
  0x98   :  { %3391 = sst [smem:[#allocation65_spill]] %s1953_s13 }
  0x99   :  { %s1961_s16 = sld [smem:[#allocation2 + $0x70]] }
  0x9a   :  { %s1963_s9 = sld [smem:[#allocation2 + $0x7c]] }
  0x9b   :  { %3392 = sst [smem:[#allocation66_spill]] %s1955_s14 }
  0x9c   :  { %3393 = sst [smem:[#allocation67_spill]] %s1957_s3 }
  0x9d   :  { %3394 = sst [smem:[#allocation68_spill]] %s1959_s2 }
  0x9e   :  { %s1965_s10 = sld [smem:[#allocation2 + $0x88]] }
  0x9f   :  { %3395 = sst [smem:[#allocation69_spill]] %s1961_s16 }
  0xa0   :  { %3396 = sst [smem:[#allocation70_spill]] %s1963_s9 }
  0xa1   :  { %s1967_s11 = sld [smem:[#allocation2 + $0x94]] }
  0xa2   :  { %s1969_s12 = sld [smem:[#allocation2 + $0xa0]] }
  0xa3   :  { %s1971_s13 = sld [smem:[#allocation2 + $0xac]] }
  0xa4   :  { %3397 = sst [smem:[#allocation71_spill]] %s1965_s10 }
  0xa5   :  { %s1973_s14 = sld [smem:[#allocation2 + $0x1d]] }
  0xa6   :  { %s1975_s3 = sld [smem:[#allocation2 + $0x29]] }
  0xa7   :  { %3398 = sst [smem:[#allocation72_spill]] %s1967_s11 }
  0xa8   :  { %3399 = sst [smem:[#allocation73_spill]] %s1969_s12 }
  0xa9   :  { %3400 = sst [smem:[#allocation74_spill]] %s1971_s13 }
  0xaa   :  { %s1977_s2 = sld [smem:[#allocation2 + $0x35]] }
  0xab   :  { %s1979_s16 = sld [smem:[#allocation2 + $0x41]] }
  0xac   :  { %s1981_s9 = sld [smem:[#allocation2 + $0x4d]] }
  0xad   :  { %s1983_s8 = sld [smem:[#allocation2 + $0x59]] }
  0xae   :  { %s1990_s13 = sld [smem:[#allocation2 + $0x65]] }
  0xaf   :  { %s1994_s12 = sld [smem:[#allocation2 + $0x71]] }
  0xb0   :  { %s1998_s10 = sld [smem:[#allocation2 + $0x89]] }
  0xb1   :  { %s2002_s1 = sld [smem:[#allocation2 + $0x95]] }
  0xb2   :  { %3401 = sst [smem:[#allocation75_spill]] %s1981_s9 }
  0xb3   :  { %s1996_s9 = sld [smem:[#allocation2 + $0x7d]] }
  0xb4   :  { %s2008_s17 = sld [smem:[#allocation2 + $0xa1]] }
  0xb5   :  { %s2012_s19 = sld [smem:[#allocation2 + $0xad]] }
  0xb6   :  { %s2015_s18 = sld [smem:[#allocation2 + $0x1e]] }
  0xb7   :  { %s3403_s20 = sld [smem:[#allocation7_spill]] }
  0xb8   :  { %s3404_s21 = sld [smem:[#allocation9_spill]] }
  0xb9   :  { %s2017_s22 = sld [smem:[#allocation2 + $0x2a]] }
  0xba   :  { %s2021_s0 = sld [smem:[#allocation2 + $0x36]] }
  0xbb   :  { %3402 = sst [smem:[#allocation76_spill]] %s2012_s19 }
  0xbc   :  { %s2026_s23 = sld [smem:[#allocation2 + $0x42]] }
  0xbd   :  { %s3406_s24 = sld [smem:[#allocation6_spill]]  ;;  %v102_v34 = vstv %s3403_s20 }
  0xbe   :  { %v109_v35 = vstv %s3404_s21  ;;  %s2033_s26 = sld [smem:[#allocation2 + $0x4e]]  ;;  %v103_v46 = vmul.f32 %v102_v34, %v30_v0 }
  0xbf   :  { %s3408_s25 = sld [smem:[#allocation8_spill]]  ;;  %v110_v47 = vmul.f32 %v109_v35, %v30_v0  ;;  %v2072_v0 = vmax.f32 %v85_v42, 0.0 }
  0xc0   :  { %s3409_s27 = sld [smem:[#allocation10_spill]] }
  0xc1   :  { %s3410_s28 = sld [smem:[#allocation11_spill]] }
  0xc2   :  { %3405 = sst [smem:[#allocation7_spill]] %s2026_s23 }
  0xc3   :  { %s3411_s29 = sld [smem:[#allocation12_spill]]  ;;  %v98_v45 = vstv %s3406_s24 }
  0xc4   :  { %3407 = sst [smem:[#allocation9_spill]] %s2033_s26  ;;  %v99_v57 = vadd.f32 %v98_v45, %v96_v43 }
  0xc5   :  { %s2039_s30 = sld [smem:[#allocation2 + $0x5a]]  ;;  %v105_v48 = vstv %s3408_s25 }
  0xc6   :  { %s3413_s4 = sld [smem:[#allocation13_spill]]  ;;  %v112_v49 = vstv %s3409_s27  ;;  %v106_v60 = vadd.f32 %v105_v48, %v103_v46  ;;  %v2089_v9 = vmax.f32 %v99_v57, 0.0 }
  0xc7   :  { %s3414_s5 = sld [smem:[#allocation14_spill]]  ;;  %v116_v50 = vstv %s3410_s28  ;;  %v113_v61 = vadd.f32 %v112_v49, %v110_v47 }
  0xc8   :  { %s2043_s6 = sld [smem:[#allocation2 + $0x66]]  ;;  %v117_v62 = vmul.f32 %v116_v50, %v2028_v32  ;;  %v2091_v10 = vmax.f32 %v106_v60, 0.0 }
  0xc9   :  { %s3416_s7 = sld [smem:[#allocation15_spill]]  ;;  %v119_v51 = vstv %s3411_s29  ;;  %v2093_v11 = vmax.f32 %v113_v61, 0.0 }
  0xca   :  { %s3417_s11 = sld [smem:[#allocation16_spill]]  ;;  %v120_v63 = vmul.f32 %v119_v51, %v2035_v36 }
  0xcb   :  { %3412 = sst [smem:[#allocation6_spill]] %s2039_s30 }
  0xcc   :  { %s2046_s20 = sld [smem:[#allocation2 + $0x72]]  ;;  %v122_v54 = vstv %s3413_s4  ;;  %v2095_v12 = vadd.f32 %v120_v63, %v117_v62 }
  0xcd   :  { %s2052_s21 = sld [smem:[#allocation2 + $0x7e]]  ;;  %v125_v55 = vstv %s3414_s5  ;;  %v123_v2 = vmul.f32 %v122_v54, %v2037_v37 }
  0xce   :  { %3415 = sst [smem:[#allocation8_spill]] %s2043_s6  ;;  %v126_v3 = vmul.f32 %v125_v55, %v2041_v40 }
  0xcf   :  { %s2060_s19 = sld [smem:[#allocation2 + $0x8a]]  ;;  %v128_v58 = vstv %s3416_s7 }
  0xd0   :  { %s3421_s24 = sld [smem:[#allocation17_spill]]  ;;  %v131_v59 = vstv %s3417_s11  ;;  %v129_v4 = vmul.f32 %v128_v58, %v2054_v52  ;;  %v152_v16 = vadd.f32 %v126_v3, %v123_v2 }
  0xd1   :  { %s2066_s25 = sld [smem:[#allocation2 + $0x96]]  ;;  %v132_v5 = vmul.f32 %v131_v59, %v2056_v53 }
  0xd2   :  { %3418 = sst [smem:[#allocation10_spill]] %s2046_s20 }
  0xd3   :  { %3419 = sst [smem:[#allocation11_spill]] %s2052_s21  ;;  %v153_v18 = vadd.f32 %v132_v5, %v129_v4 }
  0xd4   :  { %s3422_s20 = sld [smem:[#allocation18_spill]] }
  0xd5   :  { %3420 = sst [smem:[#allocation12_spill]] %s2060_s19 }
  0xd6   :  { %s3424_s27 = sld [smem:[#allocation19_spill]]  ;;  %v134_v6 = vstv %s3421_s24 }
  0xd7   :  { %3423 = sst [smem:[#allocation13_spill]] %s2066_s25  ;;  %v135_v13 = vmul.f32 %v134_v6, %v2062_v56 }
  0xd8   :  { %s2070_s28 = sld [smem:[#allocation2 + $0xa2]] }
  0xd9   :  { %s3426_s29 = sld [smem:[#allocation20_spill]] }
  0xda   :  { %s2078_s4 = sld [smem:[#allocation2 + $0xae]]  ;;  %v137_v7 = vstv %s3422_s20 }
  0xdb   :  { %s3428_s5 = sld [smem:[#allocation24_spill]]  ;;  %v138_v14 = vmul.f32 %v137_v7, %v2072_v0  ;;  %v2167_v7 = vadd.f32 %v152_v16, %v2095_v12 }
  0xdc   :  { %s2084_s7 = sld [smem:[#allocation2 + $0x1f]]  ;;  %v140_v8 = vstv %s3424_s27 }
  0xdd   :  { %s3430_s11 = sld [smem:[#allocation25_spill]]  ;;  %v141_v17 = vmul.f32 %v140_v8, %v2074_v1  ;;  %v154_v30 = vadd.f32 %v138_v14, %v135_v13 }
  0xde   :  { %3425 = sst [smem:[#allocation14_spill]] %s2070_s28 }
  0xdf   :  { %s2087_s28 = sld [smem:[#allocation2 + $0x2b]]  ;;  %v143_v15 = vstv %s3426_s29 }
  0xe0   :  { %3427 = sst [smem:[#allocation15_spill]] %s2078_s4  ;;  %v144_v25 = vmul.f32 %v143_v15, %v2089_v9  ;;  %v2175_v15 = vadd.f32 %v154_v30, %v153_v18 }
  0xe1   :  { %s3432_s25 = sld [smem:[#allocation26_spill]]  ;;  %v167_v19 = vstv %s3428_s5 }
  0xe2   :  { %3429 = sst [smem:[#allocation16_spill]] %s2084_s7  ;;  %v168_v31 = vmul.f32 %v167_v19, %v2028_v32  ;;  %v2164_v6 = vadd.f32 %v144_v25, %v141_v17 }
  0xe3   :  { %s3433_s19 = sld [smem:[#allocation27_spill]]  ;;  %v170_v20 = vstv %s3430_s11 }
  0xe4   :  { %s3434_s4 = sld [smem:[#allocation28_spill]]  ;;  %v171_v33 = vmul.f32 %v170_v20, %v2035_v36 }
  0xe5   :  { %3431 = sst [smem:[#allocation17_spill]] %s2087_s28 }
  0xe6   :  { %s3435_s21 = sld [smem:[#allocation29_spill]]  ;;  %v202_v57 = vadd.f32 %v171_v33, %v168_v31 }
  0xe7   :  { %s2097_s20 = sld [smem:[#allocation2 + $0x37]]  ;;  %v173_v21 = vstv %s3432_s25 }
  0xe8   :  { %s3437_s24 = sld [smem:[#allocation21_spill]]  ;;  %v174_v34 = vmul.f32 %v173_v21, %v2037_v37 }
  0xe9   :  { %s3438_s27 = sld [smem:[#allocation30_spill]]  ;;  %v176_v22 = vstv %s3433_s19 }
  0xea   :  { %s3439_s28 = sld [smem:[#allocation31_spill]]  ;;  %v179_v23 = vstv %s3434_s4  ;;  %v177_v35 = vmul.f32 %v176_v22, %v2041_v40 }
  0xeb   :  { %s2102_s7 = sld [smem:[#allocation2 + $0x43]]  ;;  %v180_v38 = vmul.f32 %v179_v23, %v2054_v52 }
  0xec   :  { %s3441_s6 = sld [smem:[#allocation22_spill]]  ;;  %v182_v24 = vstv %s3435_s21  ;;  %v203_v58 = vadd.f32 %v177_v35, %v174_v34 }
  0xed   :  { %3436 = sst [smem:[#allocation18_spill]] %s2097_s20  ;;  %v183_v39 = vmul.f32 %v182_v24, %v2056_v53 }
  0xee   :  { %s2107_s30 = sld [smem:[#allocation2 + $0x4f]]  ;;  %v146_v26 = vstv %s3437_s24  ;;  %v208_v12 = vadd.f32 %v203_v58, %v202_v57 }
  0xef   :  { %s2113_s20 = sld [smem:[#allocation2 + $0x5b]]  ;;  %v185_v27 = vstv %s3438_s27  ;;  %v147_v41 = vmul.f32 %v146_v26, %v2091_v10  ;;  %v204_v59 = vadd.f32 %v183_v39, %v180_v38  ;;  %v290_v39 = vstv %s1935_s15 }
  0xf0   :  { %s3444_s29 = sld [smem:[#allocation32_spill]]  ;;  %v188_v28 = vstv %s3439_s28  ;;  %v186_v42 = vmul.f32 %v185_v27, %v2062_v56 }
  0xf1   :  { %3440 = sst [smem:[#allocation19_spill]] %s2102_s7  ;;  %v189_v43 = vmul.f32 %v188_v28, %v2072_v0 }
  0xf2   :  { %s2119_s7 = sld [smem:[#allocation2 + $0x67]]  ;;  %v149_v29 = vstv %s3441_s6 }
  0xf3   :  { %s3446_s26 = sld [smem:[#allocation33_spill]]  ;;  %v150_v45 = vmul.f32 %v149_v29, %v2093_v11  ;;  %v205_v63 = vadd.f32 %v189_v43, %v186_v42 }
  0xf4   :  { %3442 = sst [smem:[#allocation20_spill]] %s2107_s30 }
  0xf5   :  { %3443 = sst [smem:[#allocation24_spill]] %s2113_s20  ;;  %v2173_v14 = vadd.f32 %v150_v45, %v147_v41  ;;  %v209_v16 = vadd.f32 %v205_v63, %v204_v59 }
  0xf6   :  { %s3447_s5 = sld [smem:[#allocation34_spill]]  ;;  %v191_v44 = vstv %s3444_s29 }
  0xf7   :  { %s3448_s19 = sld [smem:[#allocation35_spill]]  ;;  %v192_v55 = vmul.f32 %v191_v44, %v2074_v1 }
  0xf8   :  { %3445 = sst [smem:[#allocation25_spill]] %s2119_s7 }
  0xf9   :  { %s2124_s21 = sld [smem:[#allocation2 + $0x73]]  ;;  %v194_v46 = vstv %s3446_s26 }
  0xfa   :  { %s3450_s25 = sld [smem:[#allocation37_spill]]  ;;  %v195_v60 = vmul.f32 %v194_v46, %v2089_v9 }
  0xfb   :  { %s3451_s4 = sld [smem:[#allocation38_spill]] }
  0xfc   :  { %s3452_s28 = sld [smem:[#allocation39_spill]]  ;;  %v197_v47 = vstv %s3447_s5  ;;  %v206_v17 = vadd.f32 %v195_v60, %v192_v55 }
  0xfd   :  { %s3453_s6 = sld [smem:[#allocation40_spill]]  ;;  %v200_v48 = vstv %s3448_s19  ;;  %v198_v61 = vmul.f32 %v197_v47, %v2091_v10 }
  0xfe   :  { %s2130_s11 = sld [smem:[#allocation2 + $0x7f]]  ;;  %v201_v62 = vmul.f32 %v200_v48, %v2093_v11 }
  0xff   :  { %3449 = sst [smem:[#allocation26_spill]] %s2124_s21 }
 0x100   :  { %s2136_s24 = sld [smem:[#allocation2 + $0x8b]]  ;;  %v218_v49 = vstv %s3450_s25  ;;  %v207_v21 = vadd.f32 %v201_v62, %v198_v61 }
 0x101   :  { %s2142_s27 = sld [smem:[#allocation2 + $0x97]]  ;;  %v221_v50 = vstv %s3451_s4  ;;  %v219_v2 = vmul.f32 %v218_v49, %v2028_v32 }
 0x102   :  { %v224_v51 = vstv %s3452_s28  ;;  %s3458_s21 = sld [smem:[#allocation41_spill]]  ;;  %v222_v3 = vmul.f32 %v221_v50, %v2035_v36 }
 0x103   :  { %v227_v54 = vstv %s3453_s6  ;;  %s3459_s29 = sld [smem:[#allocation42_spill]]  ;;  %v225_v4 = vmul.f32 %v224_v51, %v2037_v37  ;;  %v291_v51 = vmul.f32 %v290_v39, %v2072_v0 }
 0x104   :  { %3454 = sst [smem:[#allocation27_spill]] %s2130_s11  ;;  %v228_v5 = vmul.f32 %v227_v54, %v2041_v40  ;;  %v2185_v23 = vadd.f32 %v222_v3, %v219_v2 }
 0x105   :  { %s2148_s11 = sld [smem:[#allocation2 + $0xa3]] }
 0x106   :  { %3455 = sst [smem:[#allocation28_spill]] %s2136_s24  ;;  %v2187_v24 = vadd.f32 %v228_v5, %v225_v4 }
 0x107   :  { %3456 = sst [smem:[#allocation29_spill]] %s2142_s27 }
 0x108   :  { %s2151_s24 = sld [smem:[#allocation2 + $0xaf]]  ;;  %v230_v8 = vstv %s3458_s21 }
 0x109   :  { %s3461_s26 = sld [smem:[#allocation43_spill]]  ;;  %v233_v13 = vstv %s3459_s29  ;;  %v231_v18 = vmul.f32 %v230_v8, %v2054_v52 }
 0x10a   :  { %s3462_s5 = sld [smem:[#allocation44_spill]]  ;;  %v234_v22 = vmul.f32 %v233_v13, %v2056_v53 }
 0x10b   :  { %3457 = sst [smem:[#allocation21_spill]] %s2148_s11 }
 0x10c   :  { %s2156_s19 = sld [smem:[#allocation2 + $0x20]]  ;;  %v255_v49 = vadd.f32 %v234_v22, %v231_v18  ;;  %v159_v18 = vadd.f32 %v2173_v14, %v2164_v6  ;;  %v160_v22 = vadd.f32 %v2175_v15, %v2167_v7  ;;  %v259_v6 = vadd.f32 %v2187_v24, %v2185_v23 }
 0x10d   :  { %s2162_s25 = sld [smem:[#allocation2 + $0x2c]] }
 0x10e   :  { %3460 = sst [smem:[#allocation30_spill]] %s2151_s24  ;;  %v2269_v24 = vadd.f32 %v160_v22, %v159_v18 }
 0x10f   :  { %s2171_s4 = sld [smem:[#allocation2 + $0x38]]  ;;  %v236_v19 = vstv %s3461_s26 }
 0x110   :  { %s3466_s28 = sld [smem:[#allocation50_spill]]  ;;  %v239_v20 = vstv %s3462_s5  ;;  %v237_v25 = vmul.f32 %v236_v19, %v2062_v56 }
 0x111   :  { %s3467_s6 = sld [smem:[#allocation51_spill]]  ;;  %v240_v26 = vmul.f32 %v239_v20, %v2072_v0 }
 0x112   :  { %3463 = sst [smem:[#allocation31_spill]] %s2156_s19 }
 0x113   :  { %3464 = sst [smem:[#allocation22_spill]] %s2162_s25  ;;  %v256_v63 = vadd.f32 %v240_v26, %v237_v25  ;;  %v210_v25 = vadd.f32 %v207_v21, %v206_v17  ;;  %v211_v26 = vadd.f32 %v209_v16, %v208_v12 }
 0x114   :  { %s2179_s24 = sld [smem:[#allocation2 + $0x44]] }
 0x115   :  { %3465 = sst [smem:[#allocation32_spill]] %s2171_s4  ;;  %v260_v14 = vadd.f32 %v256_v63, %v255_v49  ;;  %v386_v63 = vstv %s1983_s8 }
 0x116   :  { %s3469_s11 = sld [smem:[#allocation52_spill]]  ;;  %v269_v27 = vstv %s3466_s28 }
 0x117   :  { %s3470_s27 = sld [smem:[#allocation53_spill]]  ;;  %v272_v28 = vstv %s3467_s6  ;;  %v270_v43 = vmul.f32 %v269_v27, %v2028_v32 }
 0x118   :  { %s3471_s25 = sld [smem:[#allocation54_spill]]  ;;  %v273_v44 = vmul.f32 %v272_v28, %v2035_v36 }
 0x119   :  { %s3472_s21 = sld [smem:[#allocation55_spill]] }
 0x11a   :  { %3468 = sst [smem:[#allocation33_spill]] %s2179_s24  ;;  %v304_v3 = vadd.f32 %v273_v44, %v270_v43 }
 0x11b   :  { %s2181_s29 = sld [smem:[#allocation2 + $0x50]] }
 0x11c   :  { %s3474_s4 = sld [smem:[#allocation45_spill]]  ;;  %v275_v29 = vstv %s3469_s11 }
 0x11d   :  { %s3475_s19 = sld [smem:[#allocation46_spill]]  ;;  %v278_v30 = vstv %s3470_s27  ;;  %v276_v45 = vmul.f32 %v275_v29, %v2037_v37 }
 0x11e   :  { %s3476_s26 = sld [smem:[#allocation56_spill]]  ;;  %v281_v31 = vstv %s3471_s25  ;;  %v279_v46 = vmul.f32 %v278_v30, %v2041_v40 }
 0x11f   :  { %s2189_s5 = sld [smem:[#allocation2 + $0x5c]]  ;;  %v284_v33 = vstv %s3472_s21  ;;  %v282_v47 = vmul.f32 %v281_v31, %v2054_v52 }
 0x120   :  { %s3478_s24 = sld [smem:[#allocation47_spill]]  ;;  %v285_v48 = vmul.f32 %v284_v33, %v2056_v53  ;;  %v305_v4 = vadd.f32 %v279_v46, %v276_v45  ;;  %v262_v46 = vadd.f32 %v260_v14, %v259_v6  ;;  %v401_v6 = vstv %s2002_s1 }
 0x121   :  { %3473 = sst [smem:[#allocation34_spill]] %s2181_s29  ;;  %v404_v14 = vstv %s2008_s17 }
 0x122   :  { %s3479_s7 = sld [smem:[#allocation48_spill]]  ;;  %v242_v34 = vstv %s3474_s4  ;;  %v306_v5 = vadd.f32 %v285_v48, %v282_v47  ;;  %v310_v17 = vadd.f32 %v305_v4, %v304_v3  ;;  %v389_v4 = vstv %s1990_s13 }
 0x123   :  { %s2195_s29 = sld [smem:[#allocation2 + $0x68]]  ;;  %v245_v35 = vstv %s3475_s19  ;;  %v243_v55 = vmul.f32 %v242_v34, %v2074_v1 }
 0x124   :  { %s2201_s20 = sld [smem:[#allocation2 + $0x74]]  ;;  %v287_v38 = vstv %s3476_s26  ;;  %v246_v60 = vmul.f32 %v245_v35, %v2089_v9 }
 0x125   :  { %3477 = sst [smem:[#allocation35_spill]] %s2189_s5  ;;  %v288_v50 = vmul.f32 %v287_v38, %v2062_v56 }
 0x126   :  { %s3480_s5 = sld [smem:[#allocation57_spill]]  ;;  %v248_v41 = vstv %s3478_s24  ;;  %v257_v31 = vadd.f32 %v246_v60, %v243_v55  ;;  %v377_v60 = vstv %s1977_s2 }
 0x127   :  { %s2207_s30 = sld [smem:[#allocation2 + $0x80]]  ;;  %v249_v61 = vmul.f32 %v248_v41, %v2091_v10  ;;  %v307_v20 = vadd.f32 %v291_v51, %v288_v50  ;;  %v2276_v41 = vadd.f32 %v211_v26, %v210_v25  ;;  %v378_v18 = vmul.f32 %v377_v60, %v2037_v37 }
 0x128   :  { %s3481_s23 = sld [smem:[#allocation58_spill]]  ;;  %v251_v42 = vstv %s3479_s7  ;;  %v387_v26 = vmul.f32 %v386_v63, %v2056_v53  ;;  %v428_v60 = vstv %s2021_s0 }
 0x129   :  { %s3482_s28 = sld [smem:[#allocation59_spill]]  ;;  %v252_v62 = vmul.f32 %v251_v42, %v2093_v11  ;;  %v311_v21 = vadd.f32 %v307_v20, %v306_v5  ;;  %v392_v5 = vstv %s1994_s12 }
 0x12a   :  { %s3483_s11 = sld [smem:[#allocation60_spill]] }
 0x12b   :  { %s2213_s27 = sld [smem:[#allocation2 + $0x8c]]  ;;  %v258_v33 = vadd.f32 %v252_v62, %v249_v61  ;;  %v313_v48 = vadd.f32 %v311_v21, %v310_v17  ;;  %v380_v61 = vstv %s1979_s16 }
 0x12c   :  { %s2219_s15 = sld [smem:[#allocation2 + $0x98]]  ;;  %v293_v54 = vstv %s3480_s5  ;;  %v381_v22 = vmul.f32 %v380_v61, %v2041_v40 }
 0x12d   :  { %s2224_s7 = sld [smem:[#allocation2 + $0xa4]]  ;;  %v294_v2 = vmul.f32 %v293_v54, %v2074_v1  ;;  %v261_v45 = vadd.f32 %v258_v33, %v257_v31  ;;  %v398_v33 = vstv %s1998_s10 }
 0x12e   :  { %v296_v57 = vstv %s3481_s23  ;;  %s2230_s24 = sld [smem:[#allocation2 + $0xb0]] }
 0x12f   :  { %v299_v58 = vstv %s3482_s28  ;;  %s2235_s19 = sld [smem:[#allocation2 + $0x21]]  ;;  %v297_v8 = vmul.f32 %v296_v57, %v2089_v9 }
 0x130   :  { %v302_v59 = vstv %s3483_s11  ;;  %s3486_s25 = sld [smem:[#allocation62_spill]]  ;;  %v300_v13 = vmul.f32 %v299_v58, %v2091_v10  ;;  %v371_v58 = vstv %s1973_s14 }
 0x131   :  { %s3487_s4 = sld [smem:[#allocation63_spill]]  ;;  %v303_v19 = vmul.f32 %v302_v59, %v2093_v11  ;;  %v308_v7 = vadd.f32 %v297_v8, %v294_v2  ;;  %v374_v59 = vstv %s1975_s3 }
 0x132   :  { %s3488_s6 = sld [smem:[#allocation64_spill]]  ;;  %v375_v20 = vmul.f32 %v374_v59, %v2035_v36  ;;  %v425_v59 = vstv %s2017_s22 }
 0x133   :  { %s3489_s23 = sld [smem:[#allocation65_spill]]  ;;  %v309_v15 = vadd.f32 %v303_v19, %v300_v13  ;;  %v372_v19 = vmul.f32 %v371_v58, %v2028_v32  ;;  %v422_v58 = vstv %s2015_s18 }
 0x134   :  { %3484 = sst [smem:[#allocation37_spill]] %s2230_s24 }
 0x135   :  { %3485 = sst [smem:[#allocation38_spill]] %s2235_s19  ;;  %v312_v47 = vadd.f32 %v309_v15, %v308_v7 }
 0x136   :  { %s2238_s21 = sld [smem:[#allocation2 + $0x2d]]  ;;  %v320_v27 = vstv %s3486_s25 }
 0x137   :  { %s2243_s26 = sld [smem:[#allocation2 + $0x39]]  ;;  %v323_v28 = vstv %s3487_s4  ;;  %v321_v12 = vmul.f32 %v320_v27, %v2028_v32 }
 0x138   :  { %s2249_s5 = sld [smem:[#allocation2 + $0x45]]  ;;  %v326_v29 = vstv %s3488_s6  ;;  %v324_v16 = vmul.f32 %v323_v28, %v2035_v36  ;;  %v390_v28 = vmul.f32 %v389_v4, %v2062_v56  ;;  %v423_v4 = vmul.f32 %v422_v58, %v2028_v32 }
 0x139   :  { %v329_v30 = vstv %s3489_s23  ;;  %s2255_s28 = sld [smem:[#allocation2 + $0x51]]  ;;  %v327_v34 = vmul.f32 %v326_v29, %v2037_v37  ;;  %v393_v29 = vmul.f32 %v392_v5, %v2072_v0  ;;  %v426_v5 = vmul.f32 %v425_v59, %v2035_v36 }
 0x13a   :  { %s3493_s11 = sld [smem:[#allocation23_spill]]  ;;  %v330_v23 = vmul.f32 %v329_v30, %v2041_v40  ;;  %v2287_v51 = vadd.f32 %v324_v16, %v321_v12  ;;  %v395_v30 = vstv %s1996_s9  ;;  %v406_v16 = vadd.f32 %v375_v20, %v372_v19 }
 0x13b   :  { %s3494_s24 = sld [smem:[#allocation66_spill]]  ;;  %v396_v12 = vmul.f32 %v395_v30, %v2074_v1 }
 0x13c   :  { %3490 = sst [smem:[#allocation39_spill]] %s2238_s21  ;;  %v2289_v54 = vadd.f32 %v330_v23, %v327_v34  ;;  %v407_v34 = vadd.f32 %v381_v22, %v378_v18 }
 0x13d   :  { %3491 = sst [smem:[#allocation40_spill]] %s2243_s26 }
 0x13e   :  { %s3495_s26 = sld [smem:[#allocation67_spill]] }
 0x13f   :  { %3492 = sst [smem:[#allocation41_spill]] %s2255_s28 }
 0x140   :  { %s2259_s21 = sld [smem:[#allocation2 + $0x5d]]  ;;  %v163_v35 = vstv %s3493_s11 }
 0x141   :  { %s3497_s19 = sld [smem:[#allocation36_spill]]  ;;  %v332_v38 = vstv %s3494_s24  ;;  %v2378_v18 = vadd.f32 %v163_v35, %v2269_v24 }
 0x142   :  { %s3498_s25 = sld [smem:[#allocation68_spill]]  ;;  %v333_v49 = vmul.f32 %v332_v38, %v2054_v52  ;;  %v399_v38 = vmul.f32 %v398_v33, %v2089_v9 }
 0x143   :  { %s3499_s4 = sld [smem:[#allocation69_spill]] }
 0x144   :  { %s2261_s6 = sld [smem:[#allocation2 + $0x69]]  ;;  %v335_v39 = vstv %s3495_s26 }
 0x145   :  { %s2267_s23 = sld [smem:[#allocation2 + $0x75]]  ;;  %v336_v50 = vmul.f32 %v335_v39, %v2056_v53  ;;  %v402_v39 = vmul.f32 %v401_v6, %v2091_v10  ;;  %v457_v6 = vadd.f32 %v426_v5, %v423_v4 }
 0x146   :  { %3496 = sst [smem:[#allocation42_spill]] %s2259_s21 }
 0x147   :  { %s2274_s21 = sld [smem:[#allocation2 + $0x81]]  ;;  %v214_v42 = vstv %s3497_s19  ;;  %v357_v27 = vadd.f32 %v336_v50, %v333_v49  ;;  %v263_v49 = vadd.f32 %v262_v46, %v261_v45  ;;  %v410_v46 = vadd.f32 %v399_v38, %v396_v12 }
 0x148   :  { %v338_v43 = vstv %s3498_s25  ;;  %s2283_s24 = sld [smem:[#allocation2 + $0x99]]  ;;  %v2383_v22 = vadd.f32 %v214_v42, %v2276_v41 }
 0x149   :  { %v341_v44 = vstv %s3499_s4  ;;  %s3506_s26 = sld [smem:[#allocation70_spill]]  ;;  %v339_v55 = vmul.f32 %v338_v43, %v2062_v56  ;;  %v405_v43 = vmul.f32 %v404_v14, %v2093_v11 }
 0x14a   :  { %3500 = sst [smem:[#allocation43_spill]] %s2261_s6  ;;  %v342_v57 = vmul.f32 %v341_v44, %v2072_v0  ;;  %v409_v44 = vadd.f32 %v393_v29, %v390_v28 }
 0x14b   :  { %3501 = sst [smem:[#allocation44_spill]] %s2267_s23 }
 0x14c   :  { %s2281_s6 = sld [smem:[#allocation2 + $0x8d]]  ;;  %v358_v21 = vadd.f32 %v342_v57, %v339_v55  ;;  %v314_v55 = vadd.f32 %v313_v48, %v312_v47  ;;  %v411_v47 = vadd.f32 %v405_v43, %v402_v39  ;;  %v412_v48 = vadd.f32 %v407_v34, %v406_v16 }
 0x14d   :  { %3502 = sst [smem:[#allocation50_spill]] %s2274_s21 }
 0x14e   :  { %s3504_s23 = sld [smem:[#allocation75_spill]]  ;;  %v362_v45 = vadd.f32 %v358_v21, %v357_v27  ;;  %v414_v29 = vadd.f32 %v411_v47, %v410_v46 }
 0x14f   :  { %3505 = sst [smem:[#allocation52_spill]] %s2283_s24  ;;  %v344_v2 = vstv %s3506_s26 }
 0x150   :  { %s3507_s21 = sld [smem:[#allocation71_spill]]  ;;  %v345_v31 = vmul.f32 %v344_v2, %v2074_v1  ;;  %v361_v2 = vadd.f32 %v2289_v54, %v2287_v51 }
 0x151   :  { %s2291_s25 = sld [smem:[#allocation2 + $0xa5]] }
 0x152   :  { %3503 = sst [smem:[#allocation51_spill]] %s2281_s6  ;;  %v364_v28 = vadd.f32 %v362_v45, %v361_v2 }
 0x153   :  { %s3509_s4 = sld [smem:[#allocation72_spill]] }
 0x154   :  { %s3510_s6 = sld [smem:[#allocation73_spill]]  ;;  %v383_v62 = vstv %s3504_s23 }
 0x155   :  { %s2297_s24 = sld [smem:[#allocation2 + $0xb1]]  ;;  %v384_v25 = vmul.f32 %v383_v62, %v2054_v52 }
 0x156   :  { %s2303_s28 = sld [smem:[#allocation2 + $0x22]]  ;;  %v347_v3 = vstv %s3507_s21 }
 0x157   :  { %3508 = sst [smem:[#allocation53_spill]] %s2291_s25  ;;  %v348_v7 = vmul.f32 %v347_v3, %v2089_v9  ;;  %v408_v23 = vadd.f32 %v387_v26, %v384_v25 }
 0x158   :  { %s2309_s25 = sld [smem:[#allocation2 + $0x2e]] }
 0x159   :  { %v350_v8 = vstv %s3509_s4  ;;  %s2315_s2 = sld [smem:[#allocation2 + $0x3a]]  ;;  %v359_v62 = vadd.f32 %v348_v7, %v345_v31  ;;  %v413_v3 = vadd.f32 %v409_v44, %v408_v23 }
 0x15a   :  { %v353_v13 = vstv %s3510_s6  ;;  %s2321_s3 = sld [smem:[#allocation2 + $0x46]]  ;;  %v351_v15 = vmul.f32 %v350_v8, %v2091_v10  ;;  %v429_v8 = vmul.f32 %v428_v60, %v2037_v37 }
 0x15b   :  { %3511 = sst [smem:[#allocation54_spill]] %s2297_s24  ;;  %v354_v17 = vmul.f32 %v353_v13, %v2093_v11  ;;  %v415_v24 = vadd.f32 %v413_v3, %v412_v48 }
 0x15c   :  { %s2326_s16 = sld [smem:[#allocation2 + $0x52]] }
 0x15d   :  { %s2332_s8 = sld [smem:[#allocation2 + $0x5e]]  ;;  %v360_v63 = vadd.f32 %v354_v17, %v351_v15  ;;  %v2438_v46 = vadd.f32 %v415_v24, %v414_v29 }
 0x15e   :  { %s3512_s12 = sld [smem:[#allocation49_spill]] }
 0x15f   :  { %s3513_s13 = sld [smem:[#allocation61_spill]]  ;;  %v363_v27 = vadd.f32 %v360_v63, %v359_v62 }
 0x160   :  { %s2337_s14 = sld [smem:[#allocation2 + $0x6a]] }
 0x161   :  { %s3514_s9 = sld [smem:[#allocation7_spill]]  ;;  %v2431_v62 = vadd.f32 %v364_v28, %v363_v27 }
 0x162   :  { %s2340_s10 = sld [smem:[#allocation2 + $0x76]] }
 0x163   :  { %s2345_s1 = sld [smem:[#allocation2 + $0x82]] }
 0x164   :  { %v265_v50 = vstv %s3512_s12  ;;  %s2349_s17 = sld [smem:[#allocation2 + $0x8e]] }
 0x165   :  { %v316_v57 = vstv %s3513_s13  ;;  %s2355_s21 = sld [smem:[#allocation2 + $0x9a]]  ;;  %v2385_v25 = vadd.f32 %v265_v50, %v263_v49 }
 0x166   :  { %s3516_s6 = sld [smem:[#allocation9_spill]]  ;;  %v2387_v26 = vadd.f32 %v316_v57, %v314_v55 }
 0x167   :  { %v431_v61 = vstv %s3514_s9  ;;  %s3517_s23 = sld [smem:[#allocation6_spill]] }
 0x168   :  { %s3518_s26 = sld [smem:[#allocation8_spill]]  ;;  %v432_v51 = vmul.f32 %v431_v61, %v2041_v40 }
 0x169   :  { %s3519_s4 = sld [smem:[#allocation10_spill]] }
 0x16a   :  { %s2359_s12 = sld [smem:[#allocation2 + $0xa6]]  ;;  %v458_v14 = vadd.f32 %v432_v51, %v429_v8 }
 0x16b   :  { %3515 = sst [smem:[#allocation55_spill]] %s2355_s21 }
 0x16c   :  { %s2361_s18 = sld [smem:[#allocation2 + $0xb2]]  ;;  %v434_v54 = vstv %s3516_s6  ;;  %v2443_v3 = vadd.f32 %v458_v14, %v457_v6  ;;  %v542_v6 = vstv %s2195_s29  ;;  %v545_v14 = vstv %s2201_s20 }
 0x16d   :  { %s2367_s22 = sld [smem:[#allocation2 + $0x23]]  ;;  %v437_v13 = vstv %s3517_s23  ;;  %v435_v35 = vmul.f32 %v434_v54, %v2054_v52 }
 0x16e   :  { %v440_v19 = vstv %s3518_s26  ;;  %s2373_s0 = sld [smem:[#allocation2 + $0x2f]]  ;;  %v438_v41 = vmul.f32 %v437_v13, %v2056_v53 }
 0x16f   :  { %v443_v20 = vstv %s3519_s4  ;;  %s3524_s13 = sld [smem:[#allocation11_spill]]  ;;  %v441_v42 = vmul.f32 %v440_v19, %v2062_v56 }
 0x170   :  { %3520 = sst [smem:[#allocation45_spill]] %s2359_s12  ;;  %v444_v30 = vmul.f32 %v443_v20, %v2072_v0  ;;  %v459_v43 = vadd.f32 %v438_v41, %v435_v35 }
 0x171   :  { %s3525_s9 = sld [smem:[#allocation12_spill]] }
 0x172   :  { %3521 = sst [smem:[#allocation46_spill]] %s2361_s18  ;;  %v460_v44 = vadd.f32 %v444_v30, %v441_v42 }
 0x173   :  { %3522 = sst [smem:[#allocation56_spill]] %s2367_s22 }
 0x174   :  { %3523 = sst [smem:[#allocation47_spill]] %s2373_s0  ;;  %v2449_v5 = vadd.f32 %v460_v44, %v459_v43  ;;  %v548_v43 = vstv %s2207_s30  ;;  %v551_v44 = vstv %s2213_s27 }
 0x175   :  { %s2389_s6 = sld [smem:[#allocation2 + $0x3b]]  ;;  %v446_v31 = vstv %s3524_s13 }
 0x176   :  { %s3527_s23 = sld [smem:[#allocation13_spill]]  ;;  %v447_v38 = vmul.f32 %v446_v31, %v2074_v1 }
 0x177   :  { %s3528_s26 = sld [smem:[#allocation14_spill]]  ;;  %v449_v33 = vstv %s3525_s9 }
 0x178   :  { %s3529_s4 = sld [smem:[#allocation16_spill]]  ;;  %v450_v39 = vmul.f32 %v449_v33, %v2089_v9 }
 0x179   :  { %s3530_s11 = sld [smem:[#allocation17_spill]] }
 0x17a   :  { %s2391_s18 = sld [smem:[#allocation2 + $0x47]]  ;;  %v2441_v48 = vadd.f32 %v450_v39, %v447_v38  ;;  %v543_v38 = vmul.f32 %v542_v6, %v2062_v56  ;;  %v546_v39 = vmul.f32 %v545_v14, %v2072_v0 }
 0x17b   :  { %3526 = sst [smem:[#allocation48_spill]] %s2389_s6 }
 0x17c   :  { %s3532_s19 = sld [smem:[#allocation18_spill]]  ;;  %v452_v7 = vstv %s3527_s23 }
 0x17d   :  { %s3533_s24 = sld [smem:[#allocation19_spill]]  ;;  %v455_v15 = vstv %s3528_s26  ;;  %v453_v49 = vmul.f32 %v452_v7, %v2091_v10 }
 0x17e   :  { %s3534_s12 = sld [smem:[#allocation20_spill]]  ;;  %v473_v17 = vstv %s3529_s4  ;;  %v456_v50 = vmul.f32 %v455_v15, %v2093_v11 }
 0x17f   :  { %s3535_s21 = sld [smem:[#allocation24_spill]]  ;;  %v476_v21 = vstv %s3530_s11  ;;  %v474_v55 = vmul.f32 %v473_v17, %v2028_v32 }
 0x180   :  { %3531 = sst [smem:[#allocation57_spill]] %s2391_s18  ;;  %v477_v57 = vmul.f32 %v476_v21, %v2035_v36  ;;  %v2447_v4 = vadd.f32 %v456_v50, %v453_v49 }
 0x181   :  { %s2397_s6 = sld [smem:[#allocation2 + $0x53]] }
 0x182   :  { %s2401_s0 = sld [smem:[#allocation2 + $0x5f]]  ;;  %v479_v12 = vstv %s3532_s19  ;;  %v508_v51 = vadd.f32 %v477_v57, %v474_v55  ;;  %v554_v55 = vstv %s2219_s15  ;;  %v557_v57 = vstv %s2224_s7 }
 0x183   :  { %s2407_s18 = sld [smem:[#allocation2 + $0x6b]]  ;;  %v482_v16 = vstv %s3533_s24  ;;  %v480_v58 = vmul.f32 %v479_v12, %v2037_v37 }
 0x184   :  { %v485_v34 = vstv %s3534_s12  ;;  %s2413_s22 = sld [smem:[#allocation2 + $0x77]]  ;;  %v483_v59 = vmul.f32 %v482_v16, %v2041_v40 }
 0x185   :  { %v488_v23 = vstv %s3535_s21  ;;  %s3538_s13 = sld [smem:[#allocation74_spill]]  ;;  %v486_v60 = vmul.f32 %v485_v34, %v2054_v52 }
 0x186   :  { %s3539_s9 = sld [smem:[#allocation25_spill]]  ;;  %v489_v61 = vmul.f32 %v488_v23, %v2056_v53  ;;  %v509_v19 = vadd.f32 %v483_v59, %v480_v58 }
 0x187   :  { %s2417_s23 = sld [smem:[#allocation2 + $0x83]] }
 0x188   :  { %3536 = sst [smem:[#allocation58_spill]] %s2401_s0  ;;  %v510_v20 = vadd.f32 %v489_v61, %v486_v60 }
 0x189   :  { %s3540_s0 = sld [smem:[#allocation26_spill]] }
 0x18a   :  { %3537 = sst [smem:[#allocation59_spill]] %s2413_s22 }
 0x18b   :  { %s3542_s26 = sld [smem:[#allocation76_spill]]  ;;  %v367_v63 = vstv %s3538_s13 }
 0x18c   :  { %s2423_s24 = sld [smem:[#allocation2 + $0x8f]]  ;;  %v491_v2 = vstv %s3539_s9 }
 0x18d   :  { %3541 = sst [smem:[#allocation60_spill]] %s2417_s23  ;;  %v492_v54 = vmul.f32 %v491_v2, %v2062_v56  ;;  %v549_v2 = vmul.f32 %v548_v43, %v2074_v1  ;;  %v632_v43 = vstv %s2315_s2 }
 0x18e   :  { %s3544_s21 = sld [smem:[#allocation27_spill]] }
 0x18f   :  { %s2429_s12 = sld [smem:[#allocation2 + $0x9b]]  ;;  %v494_v45 = vstv %s3540_s0 }
 0x190   :  { %s2436_s4 = sld [smem:[#allocation2 + $0xa7]]  ;;  %v495_v13 = vmul.f32 %v494_v45, %v2072_v0  ;;  %v552_v45 = vmul.f32 %v551_v44, %v2089_v9  ;;  %v635_v44 = vstv %s2321_s3 }
 0x191   :  { %s3547_s11 = sld [smem:[#allocation31_spill]]  ;;  %v418_v47 = vstv %s3542_s26 }
 0x192   :  { %3543 = sst [smem:[#allocation62_spill]] %s2423_s24  ;;  %v511_v16 = vadd.f32 %v495_v13, %v492_v54  ;;  %v584_v54 = vstv %s2249_s5  ;;  %v555_v13 = vmul.f32 %v554_v55, %v2091_v10  ;;  %v638_v55 = vstv %s2326_s16 }
 0x193   :  { %s3548_s19 = sld [smem:[#allocation22_spill]]  ;;  %v585_v6 = vmul.f32 %v584_v54, %v2041_v40  ;;  %v636_v54 = vmul.f32 %v635_v44, %v2041_v40 }
 0x194   :  { %s3549_s24 = sld [smem:[#allocation32_spill]]  ;;  %v497_v8 = vstv %s3544_s21 }
 0x195   :  { %3545 = sst [smem:[#allocation63_spill]] %s2429_s12  ;;  %v498_v35 = vmul.f32 %v497_v8, %v2074_v1 }
 0x196   :  { %3546 = sst [smem:[#allocation64_spill]] %s2436_s4 }
 0x197   :  { %s3550_s23 = sld [smem:[#allocation33_spill]]  ;;  %v524_v27 = vstv %s3547_s11 }
 0x198   :  { %s2445_s22 = sld [smem:[#allocation2 + $0xb3]]  ;;  %v525_v7 = vmul.f32 %v524_v27, %v2028_v32  ;;  %v558_v27 = vmul.f32 %v557_v57, %v2093_v11  ;;  %v641_v57 = vstv %s2332_s8 }
 0x199   :  { %s3552_s13 = sld [smem:[#allocation28_spill]]  ;;  %v527_v28 = vstv %s3548_s19 }
 0x19a   :  { %s3553_s0 = sld [smem:[#allocation34_spill]]  ;;  %v530_v29 = vstv %s3549_s24  ;;  %v528_v15 = vmul.f32 %v527_v28, %v2035_v36 }
 0x19b   :  { %s3554_s9 = sld [smem:[#allocation35_spill]]  ;;  %v531_v17 = vmul.f32 %v530_v29, %v2037_v37  ;;  %v562_v29 = vadd.f32 %v546_v39, %v543_v38 }
 0x19c   :  { %s2452_s4 = sld [smem:[#allocation2 + $0xb4]]  ;;  %v559_v58 = vadd.f32 %v528_v15, %v525_v7 }
 0x19d   :  { %s3556_s26 = sld [smem:[#allocation29_spill]]  ;;  %v533_v24 = vstv %s3550_s23 }
 0x19e   :  { %3551 = sst [smem:[#allocation65_spill]] %s2445_s22  ;;  %v534_v21 = vmul.f32 %v533_v24, %v2041_v40 }
 0x19f   :  { %s3557_s12 = sld [smem:[#allocation21_spill]]  ;;  %v500_v41 = vstv %s3552_s13 }
 0x1a0   :  { %s2456_s22 = sld [smem:[#allocation2 + $0xc0]]  ;;  %v536_v42 = vstv %s3553_s0  ;;  %v501_v12 = vmul.f32 %v500_v41, %v2089_v9  ;;  %v560_v59 = vadd.f32 %v534_v21, %v531_v17  ;;  %v2515_v41 = vadd.f32 %v509_v19, %v508_v51 }
 0x1a1   :  { %s2462_s21 = sld [smem:[#allocation2 + $0xcc]]  ;;  %v539_v30 = vstv %s3554_s9  ;;  %v537_v34 = vmul.f32 %v536_v42, %v2054_v52  ;;  %v2530_v19 = vadd.f32 %v552_v45, %v549_v2 }
 0x1a2   :  { %3555 = sst [smem:[#allocation23_spill]] %s2452_s4  ;;  %v540_v23 = vmul.f32 %v539_v30, %v2056_v53  ;;  %v2513_v24 = vadd.f32 %v501_v12, %v498_v35  ;;  %v2532_v14 = vadd.f32 %v560_v59, %v559_v58 }
 0x1a3   :  { %s2468_s4 = sld [smem:[#allocation2 + $0xd8]]  ;;  %v503_v31 = vstv %s3556_s26 }
 0x1a4   :  { %s2480_s13 = sld [smem:[#allocation2 + $0xf0]]  ;;  %v504_v49 = vmul.f32 %v503_v31, %v2091_v10  ;;  %v561_v28 = vadd.f32 %v540_v23, %v537_v34  ;;  %v2521_v31 = vadd.f32 %v511_v16, %v510_v20  ;;  %v2537_v20 = vadd.f32 %v558_v27, %v555_v13 }
 0x1a5   :  { %v506_v33 = vstv %s3557_s12  ;;  %s3559_s29 = sld [smem:[#allocation38_spill]]  ;;  %v626_v34 = vstv %s2303_s28  ;;  %v629_v23 = vstv %s2309_s25  ;;  %v639_v13 = vmul.f32 %v638_v55, %v2054_v52 }
 0x1a6   :  { %3558 = sst [smem:[#allocation66_spill]] %s2456_s22  ;;  %v507_v50 = vmul.f32 %v506_v33, %v2093_v11  ;;  %v2539_v15 = vadd.f32 %v562_v29, %v561_v28  ;;  %v642_v27 = vmul.f32 %v641_v57, %v2056_v53  ;;  %v644_v28 = vstv %s2337_s14 }
 0x1a7   :  { %s2474_s22 = sld [smem:[#allocation2 + $0xe4]]  ;;  %v647_v29 = vstv %s2340_s10 }
 0x1a8   :  { %s3560_s20 = sld [smem:[#allocation39_spill]]  ;;  %v2528_v51 = vadd.f32 %v507_v50, %v504_v49  ;;  %v663_v44 = vadd.f32 %v642_v27, %v639_v13 }
 0x1a9   :  { %s2485_s23 = sld [smem:[#allocation2 + $0xfc]] }
 0x1aa   :  { %s3561_s26 = sld [smem:[#allocation40_spill]] }
 0x1ab   :  { %s2491_s24 = sld [smem:[#allocation2 + $0x108]]  ;;  %v575_v60 = vstv %s3559_s29 }
 0x1ac   :  { %s2497_s12 = sld [smem:[#allocation2 + $0x114]]  ;;  %v576_v42 = vmul.f32 %v575_v60, %v2028_v32  ;;  %v627_v60 = vmul.f32 %v626_v34, %v2028_v32  ;;  %v645_v34 = vmul.f32 %v644_v28, %v2062_v56 }
 0x1ad   :  { %s2501_s11 = sld [smem:[#allocation2 + $0x120]] }
 0x1ae   :  { %v578_v61 = vstv %s3560_s20  ;;  %s3562_s30 = sld [smem:[#allocation41_spill]] }
 0x1af   :  { %s2507_s27 = sld [smem:[#allocation2 + $0x12c]]  ;;  %v579_v30 = vmul.f32 %v578_v61, %v2035_v36  ;;  %v630_v61 = vmul.f32 %v629_v23, %v2035_v36  ;;  %v653_v23 = vstv %s2349_s17 }
 0x1b0   :  { %v581_v8 = vstv %s3561_s26  ;;  %s3563_s15 = sld [smem:[#allocation42_spill]] }
 0x1b1   :  { %s2511_s7 = sld [smem:[#allocation2 + $0x138]]  ;;  %v582_v33 = vmul.f32 %v581_v8, %v2037_v37  ;;  %v2546_v16 = vadd.f32 %v579_v30, %v576_v42  ;;  %v633_v8 = vmul.f32 %v632_v43, %v2037_v37 }
 0x1b2   :  { %s3565_s19 = sld [smem:[#allocation43_spill]] }
 0x1b3   :  { %s3566_s5 = sld [smem:[#allocation44_spill]]  ;;  %v2553_v39 = vadd.f32 %v585_v6, %v582_v33  ;;  %v650_v6 = vstv %s2345_s1 }
 0x1b4   :  { %s2519_s0 = sld [smem:[#allocation2 + $0x144]]  ;;  %v587_v35 = vstv %s3562_s30  ;;  %v651_v43 = vmul.f32 %v650_v6, %v2074_v1 }
 0x1b5   :  { %s2526_s9 = sld [smem:[#allocation2 + $0xb5]]  ;;  %v588_v12 = vmul.f32 %v587_v35, %v2054_v52 }
 0x1b6   :  { %v590_v7 = vstv %s3563_s15  ;;  %s2535_s29 = sld [smem:[#allocation2 + $0xc1]] }
 0x1b7   :  { %3564 = sst [smem:[#allocation67_spill]] %s2511_s7  ;;  %v591_v38 = vmul.f32 %v590_v7, %v2056_v53 }
 0x1b8   :  { %v593_v17 = vstv %s3565_s19  ;;  %s2543_s20 = sld [smem:[#allocation2 + $0xcd]] }
 0x1b9   :  { %v596_v21 = vstv %s3566_s5  ;;  %s3568_s26 = sld [smem:[#allocation50_spill]]  ;;  %v594_v49 = vmul.f32 %v593_v17, %v2062_v56  ;;  %v612_v33 = vadd.f32 %v591_v38, %v588_v12  ;;  %v648_v12 = vmul.f32 %v647_v29, %v2072_v0 }
 0x1ba   :  { %3567 = sst [smem:[#allocation36_spill]] %s2519_s0  ;;  %v597_v50 = vmul.f32 %v596_v21, %v2072_v0  ;;  %v661_v21 = vadd.f32 %v630_v61, %v627_v60  ;;  %v662_v38 = vadd.f32 %v636_v54, %v633_v8  ;;  %v654_v60 = vmul.f32 %v653_v23, %v2089_v9 }
 0x1bb   :  { %s3569_s30 = sld [smem:[#allocation51_spill]]  ;;  %v664_v54 = vadd.f32 %v648_v12, %v645_v34 }
 0x1bc   :  { %s2550_s15 = sld [smem:[#allocation2 + $0xd9]]  ;;  %v613_v17 = vadd.f32 %v597_v50, %v594_v49 }
 0x1bd   :  { %s3570_s0 = sld [smem:[#allocation52_spill]] }
 0x1be   :  { %s3571_s7 = sld [smem:[#allocation53_spill]] }
 0x1bf   :  { %s2557_s19 = sld [smem:[#allocation2 + $0xe5]]  ;;  %v599_v58 = vstv %s3568_s26 }
 0x1c0   :  { %s2563_s28 = sld [smem:[#allocation2 + $0xf1]]  ;;  %v600_v42 = vmul.f32 %v599_v58, %v2074_v1  ;;  %v689_v58 = vstv %s2397_s6 }
 0x1c1   :  { %v602_v59 = vstv %s3569_s30  ;;  %s2569_s25 = sld [smem:[#allocation2 + $0xfd]]  ;;  %v690_v6 = vmul.f32 %v689_v58, %v2054_v52 }
 0x1c2   :  { %s2575_s2 = sld [smem:[#allocation2 + $0x109]]  ;;  %v603_v30 = vmul.f32 %v602_v59, %v2089_v9 }
 0x1c3   :  { %v605_v2 = vstv %s3570_s0  ;;  %s2581_s3 = sld [smem:[#allocation2 + $0x115]] }
 0x1c4   :  { %v608_v45 = vstv %s3571_s7  ;;  %s3574_s16 = sld [smem:[#allocation56_spill]]  ;;  %v606_v35 = vmul.f32 %v605_v2, %v2091_v10  ;;  %v695_v2 = vstv %s2407_s18  ;;  %v614_v52 = vadd.f32 %v603_v30, %v600_v42 }
 0x1c5   :  { %s3575_s8 = sld [smem:[#allocation47_spill]]  ;;  %v609_v7 = vmul.f32 %v608_v45, %v2093_v11  ;;  %v696_v12 = vmul.f32 %v695_v2, %v2062_v56 }
 0x1c6   :  { %s2586_s7 = sld [smem:[#allocation2 + $0x121]] }
 0x1c7   :  { %s3577_s5 = sld [smem:[#allocation48_spill]] }
 0x1c8   :  { %3572 = sst [smem:[#allocation68_spill]] %s2575_s2 }
 0x1c9   :  { %3573 = sst [smem:[#allocation69_spill]] %s2581_s3 }
 0x1ca   :  { %s3578_s0 = sld [smem:[#allocation57_spill]]  ;;  %v677_v49 = vstv %s3574_s16 }
 0x1cb   :  { %s3579_s14 = sld [smem:[#allocation58_spill]]  ;;  %v680_v50 = vstv %s3575_s8  ;;  %v678_v13 = vmul.f32 %v677_v49, %v2028_v32 }
 0x1cc   :  { %3576 = sst [smem:[#allocation75_spill]] %s2586_s7  ;;  %v681_v27 = vmul.f32 %v680_v50, %v2035_v36 }
 0x1cd   :  { %s2590_s10 = sld [smem:[#allocation2 + $0x12d]]  ;;  %v683_v55 = vstv %s3577_s5 }
 0x1ce   :  { %s3581_s26 = sld [smem:[#allocation55_spill]]  ;;  %v684_v28 = vmul.f32 %v683_v55, %v2037_v37  ;;  %v616_v55 = vadd.f32 %v2553_v39, %v2546_v16  ;;  %v665_v16 = vadd.f32 %v654_v60, %v651_v43 }
 0x1cf   :  { %s3582_s1 = sld [smem:[#allocation59_spill]] }
 0x1d0   :  { %s2595_s30 = sld [smem:[#allocation2 + $0x139]]  ;;  %v686_v57 = vstv %s3578_s0 }
 0x1d1   :  { %s3584_s7 = sld [smem:[#allocation45_spill]]  ;;  %v692_v59 = vstv %s3579_s14  ;;  %v687_v29 = vmul.f32 %v686_v57, %v2041_v40  ;;  %v617_v57 = vadd.f32 %v613_v17, %v612_v33  ;;  %v667_v33 = vadd.f32 %v662_v38, %v661_v21 }
 0x1d2   :  { %s2600_s3 = sld [smem:[#allocation2 + $0x145]]  ;;  %v693_v23 = vmul.f32 %v692_v59, %v2056_v53  ;;  %v615_v53 = vadd.f32 %v609_v7, %v606_v35  ;;  %v465_v7 = vadd.f32 %v2447_v4, %v2441_v48  ;;  %v368_v17 = vadd.f32 %v367_v63, %v2431_v62 }
 0x1d3   :  { %3580 = sst [smem:[#allocation70_spill]] %s2590_s10  ;;  %v713_v58 = vadd.f32 %v687_v29, %v684_v28  ;;  %v419_v21 = vadd.f32 %v418_v47, %v2438_v46  ;;  %v567_v48 = vadd.f32 %v2537_v20, %v2530_v19  ;;  %v619_v63 = vadd.f32 %v617_v57, %v616_v55 }
 0x1d4   :  { %s2606_s10 = sld [smem:[#allocation2 + $0xb6]]  ;;  %v656_v61 = vstv %s3581_s26  ;;  %v714_v59 = vadd.f32 %v693_v23, %v690_v6  ;;  %v618_v62 = vadd.f32 %v615_v53, %v614_v52  ;;  %v2678_v47 = vmax.f32 %v2378_v18, 0.0 }
 0x1d5   :  { %s3586_s17 = sld [smem:[#allocation60_spill]]  ;;  %v698_v45 = vstv %s3582_s1  ;;  %v657_v34 = vmul.f32 %v656_v61, %v2091_v10  ;;  %v2686_v20 = vmax.f32 %v2385_v25, 0.0  ;;  %v2695_v18 = vmax.f32 %v368_v17, 0.0 }
 0x1d6   :  { %3583 = sst [smem:[#allocation71_spill]] %s2595_s30  ;;  %v699_v32 = vmul.f32 %v698_v45, %v2072_v0  ;;  %v712_v0 = vadd.f32 %v681_v27, %v678_v13  ;;  %v2699_v25 = vmax.f32 %v419_v21, 0.0  ;;  %v620_v2 = vadd.f32 %v619_v63, %v618_v62 }
 0x1d7   :  { %s2612_s30 = sld [smem:[#allocation2 + $0xc2]]  ;;  %v659_v8 = vstv %s3584_s7  ;;  %v734_v6 = vstv %s2462_s21  ;;  %v737_v23 = vstv %s2468_s4  ;;  %v758_v63 = vstv %s2507_s27 }
 0x1d8   :  { %3585 = sst [smem:[#allocation72_spill]] %s2600_s3  ;;  %v660_v36 = vmul.f32 %v659_v8, %v2093_v11  ;;  %v715_v35 = vadd.f32 %v699_v32, %v696_v12  ;;  %v740_v32 = vstv %s2474_s22  ;;  %v735_v53 = vmul.f32 %v734_v6, %v2686_v20 }
 0x1d9   :  { %s3587_s2 = sld [smem:[#allocation62_spill]] }
 0x1da   :  { %s3588_s16 = sld [smem:[#allocation63_spill]]  ;;  %v666_v39 = vadd.f32 %v660_v36, %v657_v34 }
 0x1db   :  { %s3589_s8 = sld [smem:[#allocation64_spill]]  ;;  %v701_v49 = vstv %s3586_s17 }
 0x1dc   :  { %s2617_s6 = sld [smem:[#allocation2 + $0xce]]  ;;  %v702_v56 = vmul.f32 %v701_v49, %v2074_v1  ;;  %v668_v1 = vadd.f32 %v664_v54, %v663_v44  ;;  %v743_v49 = vstv %s2480_s13 }
 0x1dd   :  { %s2623_s18 = sld [smem:[#allocation2 + $0xda]] }
 0x1de   :  { %s2629_s7 = sld [smem:[#allocation2 + $0xe6]]  ;;  %v670_v46 = vadd.f32 %v668_v1, %v667_v33 }
 0x1df   :  { %v704_v37 = vstv %s3587_s2  ;;  %s2635_s5 = sld [smem:[#allocation2 + $0xf2]] }
 0x1e0   :  { %v707_v50 = vstv %s3588_s16  ;;  %s2639_s0 = sld [smem:[#allocation2 + $0xfe]]  ;;  %v705_v61 = vmul.f32 %v704_v37, %v2089_v9  ;;  %v466_v9 = vadd.f32 %v2449_v5, %v2443_v3  ;;  %v568_v3 = vadd.f32 %v2539_v15, %v2532_v14 }
 0x1e1   :  { %v710_v40 = vstv %s3589_s8  ;;  %s2642_s14 = sld [smem:[#allocation2 + $0x10a]]  ;;  %v708_v42 = vmul.f32 %v707_v50, %v2091_v10  ;;  %v516_v10 = vadd.f32 %v2528_v51, %v2513_v24  ;;  %v718_v24 = vadd.f32 %v713_v58, %v712_v0 }
 0x1e2   :  { %v711_v30 = vmul.f32 %v710_v40, %v2093_v11  ;;  %s2647_s1 = sld [smem:[#allocation2 + $0x116]]  ;;  %v517_v11 = vadd.f32 %v2521_v31, %v2515_v41  ;;  %v716_v4 = vadd.f32 %v705_v61, %v702_v56  ;;  %v719_v41 = vadd.f32 %v715_v35, %v714_v59 }
 0x1e3   :  { %s2649_s17 = sld [smem:[#allocation2 + $0x122]]  ;;  %v669_v31 = vadd.f32 %v666_v39, %v665_v16  ;;  %v2681_v51 = vmax.f32 %v2383_v22, 0.0  ;;  %v467_v19 = vadd.f32 %v466_v9, %v465_v7  ;;  %v2689_v15 = vmax.f32 %v2387_v26, 0.0 }
 0x1e4   :  { %s2659_s16 = sld [smem:[#allocation2 + $0x12e]]  ;;  %v717_v5 = vadd.f32 %v711_v30, %v708_v42  ;;  %v518_v14 = vadd.f32 %v517_v11, %v516_v10  ;;  %v569_v22 = vadd.f32 %v568_v3, %v567_v48  ;;  %v721_v60 = vadd.f32 %v719_v41, %v718_v24 }
 0x1e5   :  { %s2671_s8 = sld [smem:[#allocation2 + $0x13a]]  ;;  %v671_v45 = vadd.f32 %v670_v46, %v669_v31  ;;  %v738_v55 = vmul.f32 %v737_v23, %v2689_v15  ;;  %v741_v0 = vmul.f32 %v740_v32, %v2695_v18  ;;  %v744_v58 = vmul.f32 %v743_v49, %v2699_v25 }
 0x1e6   :  { %3590 = sst [smem:[#allocation73_spill]] %s2639_s0  ;;  %v720_v44 = vadd.f32 %v717_v5, %v716_v4  ;;  %v746_v42 = vstv %s2485_s23  ;;  %v749_v30 = vstv %s2491_s24  ;;  %v752_v35 = vstv %s2497_s12 }
 0x1e7   :  { %3591 = sst [smem:[#allocation49_spill]] %s2642_s14  ;;  %v764_v1 = vadd.f32 %v738_v55, %v735_v53  ;;  %v755_v10 = vstv %s2501_s11  ;;  %v765_v11 = vadd.f32 %v744_v58, %v741_v0  ;;  %v779_v48 = vstv %s2526_s9 }
 0x1e8   :  { %3594 = sst [smem:[#allocation61_spill]] %s2647_s1  ;;  %v722_v12 = vadd.f32 %v721_v60, %v720_v44  ;;  %v782_v3 = vstv %s2535_s29  ;;  %v785_v4 = vstv %s2543_s20  ;;  %v788_v5 = vstv %s2550_s15 }
 0x1e9   :  { %3595 = sst [smem:[#allocation7_spill]] %s2649_s17  ;;  %v791_v24 = vstv %s2557_s19  ;;  %v794_v41 = vstv %s2563_s28  ;;  %v797_v31 = vstv %s2569_s25  ;;  %v789_v44 = vmul.f32 %v788_v5, %v2689_v15 }
 0x1ea   :  { %3596 = sst [smem:[#allocation9_spill]] %s2659_s16  ;;  %v792_v60 = vmul.f32 %v791_v24, %v2695_v18  ;;  %v830_v55 = vstv %s2606_s10  ;;  %v833_v0 = vstv %s2612_s30  ;;  %v836_v58 = vstv %s2617_s6 }
 0x1eb   :  { %3597 = sst [smem:[#allocation6_spill]] %s2671_s8 }
 0x1ec   :  { %s3598_s3 = sld [smem:[#allocation15_spill]] }
 0x1ed   :  { %s3599_s17 = sld [smem:[#allocation30_spill]] }
 0x1ee   :  { %s2673_s16 = sld [smem:[#allocation2 + $0x146]] }
 0x1ef   :  { %s2675_s2 = sld [smem:[#allocation2 + $0xb7]] }
 0x1f0   :  { %s3602_s26 = sld [smem:[#allocation37_spill]] }
 0x1f1   :  { %s2683_s8 = sld [smem:[#allocation2 + $0xc3]] }
 0x1f2   :  { %v469_v38 = vstv %s3598_s3  ;;  %s2693_s1 = sld [smem:[#allocation2 + $0xcf]] }
 0x1f3   :  { %v520_v43 = vstv %s3599_s17  ;;  %s3607_s14 = sld [smem:[#allocation23_spill]]  ;;  %v470_v8 = vadd.f32 %v469_v38, %v467_v19  ;;  %v780_v38 = vmul.f32 %v779_v48, %v2678_v47  ;;  %v837_v48 = vmul.f32 %v836_v58, %v2686_v20 }
 0x1f4   :  { %3600 = sst [smem:[#allocation8_spill]] %s2673_s16  ;;  %v521_v54 = vadd.f32 %v520_v43, %v518_v14  ;;  %v783_v43 = vmul.f32 %v782_v3, %v2681_v51 }
 0x1f5   :  { %3601 = sst [smem:[#allocation10_spill]] %s2675_s2  ;;  %v2727_v57 = vmax.f32 %v470_v8, 0.0 }
 0x1f6   :  { %s3604_s16 = sld [smem:[#allocation54_spill]]  ;;  %v571_v26 = vstv %s3602_s26  ;;  %v2729_v56 = vmax.f32 %v521_v54, 0.0  ;;  %v814_v32 = vadd.f32 %v783_v43, %v780_v38 }
 0x1f7   :  { %3603 = sst [smem:[#allocation11_spill]] %s2683_s8  ;;  %v572_v34 = vadd.f32 %v571_v26, %v569_v22  ;;  %v747_v7 = vmul.f32 %v746_v42, %v2727_v57  ;;  %v786_v22 = vmul.f32 %v785_v4, %v2686_v20  ;;  %v795_v26 = vmul.f32 %v794_v41, %v2699_v25 }
 0x1f8   :  { %s3605_s2 = sld [smem:[#allocation46_spill]]  ;;  %v750_v9 = vmul.f32 %v749_v30, %v2729_v56  ;;  %v842_v42 = vstv %s2629_s7  ;;  %v845_v30 = vstv %s2635_s5 }
 0x1f9   :  { %3606 = sst [smem:[#allocation12_spill]] %s2693_s1  ;;  %v728_v28 = vstv %s3607_s14  ;;  %v2735_v59 = vmax.f32 %v572_v34, 0.0  ;;  %v815_v49 = vadd.f32 %v789_v44, %v786_v22  ;;  %v843_v4 = vmul.f32 %v842_v42, %v2695_v18 }
 0x1fa   :  { %s3608_s0 = sld [smem:[#allocation66_spill]]  ;;  %v729_v40 = vmul.f32 %v728_v28, %v2678_v47  ;;  %v766_v14 = vadd.f32 %v750_v9, %v747_v7  ;;  %v846_v5 = vmul.f32 %v845_v30, %v2699_v25 }
 0x1fb   :  { %s2697_s8 = sld [smem:[#allocation2 + $0xdb]]  ;;  %v753_v21 = vmul.f32 %v752_v35, %v2735_v59 }
 0x1fc   :  { %s2702_s3 = sld [smem:[#allocation2 + $0xe7]]  ;;  %v622_v13 = vstv %s3604_s16  ;;  %v770_v53 = vadd.f32 %v766_v14, %v765_v11  ;;  %v831_v11 = vmul.f32 %v830_v55, %v2678_v47 }
 0x1fd   :  { %s3610_s17 = sld [smem:[#allocation65_spill]]  ;;  %v623_v36 = vadd.f32 %v622_v13, %v620_v2  ;;  %v798_v2 = vmul.f32 %v797_v31, %v2727_v57 }
 0x1fe   :  { %v673_v27 = vstv %s3605_s2  ;;  %s2706_s1 = sld [smem:[#allocation2 + $0xf3]] }
 0x1ff   :  { %s2716_s26 = sld [smem:[#allocation2 + $0x10b]]  ;;  %v674_v37 = vadd.f32 %v673_v27, %v671_v45  ;;  %v2744_v16 = vmax.f32 %v623_v36, 0.0 }
 0x200   :  { %v731_v29 = vstv %s3608_s0  ;;  %s2719_s16 = sld [smem:[#allocation2 + $0x117]] }
 0x201   :  { %3609 = sst [smem:[#allocation13_spill]] %s2697_s8  ;;  %v732_v52 = vmul.f32 %v731_v29, %v2681_v51  ;;  %v2746_v39 = vmax.f32 %v674_v37, 0.0  ;;  %v756_v62 = vmul.f32 %v755_v10, %v2744_v16 }
 0x202   :  { %s2712_s8 = sld [smem:[#allocation2 + $0xff]] }
 0x203   :  { %v724_v50 = vstv %s3610_s17  ;;  %s2725_s22 = sld [smem:[#allocation2 + $0x123]]  ;;  %v763_v33 = vadd.f32 %v732_v52, %v729_v40  ;;  %v759_v13 = vmul.f32 %v758_v63, %v2746_v39  ;;  %v767_v6 = vadd.f32 %v756_v62, %v753_v21 }
 0x204   :  { %s2733_s4 = sld [smem:[#allocation2 + $0x12f]]  ;;  %v725_v61 = vadd.f32 %v724_v50, %v722_v12  ;;  %v816_v50 = vadd.f32 %v795_v26, %v792_v60  ;;  %v834_v21 = vmul.f32 %v833_v0, %v2681_v51  ;;  %v867_v26 = vadd.f32 %v846_v5, %v843_v4 }
 0x205   :  { %s2739_s21 = sld [smem:[#allocation2 + $0x13b]]  ;;  %v769_v23 = vadd.f32 %v764_v1, %v763_v33  ;;  %v820_v33 = vadd.f32 %v815_v49, %v814_v32 }
 0x206   :  { %s2742_s13 = sld [smem:[#allocation2 + $0x147]]  ;;  %v2755_v17 = vmax.f32 %v725_v61, 0.0  ;;  %v839_v61 = vstv %s2623_s18  ;;  %v865_v44 = vadd.f32 %v834_v21, %v831_v11 }
 0x207   :  { %s2748_s0 = sld [smem:[#allocation2 + $0xb8]]  ;;  %v840_v3 = vmul.f32 %v839_v61, %v2689_v15  ;;  %v772_v14 = vadd.f32 %v770_v53, %v769_v23  ;;  %v896_v53 = vstv %s2706_s1  ;;  %v902_v61 = vstv %s2716_s26 }
 0x208   :  { %s3612_s23 = sld [smem:[#allocation68_spill]]  ;;  %v899_v58 = vstv %s2712_s8 }
 0x209   :  { %s2753_s24 = sld [smem:[#allocation2 + $0xc4]]  ;;  %v866_v60 = vadd.f32 %v840_v3, %v837_v48  ;;  %v908_v21 = vstv %s2725_s22 }
 0x20a   :  { %s3613_s12 = sld [smem:[#allocation67_spill]]  ;;  %v911_v4 = vstv %s2733_s4 }
 0x20b   :  { %s2760_s14 = sld [smem:[#allocation2 + $0xd0]]  ;;  %v914_v5 = vstv %s2739_s21 }
 0x20c   :  { %3611 = sst [smem:[#allocation14_spill]] %s2742_s13 }
 0x20d   :  { %s2766_s2 = sld [smem:[#allocation2 + $0xdc]] }
 0x20e   :  { %s3614_s11 = sld [smem:[#allocation69_spill]]  ;;  %v800_v46 = vstv %s3612_s23 }
 0x20f   :  { %s3615_s17 = sld [smem:[#allocation75_spill]]  ;;  %v801_v45 = vmul.f32 %v800_v46, %v2729_v56 }
 0x210   :  { %s2772_s13 = sld [smem:[#allocation2 + $0xe8]]  ;;  %v761_v19 = vstv %s3613_s12 }
 0x211   :  { %s3616_s9 = sld [smem:[#allocation70_spill]]  ;;  %v762_v27 = vmul.f32 %v761_v19, %v2755_v17  ;;  %v817_v40 = vadd.f32 %v801_v45, %v798_v2 }
 0x212   :  { %s3617_s29 = sld [smem:[#allocation71_spill]] }
 0x213   :  { %s2777_s20 = sld [smem:[#allocation2 + $0xf4]]  ;;  %v768_v52 = vadd.f32 %v762_v27, %v759_v13  ;;  %v821_v10 = vadd.f32 %v817_v40, %v816_v50 }
 0x214   :  { %s2783_s27 = sld [smem:[#allocation2 + $0x100]]  ;;  %v803_v8 = vstv %s3614_s11 }
 0x215   :  { %v806_v54 = vstv %s3615_s17  ;;  %s2789_s15 = sld [smem:[#allocation2 + $0x10c]]  ;;  %v804_v34 = vmul.f32 %v803_v8, %v2735_v59  ;;  %v771_v19 = vadd.f32 %v768_v52, %v767_v6  ;;  %v823_v43 = vadd.f32 %v821_v10, %v820_v33 }
 0x216   :  { %s2795_s19 = sld [smem:[#allocation2 + $0x118]]  ;;  %v807_v12 = vmul.f32 %v806_v54, %v2744_v16  ;;  %v893_v52 = vstv %s2702_s3  ;;  %v897_v33 = vmul.f32 %v896_v53, %v2699_v25  ;;  %v905_v10 = vstv %s2719_s16 }
 0x217   :  { %v809_v28 = vstv %s3616_s9  ;;  %s2797_s28 = sld [smem:[#allocation2 + $0x124]]  ;;  %v773_v13 = vadd.f32 %v772_v14, %v771_v19  ;;  %v909_v19 = vmul.f32 %v908_v21, %v2744_v16 }
 0x218   :  { %v812_v29 = vstv %s3617_s29  ;;  %s2801_s25 = sld [smem:[#allocation2 + $0x130]]  ;;  %v810_v36 = vmul.f32 %v809_v28, %v2746_v39  ;;  %v818_v35 = vadd.f32 %v807_v12, %v804_v34 }
 0x219   :  { %v813_v37 = vmul.f32 %v812_v29, %v2755_v17  ;;  %s3620_s23 = sld [smem:[#allocation73_spill]] }
 0x21a   :  { %s3621_s12 = sld [smem:[#allocation49_spill]] }
 0x21b   :  { %s2805_s11 = sld [smem:[#allocation2 + $0x13c]]  ;;  %v819_v9 = vadd.f32 %v813_v37, %v810_v36  ;;  %v871_v36 = vadd.f32 %v866_v60, %v865_v44  ;;  %v915_v44 = vmul.f32 %v914_v5, %v2755_v17 }
 0x21c   :  { %s2809_s17 = sld [smem:[#allocation2 + $0x148]] }
 0x21d   :  { %3618 = sst [smem:[#allocation16_spill]] %s2797_s28  ;;  %v822_v38 = vadd.f32 %v819_v9, %v818_v35  ;;  %v894_v35 = vmul.f32 %v893_v52, %v2695_v18  ;;  %v903_v9 = vmul.f32 %v902_v61, %v2729_v56 }
 0x21e   :  { %3619 = sst [smem:[#allocation17_spill]] %s2801_s25 }
 0x21f   :  { %s2815_s9 = sld [smem:[#allocation2 + $0xb9]]  ;;  %v848_v1 = vstv %s3620_s23  ;;  %v824_v6 = vadd.f32 %v823_v43, %v822_v38  ;;  %v944_v38 = vstv %s2772_s13  ;;  %v947_v43 = vstv %s2777_s20 }
 0x220   :  { %s3624_s29 = sld [smem:[#allocation61_spill]]  ;;  %v851_v7 = vstv %s3621_s12  ;;  %v849_v24 = vmul.f32 %v848_v1, %v2727_v57 }
 0x221   :  { %3622 = sst [smem:[#allocation18_spill]] %s2805_s11  ;;  %v852_v41 = vmul.f32 %v851_v7, %v2729_v56  ;;  %v900_v7 = vmul.f32 %v899_v58, %v2727_v57 }
 0x222   :  { %3623 = sst [smem:[#allocation19_spill]] %s2809_s17 }
 0x223   :  { %s3625_s25 = sld [smem:[#allocation7_spill]]  ;;  %v868_v54 = vadd.f32 %v852_v41, %v849_v24  ;;  %v932_v24 = vstv %s2748_s0  ;;  %v935_v41 = vstv %s2753_s24  ;;  %v919_v14 = vadd.f32 %v903_v9, %v900_v7 }
 0x224   :  { %s2819_s28 = sld [smem:[#allocation2 + $0xc5]]  ;;  %v933_v60 = vmul.f32 %v932_v24, %v2678_v47 }
 0x225   :  { %s3626_s11 = sld [smem:[#allocation9_spill]]  ;;  %v872_v37 = vadd.f32 %v868_v54, %v867_v26  ;;  %v936_v26 = vmul.f32 %v935_v41, %v2681_v51  ;;  %v983_v58 = vstv %s2815_s9 }
 0x226   :  { %s3627_s10 = sld [smem:[#allocation6_spill]]  ;;  %v854_v62 = vstv %s3624_s29 }
 0x227   :  { %s2823_s30 = sld [smem:[#allocation2 + $0xd1]]  ;;  %v855_v22 = vmul.f32 %v854_v62, %v2735_v59  ;;  %v874_v1 = vadd.f32 %v872_v37, %v871_v36  ;;  %v906_v62 = vmul.f32 %v905_v10, %v2735_v59  ;;  %v967_v37 = vadd.f32 %v936_v26, %v933_v60 }
 0x228   :  { %s2829_s6 = sld [smem:[#allocation2 + $0xdd]] }
 0x229   :  { %s2834_s18 = sld [smem:[#allocation2 + $0xe9]]  ;;  %v857_v63 = vstv %s3625_s25 }
 0x22a   :  { %s2839_s7 = sld [smem:[#allocation2 + $0xf5]]  ;;  %v858_v2 = vmul.f32 %v857_v63, %v2744_v16  ;;  %v918_v63 = vadd.f32 %v897_v33, %v894_v35  ;;  %v986_v61 = vstv %s2819_s28 }
 0x22b   :  { %v860_v31 = vstv %s3626_s11  ;;  %s3630_s5 = sld [smem:[#allocation36_spill]]  ;;  %v987_v5 = vmul.f32 %v986_v61, %v2681_v51 }
 0x22c   :  { %v863_v46 = vstv %s3627_s10  ;;  %s3631_s23 = sld [smem:[#allocation10_spill]]  ;;  %v861_v45 = vmul.f32 %v860_v31, %v2746_v39  ;;  %v869_v32 = vadd.f32 %v858_v2, %v855_v22  ;;  %v938_v31 = vstv %s2760_s14 }
 0x22d   :  { %s3632_s12 = sld [smem:[#allocation11_spill]]  ;;  %v864_v8 = vmul.f32 %v863_v46, %v2755_v17  ;;  %v941_v46 = vstv %s2766_s2  ;;  %v912_v22 = vmul.f32 %v911_v4, %v2746_v39  ;;  %v923_v36 = vadd.f32 %v919_v14, %v918_v63 }
 0x22e   :  { %s2841_s17 = sld [smem:[#allocation2 + $0x101]]  ;;  %v942_v54 = vmul.f32 %v941_v46, %v2689_v15  ;;  %v989_v35 = vstv %s2823_s30  ;;  %v992_v33 = vstv %s2829_s6  ;;  %v984_v4 = vmul.f32 %v983_v58, %v2678_v47 }
 0x22f   :  { %3628 = sst [smem:[#allocation20_spill]] %s2834_s18  ;;  %v870_v49 = vadd.f32 %v864_v8, %v861_v45  ;;  %v939_v8 = vmul.f32 %v938_v31, %v2686_v20  ;;  %v990_v24 = vmul.f32 %v989_v35, %v2686_v20  ;;  %v993_v41 = vmul.f32 %v992_v33, %v2689_v15 }
 0x230   :  { %3629 = sst [smem:[#allocation24_spill]] %s2839_s7 }
 0x231   :  { %s3634_s29 = sld [smem:[#allocation72_spill]]  ;;  %v775_v27 = vstv %s3630_s5  ;;  %v873_v11 = vadd.f32 %v870_v49, %v869_v32  ;;  %v920_v32 = vadd.f32 %v909_v19, %v906_v62  ;;  %v921_v49 = vadd.f32 %v915_v44, %v912_v22 }
 0x232   :  { %s3635_s18 = sld [smem:[#allocation12_spill]]  ;;  %v881_v28 = vstv %s3631_s23  ;;  %v2879_v42 = vadd.f32 %v775_v27, %v773_v13  ;;  %v945_v13 = vmul.f32 %v944_v38, %v2695_v18  ;;  %v948_v27 = vmul.f32 %v947_v43, %v2699_v25 }
 0x233   :  { %s3636_s25 = sld [smem:[#allocation13_spill]]  ;;  %v884_v29 = vstv %s3632_s12  ;;  %v882_v50 = vmul.f32 %v881_v28, %v2678_v47  ;;  %v950_v28 = vstv %s2783_s27  ;;  %v968_v53 = vadd.f32 %v942_v54, %v939_v8 }
 0x234   :  { %3633 = sst [smem:[#allocation25_spill]] %s2841_s17  ;;  %v885_v40 = vmul.f32 %v884_v29, %v2681_v51  ;;  %v777_v2 = vmax.f32 %v2879_v42, 0.0  ;;  %v953_v29 = vstv %s2789_s15  ;;  %v924_v60 = vadd.f32 %v921_v49, %v920_v32 }
 0x235   :  { %s2844_s11 = sld [smem:[#allocation2 + $0x10d]]  ;;  %v973_v54 = vadd.f32 %v968_v53, %v967_v37 }
 0x236   :  { %s2849_s10 = sld [smem:[#allocation2 + $0x119]]  ;;  %v916_v48 = vadd.f32 %v885_v40, %v882_v50  ;;  %v951_v50 = vmul.f32 %v950_v28, %v2727_v57  ;;  %v954_v40 = vmul.f32 %v953_v29, %v2729_v56  ;;  %v1018_v28 = vadd.f32 %v987_v5, %v984_v4 }
 0x237   :  { %s2851_s17 = sld [smem:[#allocation2 + $0x125]]  ;;  %v826_v23 = vstv %s3634_s29  ;;  %v1019_v29 = vadd.f32 %v993_v41, %v990_v24 }
 0x238   :  { %s2856_s7 = sld [smem:[#allocation2 + $0x131]]  ;;  %v887_v34 = vstv %s3635_s18  ;;  %v2881_v30 = vadd.f32 %v826_v23, %v824_v6  ;;  %v2929_v6 = vadd.f32 %v874_v1, %v873_v11 }
 0x239   :  { %v890_v12 = vstv %s3636_s25  ;;  %s2869_s5 = sld [smem:[#allocation2 + $0xba]]  ;;  %v888_v55 = vmul.f32 %v887_v34, %v2686_v20  ;;  %v1024_v35 = vadd.f32 %v1019_v29, %v1018_v28 }
 0x23a   :  { %v891_v0 = vmul.f32 %v890_v12, %v2689_v15  ;;  %s2875_s18 = sld [smem:[#allocation2 + $0xc6]]  ;;  %v828_v45 = vmax.f32 %v2881_v30, 0.0  ;;  %v956_v12 = vstv %s2795_s19 }
 0x23b   :  { %3637 = sst [smem:[#allocation26_spill]] %s2844_s11 }
 0x23c   :  { %s2861_s11 = sld [smem:[#allocation2 + $0x13d]]  ;;  %v917_v3 = vadd.f32 %v891_v0, %v888_v55  ;;  %v957_v55 = vmul.f32 %v956_v12, %v2735_v59  ;;  %v969_v0 = vadd.f32 %v948_v27, %v945_v13  ;;  %v1007_v19 = vstv %s2849_s10 }
 0x23d   :  { %3638 = sst [smem:[#allocation27_spill]] %s2851_s17  ;;  %v1008_v13 = vmul.f32 %v1007_v19, %v2735_v59 }
 0x23e   :  { %s2863_s17 = sld [smem:[#allocation2 + $0x149]]  ;;  %v922_v34 = vadd.f32 %v917_v3, %v916_v48  ;;  %v970_v3 = vadd.f32 %v954_v40, %v951_v50  ;;  %v1013_v22 = vstv %s2856_s7 }
 0x23f   :  { %s2877_s23 = sld [smem:[#allocation2 + $0xd2]]  ;;  %v1034_v50 = vstv %s2869_s5 }
 0x240   :  { %s2885_s1 = sld [smem:[#allocation2 + $0xde]]  ;;  %v925_v26 = vadd.f32 %v923_v36, %v922_v34  ;;  %v1014_v34 = vmul.f32 %v1013_v22, %v2746_v39  ;;  %v974_v37 = vadd.f32 %v970_v3, %v969_v0  ;;  %v1037_v40 = vstv %s2875_s18 }
 0x241   :  { %s2890_s8 = sld [smem:[#allocation2 + $0xea]] }
 0x242   :  { %s2893_s3 = sld [smem:[#allocation2 + $0xf6]]  ;;  %v1016_v44 = vstv %s2861_s11 }
 0x243   :  { %s2899_s26 = sld [smem:[#allocation2 + $0x102]]  ;;  %v1017_v12 = vmul.f32 %v1016_v44, %v2755_v17 }
 0x244   :  { %3639 = sst [smem:[#allocation31_spill]] %s2863_s17 }
 0x245   :  { %s2904_s16 = sld [smem:[#allocation2 + $0x10e]] }
 0x246   :  { %s2909_s22 = sld [smem:[#allocation2 + $0x11a]]  ;;  %v1043_v53 = vstv %s2885_s1 }
 0x247   :  { %s3640_s4 = sld [smem:[#allocation8_spill]] }
 0x248   :  { %s2915_s21 = sld [smem:[#allocation2 + $0x126]]  ;;  %v1049_v58 = vstv %s2893_s3 }
 0x249   :  { %s2921_s13 = sld [smem:[#allocation2 + $0x132]]  ;;  %v1052_v33 = vstv %s2899_s26  ;;  %v1050_v3 = vmul.f32 %v1049_v58, %v2699_v25 }
 0x24a   :  { %s3641_s0 = sld [smem:[#allocation16_spill]]  ;;  %v1053_v5 = vmul.f32 %v1052_v33, %v2727_v57 }
 0x24b   :  { %s2927_s24 = sld [smem:[#allocation2 + $0x13e]] }
 0x24c   :  { %s2933_s14 = sld [smem:[#allocation2 + $0x14a]]  ;;  %v1058_v41 = vstv %s2909_s22 }
 0x24d   :  { %v877_v23 = vstv %s3640_s4  ;;  %s3643_s2 = sld [smem:[#allocation20_spill]]  ;;  %v1059_v22 = vmul.f32 %v1058_v41, %v2735_v59 }
 0x24e   :  { %s3644_s20 = sld [smem:[#allocation24_spill]] }
 0x24f   :  { %s2935_s27 = sld [smem:[#allocation2 + $0xbb]] }
 0x250   :  { %s3645_s15 = sld [smem:[#allocation17_spill]]  ;;  %v959_v52 = vstv %s3641_s0 }
 0x251   :  { %s3646_s12 = sld [smem:[#allocation25_spill]]  ;;  %v960_v9 = vmul.f32 %v959_v52, %v2744_v16  ;;  %v1040_v52 = vstv %s2877_s23 }
 0x252   :  { %3642 = sst [smem:[#allocation22_spill]] %s2933_s14 }
 0x253   :  { %s3647_s19 = sld [smem:[#allocation26_spill]]  ;;  %v995_v1 = vstv %s3643_s2  ;;  %v971_v8 = vadd.f32 %v960_v9, %v957_v55  ;;  %v1046_v55 = vstv %s2890_s8  ;;  %v1035_v9 = vmul.f32 %v1034_v50, %v2678_v47 }
 0x254   :  { %s2940_s29 = sld [smem:[#allocation2 + $0xc7]]  ;;  %v998_v7 = vstv %s3644_s20  ;;  %v996_v62 = vmul.f32 %v995_v1, %v2695_v18  ;;  %v1055_v1 = vstv %s2904_s16  ;;  %v3052_v50 = vadd.f32 %v877_v23, %v2929_v6 }
 0x255   :  { %s3648_s25 = sld [smem:[#allocation18_spill]]  ;;  %v999_v63 = vmul.f32 %v998_v7, %v2699_v25  ;;  %v1023_v7 = vadd.f32 %v1017_v12, %v1014_v34  ;;  %v1056_v24 = vmul.f32 %v1055_v1, %v2729_v56  ;;  %v1085_v28 = vstv %s2935_s27 }
 0x256   :  { %s2945_s14 = sld [smem:[#allocation2 + $0xd3]]  ;;  %v962_v10 = vstv %s3645_s15 }
 0x257   :  { %s2951_s17 = sld [smem:[#allocation2 + $0xdf]]  ;;  %v1001_v11 = vstv %s3646_s12  ;;  %v963_v38 = vmul.f32 %v962_v10, %v2746_v39  ;;  %v1020_v32 = vadd.f32 %v999_v63, %v996_v62  ;;  %v1038_v10 = vmul.f32 %v1037_v40, %v2681_v51 }
 0x258   :  { %s3649_s0 = sld [smem:[#allocation27_spill]]  ;;  %v1002_v31 = vmul.f32 %v1001_v11, %v2727_v57  ;;  %v1041_v11 = vmul.f32 %v1040_v52, %v2686_v20  ;;  %v926_v62 = vadd.f32 %v925_v26, %v924_v60  ;;  %v1061_v63 = vstv %s2915_s21 }
 0x259   :  { %v1004_v21 = vstv %s3647_s19  ;;  %s2957_s4 = sld [smem:[#allocation2 + $0xeb]]  ;;  %v1069_v44 = vadd.f32 %v1038_v10, %v1035_v9 }
 0x25a   :  { %s2962_s28 = sld [smem:[#allocation2 + $0xf7]]  ;;  %v1005_v46 = vmul.f32 %v1004_v21, %v2729_v56  ;;  %v1044_v21 = vmul.f32 %v1043_v53, %v2689_v15  ;;  %v1088_v29 = vstv %s2940_s29 }
 0x25b   :  { %v965_v48 = vstv %s3648_s25  ;;  %s2968_s9 = sld [smem:[#allocation2 + $0x103]]  ;;  %v1089_v58 = vmul.f32 %v1088_v29, %v2681_v51 }
 0x25c   :  { %s2974_s30 = sld [smem:[#allocation2 + $0x10f]]  ;;  %v966_v43 = vmul.f32 %v965_v48, %v2755_v17  ;;  %v1021_v49 = vadd.f32 %v1005_v46, %v1002_v31  ;;  %v1047_v48 = vmul.f32 %v1046_v55, %v2695_v18  ;;  %v1064_v31 = vstv %s2921_s13 }
 0x25d   :  { %s2980_s6 = sld [smem:[#allocation2 + $0x11b]]  ;;  %v1067_v46 = vstv %s2927_s24  ;;  %v1070_v60 = vadd.f32 %v1044_v21, %v1041_v11  ;;  %v1091_v34 = vstv %s2945_s14  ;;  %v1094_v12 = vstv %s2951_s17 }
 0x25e   :  { %v1010_v14 = vstv %s3649_s0  ;;  %s2982_s2 = sld [smem:[#allocation2 + $0x127]]  ;;  %v972_v36 = vadd.f32 %v966_v43, %v963_v38  ;;  %v1025_v0 = vadd.f32 %v1021_v49, %v1020_v32  ;;  %v1071_v26 = vadd.f32 %v1050_v3, %v1047_v48 }
 0x25f   :  { %v1011_v27 = vmul.f32 %v1010_v14, %v2744_v16  ;;  %s2986_s7 = sld [smem:[#allocation2 + $0x133]]  ;;  %v976_v14 = vadd.f32 %v974_v37, %v973_v54  ;;  %v1065_v54 = vmul.f32 %v1064_v31, %v2746_v39  ;;  %v1097_v32 = vstv %s2957_s4 }
 0x260   :  { %s2990_s11 = sld [smem:[#allocation2 + $0x13f]]  ;;  %v975_v19 = vadd.f32 %v972_v36, %v971_v8  ;;  %v1027_v43 = vadd.f32 %v1025_v0, %v1024_v35  ;;  %v1062_v8 = vmul.f32 %v1061_v63, %v2744_v16  ;;  %v1100_v49 = vstv %s2962_s28 }
 0x261   :  { %s2994_s10 = sld [smem:[#allocation2 + $0x14b]]  ;;  %v1022_v61 = vadd.f32 %v1011_v27, %v1008_v13  ;;  %v1068_v13 = vmul.f32 %v1067_v46, %v2755_v17  ;;  %v1072_v27 = vadd.f32 %v1056_v24, %v1053_v5  ;;  %v1103_v36 = vstv %s2968_s9 }
 0x262   :  { %s3000_s20 = sld [smem:[#allocation2 + $0xbc]]  ;;  %v1106_v37 = vstv %s2974_s30  ;;  %v977_v52 = vadd.f32 %v976_v14, %v975_v19  ;;  %v1086_v55 = vmul.f32 %v1085_v28, %v2678_v47  ;;  %v1095_v35 = vmul.f32 %v1094_v12, %v2689_v15 }
 0x263   :  { %s3650_s15 = sld [smem:[#allocation14_spill]]  ;;  %v1026_v38 = vadd.f32 %v1023_v7, %v1022_v61  ;;  %v1092_v61 = vmul.f32 %v1091_v34, %v2686_v20  ;;  %v1098_v6 = vmul.f32 %v1097_v32, %v2695_v18  ;;  %v1101_v23 = vmul.f32 %v1100_v49, %v2699_v25 }
 0x264   :  { %s3004_s12 = sld [smem:[#allocation2 + $0xc8]]  ;;  %v1104_v33 = vmul.f32 %v1103_v36, %v2727_v57  ;;  %v1107_v1 = vmul.f32 %v1106_v37, %v2729_v56  ;;  %v1073_v7 = vadd.f32 %v1062_v8, %v1059_v22  ;;  %v1074_v0 = vadd.f32 %v1068_v13, %v1065_v54 }
 0x265   :  { %s3008_s5 = sld [smem:[#allocation2 + $0xd4]]  ;;  %v1028_v53 = vadd.f32 %v1027_v43, %v1026_v38  ;;  %v1075_v9 = vadd.f32 %v1070_v60, %v1069_v44  ;;  %v1076_v10 = vadd.f32 %v1072_v27, %v1071_v26  ;;  %v1109_v11 = vstv %s2980_s6 }
 0x266   :  { %s3014_s18 = sld [smem:[#allocation2 + $0xe0]]  ;;  %v1112_v21 = vstv %s2982_s2  ;;  %v1115_v48 = vstv %s2986_s7  ;;  %v1118_v3 = vstv %s2990_s11  ;;  %v1121_v63 = vadd.f32 %v1095_v35, %v1092_v61 }
 0x267   :  { %s3020_s23 = sld [smem:[#allocation2 + $0xec]]  ;;  %v1122_v31 = vadd.f32 %v1101_v23, %v1098_v6  ;;  %v1123_v46 = vadd.f32 %v1107_v1, %v1104_v33  ;;  %v1110_v19 = vmul.f32 %v1109_v11, %v2735_v59  ;;  %v1113_v14 = vmul.f32 %v1112_v21, %v2744_v16 }
 0x268   :  { %s3025_s1 = sld [smem:[#allocation2 + $0xf8]]  ;;  %v1116_v38 = vmul.f32 %v1115_v48, %v2746_v39  ;;  %v1119_v43 = vmul.f32 %v1118_v3, %v2755_v17  ;;  %v1077_v60 = vadd.f32 %v1074_v0, %v1073_v7  ;;  %v1078_v26 = vadd.f32 %v1076_v10, %v1075_v9 }
 0x269   :  { %v928_v4 = vstv %s3650_s15  ;;  %s3027_s8 = sld [smem:[#allocation2 + $0x104]]  ;;  %v1136_v8 = vstv %s3000_s20  ;;  %v1127_v29 = vadd.f32 %v1123_v46, %v1122_v31  ;;  %v1124_v32 = vadd.f32 %v1113_v14, %v1110_v19 }
 0x26a   :  { %s3030_s3 = sld [smem:[#allocation2 + $0x110]]  ;;  %v3054_v40 = vadd.f32 %v928_v4, %v926_v62  ;;  %v879_v4 = vmax.f32 %v3052_v50, 0.0  ;;  %v1120_v62 = vadd.f32 %v1089_v58, %v1086_v55  ;;  %v1139_v54 = vstv %s3004_s12 }
 0x26b   :  { %s3035_s16 = sld [smem:[#allocation2 + $0x11c]]  ;;  %v1142_v13 = vstv %s3008_s5  ;;  %v1125_v49 = vadd.f32 %v1119_v43, %v1116_v38  ;;  %v1079_v61 = vadd.f32 %v1078_v26, %v1077_v60 }
 0x26c   :  { %s3041_s22 = sld [smem:[#allocation2 + $0x128]]  ;;  %v930_v5 = vmax.f32 %v3054_v40, 0.0  ;;  %v1145_v27 = vstv %s3014_s18  ;;  %v1126_v28 = vadd.f32 %v1121_v63, %v1120_v62  ;;  %v1143_v55 = vmul.f32 %v1142_v13, %v2686_v20 }
 0x26d   :  { %s3047_s21 = sld [smem:[#allocation2 + $0x134]]  ;;  %v1148_v34 = vstv %s3020_s23  ;;  %v1146_v58 = vmul.f32 %v1145_v27, %v2689_v15  ;;  %v1128_v9 = vadd.f32 %v1125_v49, %v1124_v32 }
 0x26e   :  { %s3056_s13 = sld [smem:[#allocation2 + $0x140]]  ;;  %v1151_v12 = vstv %s3025_s1  ;;  %v1149_v6 = vmul.f32 %v1148_v34, %v2695_v18  ;;  %v1129_v33 = vadd.f32 %v1127_v29, %v1126_v28 }
 0x26f   :  { %s3062_s17 = sld [smem:[#allocation2 + $0x14c]]  ;;  %v1154_v36 = vstv %s3027_s8  ;;  %v1152_v23 = vmul.f32 %v1151_v12, %v2699_v25  ;;  %v1172_v3 = vadd.f32 %v1146_v58, %v1143_v55  ;;  %v1132_v12 = vstv %s2994_s10 }
 0x270   :  { %s3652_s4 = sld [smem:[#allocation19_spill]]  ;;  %v1157_v37 = vstv %s3030_s3  ;;  %v1155_v1 = vmul.f32 %v1154_v36, %v2727_v57  ;;  %v3166_v36 = vadd.f32 %v1129_v33, %v1128_v9 }
 0x271   :  { %s3653_s24 = sld [smem:[#allocation31_spill]]  ;;  %v1158_v7 = vmul.f32 %v1157_v37, %v2729_v56  ;;  %v1160_v0 = vstv %s3035_s16  ;;  %v1173_v63 = vadd.f32 %v1152_v23, %v1149_v6 }
 0x272   :  { %s3068_s14 = sld [smem:[#allocation2 + $0xbd]]  ;;  %v1163_v10 = vstv %s3041_s22  ;;  %v1161_v62 = vmul.f32 %v1160_v0, %v2735_v59 }
 0x273   :  { %s3070_s27 = sld [smem:[#allocation2 + $0xc9]]  ;;  %v1166_v11 = vstv %s3047_s21  ;;  %v1164_v19 = vmul.f32 %v1163_v10, %v2744_v16  ;;  %v1174_v43 = vadd.f32 %v1158_v7, %v1155_v1 }
 0x274   :  { %s3076_s19 = sld [smem:[#allocation2 + $0xd5]]  ;;  %v1169_v21 = vstv %s3056_s13  ;;  %v1167_v14 = vmul.f32 %v1166_v11, %v2746_v39 }
 0x275   :  { %s3082_s29 = sld [smem:[#allocation2 + $0xe1]]  ;;  %v1170_v38 = vmul.f32 %v1169_v21, %v2755_v17  ;;  %v3172_v55 = vadd.f32 %v1164_v19, %v1161_v62 }
 0x276   :  { %v979_v24 = vstv %s3652_s4  ;;  %s3084_s25 = sld [smem:[#allocation2 + $0xed]] }
 0x277   :  { %v1030_v41 = vstv %s3653_s24  ;;  %s3090_s0 = sld [smem:[#allocation2 + $0xf9]]  ;;  %v3092_v22 = vadd.f32 %v979_v24, %v977_v52  ;;  %v1137_v52 = vmul.f32 %v1136_v8, %v2678_v47  ;;  %v3174_v58 = vadd.f32 %v1170_v38, %v1167_v14 }
 0x278   :  { %v3094_v44 = vadd.f32 %v1030_v41, %v1028_v53  ;;  %s3096_s28 = sld [smem:[#allocation2 + $0x105]]  ;;  %v1140_v53 = vmul.f32 %v1139_v54, %v2681_v51  ;;  %v1187_v24 = vstv %s3068_s14 }
 0x279   :  { %s3102_s9 = sld [smem:[#allocation2 + $0x111]]  ;;  %v1190_v41 = vstv %s3070_s27  ;;  %v1188_v60 = vmul.f32 %v1187_v24, %v2678_v47  ;;  %v981_v13 = vmax.f32 %v3092_v22, 0.0 }
 0x27a   :  { %s3654_s30 = sld [smem:[#allocation22_spill]]  ;;  %v1171_v48 = vadd.f32 %v1140_v53, %v1137_v52  ;;  %v1193_v31 = vstv %s3076_s19  ;;  %v1191_v26 = vmul.f32 %v1190_v41, %v2681_v51  ;;  %v1032_v27 = vmax.f32 %v3094_v44, 0.0 }
 0x27b   :  { %s3106_s6 = sld [smem:[#allocation2 + $0x11d]]  ;;  %v1196_v46 = vstv %s3082_s29  ;;  %v1194_v28 = vmul.f32 %v1193_v31, %v2686_v20 }
 0x27c   :  { %s3110_s2 = sld [smem:[#allocation2 + $0x129]]  ;;  %v1199_v8 = vstv %s3084_s25  ;;  %v1197_v29 = vmul.f32 %v1196_v46, %v2689_v15  ;;  %v1177_v37 = vadd.f32 %v1172_v3, %v1171_v48 }
 0x27d   :  { %s3116_s7 = sld [smem:[#allocation2 + $0x135]]  ;;  %v1202_v54 = vstv %s3090_s0  ;;  %v1200_v52 = vmul.f32 %v1199_v8, %v2695_v18 }
 0x27e   :  { %s3121_s11 = sld [smem:[#allocation2 + $0x141]]  ;;  %v1205_v32 = vstv %s3096_s28  ;;  %v1203_v53 = vmul.f32 %v1202_v54, %v2699_v25  ;;  %v1223_v33 = vadd.f32 %v1197_v29, %v1194_v28 }
 0x27f   :  { %s3126_s20 = sld [smem:[#allocation2 + $0x14d]]  ;;  %v1208_v49 = vstv %s3102_s9  ;;  %v1206_v6 = vmul.f32 %v1205_v32, %v2727_v57 }
 0x280   :  { %v1081_v35 = vstv %s3654_s30  ;;  %s3131_s15 = sld [smem:[#allocation2 + $0xbe]]  ;;  %v1209_v23 = vmul.f32 %v1208_v49, %v2729_v56  ;;  %v1224_v21 = vadd.f32 %v1203_v53, %v1200_v52 }
 0x281   :  { %s3135_s12 = sld [smem:[#allocation2 + $0xca]]  ;;  %v3159_v34 = vadd.f32 %v1081_v35, %v1079_v61  ;;  %v1178_v61 = vadd.f32 %v1174_v43, %v1173_v63  ;;  %v1222_v35 = vadd.f32 %v1191_v26, %v1188_v60  ;;  %v1211_v7 = vstv %s3106_s6 }
 0x282   :  { %s3140_s5 = sld [smem:[#allocation2 + $0xd6]]  ;;  %v1214_v11 = vstv %s3110_s2  ;;  %v1212_v8 = vmul.f32 %v1211_v7, %v2735_v59  ;;  %v1225_v28 = vadd.f32 %v1209_v23, %v1206_v6 }
 0x283   :  { %s3145_s18 = sld [smem:[#allocation2 + $0xe2]]  ;;  %v1217_v24 = vstv %s3116_s7  ;;  %v1215_v54 = vmul.f32 %v1214_v11, %v2744_v16 }
 0x284   :  { %s3151_s23 = sld [smem:[#allocation2 + $0xee]]  ;;  %v1220_v41 = vstv %s3121_s11  ;;  %v1218_v32 = vmul.f32 %v1217_v24, %v2746_v39  ;;  %v1229_v24 = vadd.f32 %v1225_v28, %v1224_v21 }
 0x285   :  { %s3157_s1 = sld [smem:[#allocation2 + $0xfa]]  ;;  %v1221_v49 = vmul.f32 %v1220_v41, %v2755_v17 }
 0x286   :  { %s3164_s8 = sld [smem:[#allocation2 + $0x106]]  ;;  %v1238_v1 = vstv %s3131_s15 }
 0x287   :  { %s3170_s3 = sld [smem:[#allocation2 + $0x112]]  ;;  %v1241_v0 = vstv %s3135_s12  ;;  %v1239_v62 = vmul.f32 %v1238_v1, %v2678_v47  ;;  %v1180_v1 = vadd.f32 %v1178_v61, %v1177_v37 }
 0x288   :  { %s3176_s26 = sld [smem:[#allocation2 + $0x11e]]  ;;  %v1244_v9 = vstv %s3140_s5  ;;  %v1242_v31 = vmul.f32 %v1241_v0, %v2681_v51  ;;  %v1228_v0 = vadd.f32 %v1223_v33, %v1222_v35  ;;  %v1226_v35 = vadd.f32 %v1215_v54, %v1212_v8 }
 0x289   :  { %s3181_s16 = sld [smem:[#allocation2 + $0x12a]]  ;;  %v1247_v10 = vstv %s3145_s18  ;;  %v1245_v46 = vmul.f32 %v1244_v9, %v2686_v20  ;;  %v1227_v33 = vadd.f32 %v1221_v49, %v1218_v32 }
 0x28a   :  { %s3187_s22 = sld [smem:[#allocation2 + $0x136]]  ;;  %v1250_v48 = vstv %s3151_s23  ;;  %v1248_v19 = vmul.f32 %v1247_v10, %v2689_v15  ;;  %v1273_v7 = vadd.f32 %v1242_v31, %v1239_v62  ;;  %v1179_v62 = vadd.f32 %v3174_v58, %v3172_v55 }
 0x28b   :  { %v1253_v3 = vstv %s3157_s1  ;;  %s3192_s21 = sld [smem:[#allocation2 + $0x142]]  ;;  %v1251_v38 = vmul.f32 %v1250_v48, %v2695_v18  ;;  %v1231_v58 = vadd.f32 %v1229_v24, %v1228_v0 }
 0x28c   :  { %v1256_v63 = vstv %s3164_s8  ;;  %s3198_s13 = sld [smem:[#allocation2 + $0x14e]]  ;;  %v1254_v43 = vmul.f32 %v1253_v3, %v2699_v25  ;;  %v1274_v23 = vadd.f32 %v1248_v19, %v1245_v46 }
 0x28d   :  { %v1259_v14 = vstv %s3170_s3  ;;  %s3204_s4 = sld [smem:[#allocation2 + $0xbf]]  ;;  %v1257_v60 = vmul.f32 %v1256_v63, %v2727_v57 }
 0x28e   :  { %v1260_v26 = vmul.f32 %v1259_v14, %v2729_v56  ;;  %s3210_s24 = sld [smem:[#allocation2 + $0xcb]]  ;;  %v1262_v29 = vstv %s3176_s26  ;;  %v1275_v10 = vadd.f32 %v1254_v43, %v1251_v38  ;;  %v1279_v19 = vadd.f32 %v1274_v23, %v1273_v7 }
 0x28f   :  { %s3215_s14 = sld [smem:[#allocation2 + $0xd7]]  ;;  %v1265_v52 = vstv %s3181_s16  ;;  %v1263_v6 = vmul.f32 %v1262_v29, %v2735_v59 }
 0x290   :  { %v1268_v53 = vstv %s3187_s22  ;;  %s3221_s27 = sld [smem:[#allocation2 + $0xe3]]  ;;  %v1276_v11 = vadd.f32 %v1260_v26, %v1257_v60  ;;  %v1266_v48 = vmul.f32 %v1265_v52, %v2744_v16 }
 0x291   :  { %v1271_v9 = vstv %s3192_s21  ;;  %s3224_s19 = sld [smem:[#allocation2 + $0xef]]  ;;  %v1269_v3 = vmul.f32 %v1268_v53, %v2746_v39 }
 0x292   :  { %s3227_s29 = sld [smem:[#allocation2 + $0xfb]]  ;;  %v1272_v37 = vmul.f32 %v1271_v9, %v2755_v17  ;;  %v1280_v14 = vadd.f32 %v1276_v11, %v1275_v10  ;;  %v1277_v43 = vadd.f32 %v1266_v48, %v1263_v6  ;;  %v1181_v9 = vadd.f32 %v1180_v1, %v1179_v62 }
 0x293   :  { %v1289_v61 = vstv %s3204_s4  ;;  %s3233_s25 = sld [smem:[#allocation2 + $0x107]] }
 0x294   :  { %v1292_v41 = vstv %s3210_s24  ;;  %s3236_s0 = sld [smem:[#allocation2 + $0x113]]  ;;  %v1290_v63 = vmul.f32 %v1289_v61, %v2678_v47  ;;  %v1278_v60 = vadd.f32 %v1272_v37, %v1269_v3  ;;  %v1282_v32 = vadd.f32 %v1280_v14, %v1279_v19 }
 0x295   :  { %v1293_v31 = vmul.f32 %v1292_v41, %v2681_v51  ;;  %v1295_v46 = vstv %s3215_s14  ;;  %s3243_s28 = sld [smem:[#allocation2 + $0x11f]]  ;;  %v1230_v51 = vadd.f32 %v1227_v33, %v1226_v35  ;;  %v1234_v3 = vstv %s3126_s20 }
 0x296   :  { %v1296_v21 = vmul.f32 %v1295_v46, %v2686_v20  ;;  %v1298_v38 = vstv %s3221_s27  ;;  %s3247_s9 = sld [smem:[#allocation2 + $0x12b]]  ;;  %v1083_v33 = vmax.f32 %v3159_v34, 0.0  ;;  %v1285_v41 = vstv %s3198_s13 }
 0x297   :  { %v1299_v55 = vmul.f32 %v1298_v38, %v2689_v15  ;;  %v1301_v47 = vstv %s3224_s19  ;;  %s3251_s30 = sld [smem:[#allocation2 + $0x137]]  ;;  %v1324_v28 = vadd.f32 %v1293_v31, %v1290_v63  ;;  %v1183_v15 = vstv %s3062_s17 }
 0x298   :  { %v1302_v26 = vmul.f32 %v1301_v47, %v2695_v18  ;;  %v1304_v8 = vstv %s3227_s29  ;;  %s3255_s6 = sld [smem:[#allocation2 + $0x143]]  ;;  %v1281_v18 = vadd.f32 %v1278_v60, %v1277_v43  ;;  %v1232_v7 = vadd.f32 %v1231_v58, %v1230_v51 }
 0x299   :  { %v1305_v20 = vmul.f32 %v1304_v8, %v2699_v25  ;;  %v1307_v54 = vstv %s3233_s25  ;;  %v1325_v29 = vadd.f32 %v1299_v55, %v1296_v21  ;;  %s3259_s2 = sld [smem:[#allocation2 + $0x14f]]  ;;  %v1184_v24 = vadd.f32 %v1183_v15, %v1181_v9 }
 0x29a   :  { %v1308_v49 = vmul.f32 %v1307_v54, %v2727_v57  ;;  %v1310_v52 = vstv %s3236_s0  ;;  %s3264_s7 = sld [smem:[#allocation2 + $0x150]]  ;;  %v1283_v37 = vadd.f32 %v1282_v32, %v1281_v18 }
 0x29b   :  { %v1311_v53 = vmul.f32 %v1310_v52, %v2729_v56  ;;  %v1313_v25 = vstv %s3243_s28  ;;  %v1326_v0 = vadd.f32 %v1305_v20, %v1302_v26  ;;  %s3268_s11 = sld [smem:[#allocation2 + $0x151]]  ;;  %v1330_v48 = vadd.f32 %v1325_v29, %v1324_v28 }
 0x29c   :  { %v1314_v6 = vmul.f32 %v1313_v25, %v2735_v59  ;;  %v1316_v23 = vstv %s3247_s9  ;;  %s3272_s17 = sld [smem:[#allocation2 + $0x152]]  ;;  %v1133_v56 = vadd.f32 %v1132_v12, %v3166_v36  ;;  %v1286_v19 = vadd.f32 %v1285_v41, %v1283_v37 }
 0x29d   :  { %v1317_v57 = vmul.f32 %v1316_v23, %v2744_v16  ;;  %v1319_v10 = vstv %s3251_s30  ;;  %v1327_v11 = vadd.f32 %v1311_v53, %v1308_v49  ;;  %s3276_s15 = sld [smem:[#allocation2 + $0x153]]  ;;  %v1185_v43 = vmax.f32 %v1184_v24, 0.0 }
 0x29e   :  { %v1320_v1 = vmul.f32 %v1319_v10, %v2746_v39  ;;  %v1322_v59 = vstv %s3255_s6  ;;  %s3284_s12 = sld [smem:[#allocation2 + $0x154]]  ;;  %v1235_v39 = vadd.f32 %v1234_v3, %v1232_v7  ;;  %v1287_v26 = vmax.f32 %v1286_v19, 0.0 }
 0x29f   :  { %v1323_v16 = vmul.f32 %v1322_v59, %v2755_v17  ;;  %v1328_v61 = vadd.f32 %v1317_v57, %v1314_v6  ;;  %v1331_v35 = vadd.f32 %v1327_v11, %v1326_v0  ;;  %s3287_s5 = sld [smem:[#allocation2 + $0x155]]  ;;  %v1134_v17 = vmax.f32 %v1133_v56, 0.0 }
 0x2a0   :  { %v1340_v12 = vstv %s3264_s7  ;;  %s3292_s10 = sld [smem:[#allocation2 + $0x156]]  ;;  %v1336_v60 = vstv %s3259_s2  ;;  %v1236_v30 = vmax.f32 %v1235_v39, 0.0 }
 0x2a1   :  { %v1329_v36 = vadd.f32 %v1323_v16, %v1320_v1  ;;  %v1333_v62 = vadd.f32 %v1331_v35, %v1330_v48  ;;  %v1343_v63 = vstv %s3268_s11  ;;  %s1748_s20 = sld [smem:[#allocation2 + $0x157]]  ;;  %v1341_v31 = vmul.f32 %v1340_v12, %v777_v2 }
 0x2a2   :  { %v1344_v34 = vmul.f32 %v1343_v63, %v828_v45  ;;  %v1346_v46 = vstv %s3272_s17  ;;  %s1749_s18 = sld [smem:[#allocation2 + $0x158]] }
 0x2a3   :  { %v1332_v14 = vadd.f32 %v1329_v36, %v1328_v61  ;;  %v1347_v21 = vmul.f32 %v1346_v46, %v879_v4  ;;  %v1349_v38 = vstv %s3276_s15  ;;  %s1750_s23 = sld [smem:[#allocation2 + $0x159]] }
 0x2a4   :  { %v1350_v42 = vmul.f32 %v1349_v38, %v930_v5  ;;  %v1352_v2 = vstv %s3284_s12  ;;  %s1751_s1 = sld [smem:[#allocation2 + $0x15a]]  ;;  %v1375_v51 = vadd.f32 %v1344_v34, %v1341_v31 }
 0x2a5   :  { %v1334_v45 = vadd.f32 %v1333_v62, %v1332_v14  ;;  %v1353_v55 = vmul.f32 %v1352_v2, %v981_v13  ;;  %v1355_v47 = vstv %s3287_s5  ;;  %s1752_s8 = sld [smem:[#allocation2 + $0x15b]] }
 0x2a6   :  { %v1356_v50 = vmul.f32 %v1355_v47, %v1032_v27  ;;  %v1358_v4 = vstv %s3292_s10  ;;  %v1376_v58 = vadd.f32 %v1350_v42, %v1347_v21  ;;  %s1404_s3 = sld [smem:[#allocation2 + $0x15e]] }
 0x2a7   :  { %v1337_v8 = vadd.f32 %v1336_v60, %v1334_v45  ;;  %v1359_v40 = vmul.f32 %v1358_v4, %v1083_v33  ;;  %s3655_s26 = sld [smem:[#allocation5_spill]]  ;;  %v1361_v5 = vstv %s1748_s20 }
 0x2a8   :  { %v1362_v20 = vmul.f32 %v1361_v5, %v1134_v17  ;;  %v1364_v54 = vstv %s1749_s18  ;;  %v1377_v28 = vadd.f32 %v1356_v50, %v1353_v55  ;;  %s1405_s16 = sld [smem:[#allocation2 + $0x15c]]  ;;  %v1381_v27 = vadd.f32 %v1376_v58, %v1375_v51 }
 0x2a9   :  { %v1338_v22 = vmax.f32 %v1337_v8, 0.0  ;;  %v1365_v13 = vmul.f32 %v1364_v54, %v1185_v43  ;;  %v1367_v29 = vstv %s1750_s23  ;;  %s3656_s13 = sld [smem:[#allocation77_spill]] }
 0x2aa   :  { %v1368_v15 = vmul.f32 %v1367_v29, %v1236_v30  ;;  %v1370_v32 = vstv %s1751_s1  ;;  %v1378_v44 = vadd.f32 %v1362_v20, %v1359_v40  ;;  %s3657_s14 = sld [smem:[#allocation78_spill]] }
 0x2ab   :  { %v1371_v49 = vmul.f32 %v1370_v32, %v1287_v26  ;;  %v1373_v52 = vstv %s1752_s8 }
 0x2ac   :  { %v1374_v25 = vmul.f32 %v1373_v52, %v1338_v22  ;;  %v1379_v0 = vadd.f32 %v1368_v15, %v1365_v13  ;;  %v1382_v9 = vadd.f32 %v1378_v44, %v1377_v28  ;;  %v1391_v57 = vstv %s1404_s3 }
 0x2ad   :  { %v1389_v53 = vstv %s3655_s26 }
 0x2ae   :  { %v1380_v7 = vadd.f32 %v1374_v25, %v1371_v49  ;;  %v1384_v6 = vadd.f32 %v1382_v9, %v1381_v27  ;;  %v1386_v11 = vstv %s1405_s16 }
 0x2af   :  { %v1388_v18 = vld [vmem:[%s3656_s13] sm:$0xff] }
 0x2b0   :  { %v1390_v23 = vmul.f32 %v1389_v53, %v1388_v18  ;;  %v1383_v10 = vadd.f32 %v1380_v7, %v1379_v0 }
 0x2b2   :  { %v1385_v48 = vadd.f32 %v1384_v6, %v1383_v10  ;;  %v1392_v56 = vsub.f32 %v1390_v23, %v1391_v57 }
 0x2b4   :  { %v1387_v3 = vadd.f32 %v1386_v11, %v1385_v48 }
 0x2b6   :  { %v1393_v1 = vsub.f32 %v1392_v56, %v1387_v3 }
 0x2b8   :  { %v1394_v59 = vmul.f32 %v1393_v1, %v1393_v1 }
 0x2ba   :  { %v1395_v37 = vmul.f32 -0.5, %v1394_v59 }
 0x2bc   :  { %v1753_v16 = vadd.f32 -0.9189385, %v1395_v37 }
 0x2be   :  { %1397 = vst [vmem:[%s3657_s14] sm:$0xff] %v1753_v16 }
 0x2bf   :  { %1402 = vsyncpa [#allocation3], 1 }

</bundles_post_ra>
